<compile_context>
chip_gen: v7x
topology: tpu7x:2x2x1
jax: 0.10.0
libtpu: 0.0.40
codegen_flags: <defaults>
</compile_context>

<pallas_src>
import functools

import jax
import jax.numpy as jnp
from jax import lax
from jax.experimental import pallas as pl
from jax.experimental.pallas import tpu as pltpu


# ----------------------------- helpers ---------------------------------------

def _round_up(x, m):
    return (x + m - 1) // m * m


@functools.lru_cache(maxsize=None)
def _vmem_budget_bytes():
    """~75% of per-core VMEM (≈48 MiB on v7x, ≈96 MiB on v5e/v6e)."""
    try:
        cap = int(pltpu.get_tpu_info().vmem_capacity_bytes)
    except Exception:
        cap = 64 * 1024 * 1024  # conservative fallback, safe on all generations
    return cap * 3 // 4


def _pick_tile(dim, candidates):
    # Largest candidate that exactly divides dim; else the full dim.
    for c in candidates:
        if dim >= c and dim % c == 0:
            return c
    return dim


# ----------------------------- tiled projection matmul -----------------------

def _proj_kernel(x_ref, w_ref, o_ref, acc_ref):
    @pl.when(pl.program_id(2) == 0)
    def _():
        acc_ref[...] = jnp.zeros_like(acc_ref)

    acc_ref[...] += jnp.dot(x_ref[...], w_ref[...],
                            preferred_element_type=jnp.float32)

    @pl.when(pl.program_id(2) == pl.num_programs(2) - 1)
    def _():
        o_ref[...] = acc_ref[...].astype(o_ref.dtype)


def _proj_bias_kernel(x_ref, w_ref, b_ref, o_ref, acc_ref):
    @pl.when(pl.program_id(2) == 0)
    def _():
        acc_ref[...] = jnp.zeros_like(acc_ref)

    acc_ref[...] += jnp.dot(x_ref[...], w_ref[...],
                            preferred_element_type=jnp.float32)

    @pl.when(pl.program_id(2) == pl.num_programs(2) - 1)
    def _():
        o_ref[...] = (acc_ref[...] + b_ref[...]).astype(o_ref.dtype)


def pallas_matmul(x, w, bias=None, *, out_dtype=jnp.float32):
    """y = x @ w (+ bias). bf16 MXU operands, f32 accumulation, tiled+pipelined."""
    M, K = x.shape
    K2, N = w.shape
    assert K == K2
    x = x.astype(jnp.bfloat16)
    w = w.astype(jnp.bfloat16)
    vmem_limit = _vmem_budget_bytes()

    tm = _pick_tile(M, (1024, 512, 256, 128, 64, 32, 16, 8))
    tn = _pick_tile(N, (1024, 512, 256, 128))
    tk = _pick_tile(K, (512, 256, 128))
    grid = (M // tm, N // tn, K // tk)

    out_bytes = jnp.dtype(out_dtype).itemsize
    flops = 2 * M * N * K
    # Count grid re-reads: x is streamed once per output-column tile, w once per
    # output-row tile (advisory scheduler hint).
    bytes_accessed = (M * K * 2 * (N // tn)
                      + K * N * 2 * (M // tm)
                      + M * N * out_bytes)

    in_specs = [
        pl.BlockSpec((tm, tk), lambda i, j, k: (i, k)),
        pl.BlockSpec((tk, tn), lambda i, j, k: (k, j)),
    ]
    args = (x, w)
    kernel = _proj_kernel
    if bias is not None:
        in_specs.append(pl.BlockSpec((1, tn), lambda i, j, k: (0, j)))
        args = (x, w, bias.reshape(1, N).astype(jnp.float32))
        kernel = _proj_bias_kernel
        bytes_accessed += N * 4 * (M // tm)

    return pl.pallas_call(
        kernel,
        out_shape=jax.ShapeDtypeStruct((M, N), out_dtype),
        grid=grid,
        in_specs=in_specs,
        out_specs=pl.BlockSpec((tm, tn), lambda i, j, k: (i, j)),
        scratch_shapes=[pltpu.VMEM((tm, tn), jnp.float32)],
        compiler_params=pltpu.CompilerParams(
            dimension_semantics=("parallel", "parallel", "arbitrary"),
            vmem_limit_bytes=vmem_limit),
        cost_estimate=pl.CostEstimate(flops=flops, transcendentals=0,
                                      bytes_accessed=bytes_accessed),
    )(*args)


# ----------------------------- attention kernel ------------------------------

def _attention_kernel(q_ref, k_ref, v_ref, o_ref, attn_ref, *,
                      heads_per_group, dim_head, n_valid):
    # q_ref: (1, tq, G*d)   k_ref/v_ref: (1, Nk, G*d)   (bf16, q pre-scaled)
    # o_ref: (1, tq, G*d)   attn_ref:   (1, G, tq, Nk)
    tq = q_ref.shape[1]
    nk = k_ref.shape[1]
    needs_mask = n_valid < nk
    if needs_mask:
        key_valid = lax.broadcasted_iota(jnp.int32, (tq, nk), 1) < n_valid

    for h in range(heads_per_group):          # static unroll over grouped heads
        lo, hi = h * dim_head, (h + 1) * dim_head
        q = q_ref[0, :, lo:hi]                # (tq, d) bf16, already scaled
        k = k_ref[0, :, lo:hi]                # (nk, d) bf16
        v = v_ref[0, :, lo:hi]                # (nk, d) bf16

        # q @ k^T without materializing a transpose.
        dots = lax.dot_general(q, k, (((1,), (1,)), ((), ())),
                               preferred_element_type=jnp.float32)   # (tq, nk)
        if needs_mask:
            dots = jnp.where(key_valid, dots, -1e30)

        m = jnp.max(dots, axis=-1, keepdims=True)
        e = jnp.exp(dots - m)   # TODO(synk): bf16 exp on v6e/v7x EUP (keep f32 on v5e)
        s = jnp.sum(e, axis=-1, keepdims=True)
        attn = e * pl.reciprocal(s, approx=True)                      # EUP, ~free

        attn_ref[0, h] = attn.astype(attn_ref.dtype)
        o_ref[0, :, lo:hi] = jnp.dot(attn.astype(jnp.bfloat16), v,
                                     preferred_element_type=jnp.float32
                                     ).astype(o_ref.dtype)
    # TODO(synk): flash-style kv-tiled variant (no attn materialization) for
    # callers that only need `out` at very large N.


def _head_group(heads, dim_head):
    """Smallest G dividing heads with G*dim_head a multiple of 128, else None."""
    for g in range(1, heads + 1):
        if heads % g == 0 and (g * dim_head) % 128 == 0:
            return g
    return None


def _pick_q_tile(n_pad, cw, g, attn_itemsize, budget):
    """Largest q tile whose per-step VMEM footprint fits the budget."""
    for tq in (512, 256, 128, 64, 32, 16, 8):
        if tq > n_pad or n_pad % tq:
            continue
        use = (2 * 2 * tq * cw * 2                      # q + o blocks (bf16, x2 buf)
               + 2 * 2 * n_pad * cw * 2                 # k + v blocks (bf16, x2 buf)
               + 2 * g * tq * n_pad * attn_itemsize     # attn out block (x2 buf)
               + 6 * tq * n_pad * 4)                    # f32 softmax temporaries
        if use <= budget:
            return tq
    return 8


def pallas_attention(qkv, *, b, n_valid, n_pad, heads, dim_head,
                     attn_dtype=jnp.float32, out_dtype=jnp.bfloat16):
    """qkv: (b, n_pad, 3*inner) bf16, token-major, q columns pre-scaled.

    Returns out (b, n_pad, inner) [out_dtype] and attn (b, heads, n_pad, n_pad)
    [attn_dtype]. Token-major throughout: no head transposes needed.
    """
    inner = heads * dim_head
    budget = _vmem_budget_bytes()

    g = _head_group(heads, dim_head)
    if g is not None:
        # Head-grouped path: 128-multiple column groups sliced straight out of
        # the fused qkv array via index_map block offsets (no q/k/v split).
        cw = g * dim_head
        n_groups = heads // g
        q_arr = k_arr = v_arr = qkv
        q_off, k_off, v_off = 0, n_groups, 2 * n_groups
    else:
        # Small-dim fallback (inner not groupable into 128-lane columns): split
        # qkv and run all heads as one group with full-width (== inner) blocks.
        g, cw, n_groups = heads, inner, 1
        q_arr = qkv[:, :, :inner]
        k_arr = qkv[:, :, inner:2 * inner]
        v_arr = qkv[:, :, 2 * inner:]
        q_off = k_off = v_off = 0

    attn_bytes = jnp.dtype(attn_dtype).itemsize
    tq = _pick_q_tile(n_pad, cw, g, attn_bytes, budget)
    grid = (b, n_groups, n_pad // tq)   # qi innermost: k/v blocks reused across q tiles

    q_spec = pl.BlockSpec((1, tq, cw), lambda bi, gi, qi: (bi, qi, q_off + gi))
    k_spec = pl.BlockSpec((1, n_pad, cw), lambda bi, gi, qi: (bi, 0, k_off + gi))
    v_spec = pl.BlockSpec((1, n_pad, cw), lambda bi, gi, qi: (bi, 0, v_off + gi))
    o_spec = pl.BlockSpec((1, tq, cw), lambda bi, gi, qi: (bi, qi, gi))
    a_spec = pl.BlockSpec((1, g, tq, n_pad), lambda bi, gi, qi: (bi, gi, qi, 0))

    kernel = functools.partial(_attention_kernel, heads_per_group=g,
                               dim_head=dim_head, n_valid=n_valid)

    flops = 4 * b * heads * n_pad * n_pad * dim_head
    bytes_accessed = (b * n_pad * inner * 2                      # q read
                      + 2 * b * n_pad * inner * 2                # k, v read
                      + b * n_pad * inner * jnp.dtype(out_dtype).itemsize
                      + b * heads * n_pad * n_pad * attn_bytes)  # attn writeback

    return pl.pallas_call(
        kernel,
        out_shape=(jax.ShapeDtypeStruct((b, n_pad, inner), out_dtype),
                   jax.ShapeDtypeStruct((b, heads, n_pad, n_pad), attn_dtype)),
        grid=grid,
        in_specs=[q_spec, k_spec, v_spec],
        out_specs=(o_spec, a_spec),
        compiler_params=pltpu.CompilerParams(
            dimension_semantics=("parallel", "parallel", "parallel"),
            vmem_limit_bytes=budget),
        cost_estimate=pl.CostEstimate(flops=flops,
                                      transcendentals=b * heads * n_pad * n_pad,
                                      bytes_accessed=bytes_accessed),
    )(q_arr, k_arr, v_arr)


# ----------------------------- module forward --------------------------------

def init_params(key, dim_in, dim_out, heads, dim_head):
    inner = heads * dim_head
    k1, k2, k3, k4 = jax.random.split(key, 4)
    # Conv2d 1x1 weights stored pre-transposed as (in_c, out_c).
    wq = jax.random.normal(k1, (dim_in, inner), jnp.float32) * (dim_in ** -0.5)
    wkv = jax.random.normal(k2, (dim_in, 2 * inner), jnp.float32) * (dim_in ** -0.5)
    wo = jax.random.normal(k3, (inner, dim_out), jnp.float32) * (inner ** -0.5)
    bo = jax.random.normal(k4, (dim_out,), jnp.float32) * 0.01
    return dict(wq=wq, wkv=wkv, wo=wo, bo=bo)


def attention2d_forward(x, params, *, heads, dim_head, attn_dtype=jnp.float32):
    # k=1, mask=None, dropout=0 path of the PyTorch module.
    # TODO(synk): k>1 (strided kxk conv for kv) would need patch extraction.
    b, c, H, W = x.shape
    N = H * W
    inner = heads * dim_head
    scale = dim_head ** (-0.5)
    n_pad = _round_up(N, 128)

    # NCHW -> token-major (b, N, c); pad tokens to a multiple of 128 so all
    # attention blocks are lane/sublane aligned at any resolution.
    x_tok = x.reshape(b, c, N).transpose(0, 2, 1)
    if n_pad != N:
        x_tok = jnp.pad(x_tok, ((0, 0), (0, n_pad - N), (0, 0)))
    x_tok = x_tok.reshape(b * n_pad, c)

    # Fused Q/KV projection (x read once); softmax scale folded into wq (free).
    w_qkv = jnp.concatenate([params["wq"] * scale, params["wkv"]], axis=1)
    qkv = pallas_matmul(x_tok, w_qkv, out_dtype=jnp.bfloat16)   # (b*n_pad, 3*inner)
    qkv = qkv.reshape(b, n_pad, 3 * inner)

    out_tok, attn = pallas_attention(qkv, b=b, n_valid=N, n_pad=n_pad,
                                     heads=heads, dim_head=dim_head,
                                     attn_dtype=attn_dtype)

    # out_tok is already token-major (b, n_pad, inner): feed to_out directly.
    out_proj = pallas_matmul(out_tok.reshape(b * n_pad, inner),
                             params["wo"], params["bo"], out_dtype=jnp.float32)
    dim_out = params["wo"].shape[1]
    out = out_proj.reshape(b, n_pad, dim_out)
    if n_pad != N:
        out = out[:, :N]
        attn = attn[:, :, :N, :N]
    out = out.transpose(0, 2, 1).reshape(b, dim_out, H, W)
    return out, attn


# ----------------------------- reference (pure JAX) ---------------------------

def reference_forward(x, params, *, heads, dim_head):
    b, c, H, W = x.shape
    N = H * W
    inner = heads * dim_head
    scale = dim_head ** (-0.5)
    x_tok = x.reshape(b, c, N).transpose(0, 2, 1)                    # (b, N, c)
    q = jnp.einsum('bnc,ci->bni', x_tok, params["wq"])
    kv = jnp.einsum('bnc,ci->bni', x_tok, params["wkv"])
    k_, v_ = kv[..., :inner], kv[..., inner:]

    def split(t):
        return t.reshape(b, N, heads, dim_head).transpose(0, 2, 1, 3)

    q, k_, v_ = split(q), split(k_), split(v_)
    dots = jnp.einsum('bhid,bhjd->bhij', q, k_) * scale
    attn = jax.nn.softmax(dots, axis=-1)
    out = jnp.einsum('bhij,bhjd->bhid', attn, v_)
    out = out.transpose(0, 2, 1, 3).reshape(b, N, inner)
    out = jnp.einsum('bni,io->bno', out, params["wo"]) + params["bo"]
    out = out.transpose(0, 2, 1).reshape(b, -1, H, W)
    return out, attn


if __name__ == "__main__":
    key = jax.random.PRNGKey(0)

    # Config 1: module-default small shapes (fallback single-group path, N % 128 == 0).
    # Config 2: head-grouped path (G*dim_head = 128) + token padding/masking (N = 144).
    configs = [
        dict(b=2, dim_in=4, H=16, W=16, heads=2, dim_head=8),
        dict(b=1, dim_in=8, H=12, W=12, heads=2, dim_head=64),
    ]

    for cfg in configs:
        key, kx, kp = jax.random.split(key, 3)
        b, dim_in, H, W = cfg["b"], cfg["dim_in"], cfg["H"], cfg["W"]
        heads, dim_head = cfg["heads"], cfg["dim_head"]
        dim_out = dim_in  # module default: dim_out = dim_in

        x = jax.random.normal(kx, (b, dim_in, H, W), jnp.float32)
        params = init_params(kp, dim_in, dim_out, heads, dim_head)

        fwd = jax.jit(functools.partial(attention2d_forward,
                                        heads=heads, dim_head=dim_head))
        out, attn = fwd(x, params)
        jax.block_until_ready(out)
        jax.block_until_ready(attn)

        assert out.shape == (b, dim_out, H, W)
        assert attn.shape == (b, heads, H * W, H * W)
        assert bool(jnp.all(jnp.isfinite(out))) and bool(jnp.all(jnp.isfinite(attn)))

        # Loose tolerance: bf16 MXU operands + approx reciprocal vs f32 reference.
        out_ref, attn_ref = reference_forward(x, params, heads=heads, dim_head=dim_head)
        err_out = float(jnp.max(jnp.abs(out - out_ref)))
        err_attn = float(jnp.max(jnp.abs(attn - attn_ref)))
        assert err_out < 5e-2, f"{cfg}: out max abs err {err_out}"
        assert err_attn < 5e-2, f"{cfg}: attn max abs err {err_attn}"

    print("KERNEL_OK")
</pallas_src>

<mosaic_0001>
module attributes {stable_mosaic.version = 11 : i64} {
  func.func @_proj_kernel(%arg0: i32, %arg1: i32, %arg2: i32, %arg3: memref<512x4xbf16, #tpu.memory_space<vmem>>, %arg4: memref<4x48xbf16, #tpu.memory_space<vmem>>, %arg5: memref<512x48xbf16, #tpu.memory_space<vmem>>, %arg6: memref<512x48xf32, #tpu.memory_space<vmem>>) attributes {dimension_semantics = [#tpu.dimension_semantics<parallel>, #tpu.dimension_semantics<parallel>, #tpu.dimension_semantics<arbitrary>], iteration_bounds = array<i64: 1, 1, 1>, scalar_prefetch = 0 : i64, scratch_operands = 1 : i64, tpu.core_type = #tpu.core_type<tc>, window_params = [{transform_indices = @transform_0, window_bounds = array<i64: 512, 4>}, {transform_indices = @transform_1, window_bounds = array<i64: 4, 48>}, {transform_indices = @transform_2, window_bounds = array<i64: 512, 48>}]} {
    %c0_i32 = arith.constant 0 : i32
    %0 = arith.cmpi eq, %arg2, %c0_i32 : i32
    %1 = arith.extui %0 : i1 to i32
    %c0_i32_0 = arith.constant 0 : i32
    %2 = arith.cmpi ne, %1, %c0_i32_0 : i32
    scf.if %2 {
      %cst_10 = arith.constant 0.000000e+00 : f32
      %12 = vector.broadcast %cst_10 : f32 to vector<512x48xf32>
      %c0_11 = arith.constant 0 : index
      %c0_12 = arith.constant 0 : index
      %13 = vector.load %arg6[%c0_11, %c0_12] : memref<512x48xf32, #tpu.memory_space<vmem>>, vector<512x48xf32>
      tpu.vector_store %arg6[%c0_11, %c0_12], %12 {strides = array<i32>} : memref<512x48xf32, #tpu.memory_space<vmem>>, vector<512x48xf32>,
    } else {
    }
    %c0 = arith.constant 0 : index
    %c0_1 = arith.constant 0 : index
    %3 = vector.load %arg6[%c0, %c0_1] : memref<512x48xf32, #tpu.memory_space<vmem>>, vector<512x48xf32>
    %c0_2 = arith.constant 0 : index
    %c0_3 = arith.constant 0 : index
    %4 = vector.load %arg3[%c0_2, %c0_3] : memref<512x4xbf16, #tpu.memory_space<vmem>>, vector<512x4xbf16>
    %c0_4 = arith.constant 0 : index
    %c0_5 = arith.constant 0 : index
    %5 = vector.load %arg4[%c0_4, %c0_5] : memref<4x48xbf16, #tpu.memory_space<vmem>>, vector<4x48xbf16>
    %cst = arith.constant dense<0.000000e+00> : vector<512x48xf32>
    %6 = tpu.matmul %4, %5, %cst {dimension_numbers = #tpu.dot_dimension_numbers<[1], [0], [0], [1], [0, 0, 1, 1], [], []>} : vector<512x4xbf16>, vector<4x48xbf16>, vector<512x48xf32> -> vector<512x48xf32>
    %7 = arith.addf %3, %6 : vector<512x48xf32>
    %c0_6 = arith.constant 0 : index
    %c0_7 = arith.constant 0 : index
    %8 = vector.load %arg6[%c0_6, %c0_7] : memref<512x48xf32, #tpu.memory_space<vmem>>, vector<512x48xf32>
    tpu.vector_store %arg6[%c0_6, %c0_7], %7 {strides = array<i32>} : memref<512x48xf32, #tpu.memory_space<vmem>>, vector<512x48xf32>,
    %c0_i32_8 = arith.constant 0 : i32
    %9 = arith.cmpi eq, %arg2, %c0_i32_8 : i32
    %10 = arith.extui %9 : i1 to i32
    %c0_i32_9 = arith.constant 0 : i32
    %11 = arith.cmpi ne, %10, %c0_i32_9 : i32
    scf.if %11 {
      %c0_10 = arith.constant 0 : index
      %c0_11 = arith.constant 0 : index
      %12 = vector.load %arg6[%c0_10, %c0_11] : memref<512x48xf32, #tpu.memory_space<vmem>>, vector<512x48xf32>
      %13 = arith.truncf %12 : vector<512x48xf32> to vector<512x48xbf16>
      %c0_12 = arith.constant 0 : index
      %c0_13 = arith.constant 0 : index
      %14 = vector.load %arg5[%c0_12, %c0_13] : memref<512x48xbf16, #tpu.memory_space<vmem>>, vector<512x48xbf16>
      tpu.vector_store %arg5[%c0_12, %c0_13], %13 {strides = array<i32>} : memref<512x48xbf16, #tpu.memory_space<vmem>>, vector<512x48xbf16>,
    } else {
    }
    return
  }
  func.func @transform_0(%arg0: i32, %arg1: i32, %arg2: i32) -> (i32, i32) {
    %c0_i32 = arith.constant 0 : i32
    return %arg0, %arg2 : i32, i32
  }
  func.func @transform_1(%arg0: i32, %arg1: i32, %arg2: i32) -> (i32, i32) {
    %c0_i32 = arith.constant 0 : i32
    return %arg2, %arg1 : i32, i32
  }
  func.func @transform_2(%arg0: i32, %arg1: i32, %arg2: i32) -> (i32, i32) {
    %c0_i32 = arith.constant 0 : i32
    return %arg0, %arg1 : i32, i32
  }
}

module attributes {stable_mosaic.version = 11 : i64} {
  func.func @_attention_kernel(%arg0: i32, %arg1: i32, %arg2: i32, %arg3: memref<1x256x16xbf16, #tpu.memory_space<vmem>>, %arg4: memref<1x256x16xbf16, #tpu.memory_space<vmem>>, %arg5: memref<1x256x16xbf16, #tpu.memory_space<vmem>>, %arg6: memref<1x256x16xbf16, #tpu.memory_space<vmem>>, %arg7: memref<1x2x256x256xf32, #tpu.memory_space<vmem>>) attributes {dimension_semantics = [#tpu.dimension_semantics<parallel>, #tpu.dimension_semantics<parallel>, #tpu.dimension_semantics<parallel>], iteration_bounds = array<i64: 2, 1, 1>, scalar_prefetch = 0 : i64, scratch_operands = 0 : i64, tpu.core_type = #tpu.core_type<tc>, window_params = [{transform_indices = @transform_0, window_bounds = array<i64: 1, 256, 16>}, {transform_indices = @transform_1, window_bounds = array<i64: 1, 256, 16>}, {transform_indices = @transform_2, window_bounds = array<i64: 1, 256, 16>}, {transform_indices = @transform_3, window_bounds = array<i64: 1, 256, 16>}, {transform_indices = @transform_4, window_bounds = array<i64: 1, 2, 256, 256>}]} {
    %c0 = arith.constant 0 : index
    %c0_0 = arith.constant 0 : index
    %c0_1 = arith.constant 0 : index
    %0 = vector.load %arg3[%c0, %c0_0, %c0_1] : memref<1x256x16xbf16, #tpu.memory_space<vmem>>, vector<1x256x8xbf16>
    %1 = vector.shape_cast %0 : vector<1x256x8xbf16> to vector<256x8xbf16>
    %c0_2 = arith.constant 0 : index
    %c0_3 = arith.constant 0 : index
    %c0_4 = arith.constant 0 : index
    %2 = vector.load %arg4[%c0_2, %c0_3, %c0_4] : memref<1x256x16xbf16, #tpu.memory_space<vmem>>, vector<1x256x8xbf16>
    %3 = vector.shape_cast %2 : vector<1x256x8xbf16> to vector<256x8xbf16>
    %c0_5 = arith.constant 0 : index
    %c0_6 = arith.constant 0 : index
    %c0_7 = arith.constant 0 : index
    %4 = vector.load %arg5[%c0_5, %c0_6, %c0_7] : memref<1x256x16xbf16, #tpu.memory_space<vmem>>, vector<1x256x8xbf16>
    %5 = vector.shape_cast %4 : vector<1x256x8xbf16> to vector<256x8xbf16>
    %cst = arith.constant dense<0.000000e+00> : vector<256x256xf32>
    %6 = tpu.matmul %1, %3, %cst {dimension_numbers = #tpu.dot_dimension_numbers<[1], [1], [0], [0], [0, 0, 1, 0], [], []>} : vector<256x8xbf16>, vector<256x8xbf16>, vector<256x256xf32> -> vector<256x256xf32>
    %cst_8 = arith.constant dense<0xFF800000> : vector<256xf32>
    %7 = vector.multi_reduction <maximumf>, %6, %cst_8 [1] : vector<256x256xf32> to vector<256xf32>
    %8 = vector.shape_cast %7 : vector<256xf32> to vector<256x1xf32>
    %9 = vector.broadcast %8 : vector<256x1xf32> to vector<256x256xf32>
    %10 = arith.subf %6, %9 : vector<256x256xf32>
    %11 = math.exp %10 : vector<256x256xf32>
    %cst_9 = arith.constant dense<0.000000e+00> : vector<256xf32>
    %12 = vector.multi_reduction <add>, %11, %cst_9 [1] : vector<256x256xf32> to vector<256xf32>
    %13 = vector.shape_cast %12 : vector<256xf32> to vector<256x1xf32>
    %14 = tpu.reciprocal %13 {approx = true} : vector<256x1xf32> -> vector<256x1xf32>
    %15 = vector.broadcast %14 : vector<256x1xf32> to vector<256x256xf32>
    %16 = arith.mulf %11, %15 : vector<256x256xf32>
    %c0_10 = arith.constant 0 : index
    %c0_11 = arith.constant 0 : index
    %c0_12 = arith.constant 0 : index
    %c0_13 = arith.constant 0 : index
    %17 = vector.load %arg7[%c0_10, %c0_11, %c0_12, %c0_13] : memref<1x2x256x256xf32, #tpu.memory_space<vmem>>, vector<1x1x256x256xf32>
    %18 = vector.shape_cast %17 : vector<1x1x256x256xf32> to vector<256x256xf32>
    %19 = vector.shape_cast %16 : vector<256x256xf32> to vector<1x1x256x256xf32>
    tpu.vector_store %arg7[%c0_10, %c0_11, %c0_12, %c0_13], %19 {strides = array<i32>} : memref<1x2x256x256xf32, #tpu.memory_space<vmem>>, vector<1x1x256x256xf32>,
    %20 = arith.truncf %16 : vector<256x256xf32> to vector<256x256xbf16>
    %cst_14 = arith.constant dense<0.000000e+00> : vector<256x8xf32>
    %21 = tpu.matmul %20, %5, %cst_14 {dimension_numbers = #tpu.dot_dimension_numbers<[1], [0], [0], [1], [0, 0, 1, 1], [], []>} : vector<256x256xbf16>, vector<256x8xbf16>, vector<256x8xf32> -> vector<256x8xf32>
    %22 = arith.truncf %21 : vector<256x8xf32> to vector<256x8xbf16>
    %c0_15 = arith.constant 0 : index
    %c0_16 = arith.constant 0 : index
    %c0_17 = arith.constant 0 : index
    %23 = vector.load %arg6[%c0_15, %c0_16, %c0_17] : memref<1x256x16xbf16, #tpu.memory_space<vmem>>, vector<1x256x8xbf16>
    %24 = vector.shape_cast %23 : vector<1x256x8xbf16> to vector<256x8xbf16>
    %25 = vector.shape_cast %22 : vector<256x8xbf16> to vector<1x256x8xbf16>
    tpu.vector_store %arg6[%c0_15, %c0_16, %c0_17], %25 {strides = array<i32>} : memref<1x256x16xbf16, #tpu.memory_space<vmem>>, vector<1x256x8xbf16>,
    %c0_18 = arith.constant 0 : index
    %c0_19 = arith.constant 0 : index
    %c8 = arith.constant 8 : index
    %26 = vector.load %arg3[%c0_18, %c0_19, %c8] : memref<1x256x16xbf16, #tpu.memory_space<vmem>>, vector<1x256x8xbf16>
    %27 = vector.shape_cast %26 : vector<1x256x8xbf16> to vector<256x8xbf16>
    %c0_20 = arith.constant 0 : index
    %c0_21 = arith.constant 0 : index
    %c8_22 = arith.constant 8 : index
    %28 = vector.load %arg4[%c0_20, %c0_21, %c8_22] : memref<1x256x16xbf16, #tpu.memory_space<vmem>>, vector<1x256x8xbf16>
    %29 = vector.shape_cast %28 : vector<1x256x8xbf16> to vector<256x8xbf16>
    %c0_23 = arith.constant 0 : index
    %c0_24 = arith.constant 0 : index
    %c8_25 = arith.constant 8 : index
    %30 = vector.load %arg5[%c0_23, %c0_24, %c8_25] : memref<1x256x16xbf16, #tpu.memory_space<vmem>>, vector<1x256x8xbf16>
    %31 = vector.shape_cast %30 : vector<1x256x8xbf16> to vector<256x8xbf16>
    %cst_26 = arith.constant dense<0.000000e+00> : vector<256x256xf32>
    %32 = tpu.matmul %27, %29, %cst_26 {dimension_numbers = #tpu.dot_dimension_numbers<[1], [1], [0], [0], [0, 0, 1, 0], [], []>} : vector<256x8xbf16>, vector<256x8xbf16>, vector<256x256xf32> -> vector<256x256xf32>
    %cst_27 = arith.constant dense<0xFF800000> : vector<256xf32>
    %33 = vector.multi_reduction <maximumf>, %32, %cst_27 [1] : vector<256x256xf32> to vector<256xf32>
    %34 = vector.shape_cast %33 : vector<256xf32> to vector<256x1xf32>
    %35 = vector.broadcast %34 : vector<256x1xf32> to vector<256x256xf32>
    %36 = arith.subf %32, %35 : vector<256x256xf32>
    %37 = math.exp %36 : vector<256x256xf32>
    %cst_28 = arith.constant dense<0.000000e+00> : vector<256xf32>
    %38 = vector.multi_reduction <add>, %37, %cst_28 [1] : vector<256x256xf32> to vector<256xf32>
    %39 = vector.shape_cast %38 : vector<256xf32> to vector<256x1xf32>
    %40 = tpu.reciprocal %39 {approx = true} : vector<256x1xf32> -> vector<256x1xf32>
    %41 = vector.broadcast %40 : vector<256x1xf32> to vector<256x256xf32>
    %42 = arith.mulf %37, %41 : vector<256x256xf32>
    %c0_29 = arith.constant 0 : index
    %c1 = arith.constant 1 : index
    %c0_30 = arith.constant 0 : index
    %c0_31 = arith.constant 0 : index
    %43 = vector.load %arg7[%c0_29, %c1, %c0_30, %c0_31] : memref<1x2x256x256xf32, #tpu.memory_space<vmem>>, vector<1x1x256x256xf32>
    %44 = vector.shape_cast %43 : vector<1x1x256x256xf32> to vector<256x256xf32>
    %45 = vector.shape_cast %42 : vector<256x256xf32> to vector<1x1x256x256xf32>
    tpu.vector_store %arg7[%c0_29, %c1, %c0_30, %c0_31], %45 {strides = array<i32>} : memref<1x2x256x256xf32, #tpu.memory_space<vmem>>, vector<1x1x256x256xf32>,
    %46 = arith.truncf %42 : vector<256x256xf32> to vector<256x256xbf16>
    %cst_32 = arith.constant dense<0.000000e+00> : vector<256x8xf32>
    %47 = tpu.matmul %46, %31, %cst_32 {dimension_numbers = #tpu.dot_dimension_numbers<[1], [0], [0], [1], [0, 0, 1, 1], [], []>} : vector<256x256xbf16>, vector<256x8xbf16>, vector<256x8xf32> -> vector<256x8xf32>
    %48 = arith.truncf %47 : vector<256x8xf32> to vector<256x8xbf16>
    %c0_33 = arith.constant 0 : index
    %c0_34 = arith.constant 0 : index
    %c8_35 = arith.constant 8 : index
    %49 = vector.load %arg6[%c0_33, %c0_34, %c8_35] : memref<1x256x16xbf16, #tpu.memory_space<vmem>>, vector<1x256x8xbf16>
    %50 = vector.shape_cast %49 : vector<1x256x8xbf16> to vector<256x8xbf16>
    %51 = vector.shape_cast %48 : vector<256x8xbf16> to vector<1x256x8xbf16>
    tpu.vector_store %arg6[%c0_33, %c0_34, %c8_35], %51 {strides = array<i32>} : memref<1x256x16xbf16, #tpu.memory_space<vmem>>, vector<1x256x8xbf16>,
    return
  }
  func.func @transform_0(%arg0: i32, %arg1: i32, %arg2: i32) -> (i32, i32, i32) {
    %c0_i32 = arith.constant 0 : i32
    %0 = arith.addi %c0_i32, %arg1 : i32
    %c0_i32_0 = arith.constant 0 : i32
    return %arg0, %arg2, %0 : i32, i32, i32
  }
  func.func @transform_1(%arg0: i32, %arg1: i32, %arg2: i32) -> (i32, i32, i32) {
    %c0_i32 = arith.constant 0 : i32
    %0 = arith.addi %c0_i32, %arg1 : i32
    %c0_i32_0 = arith.constant 0 : i32
    %c0_i32_1 = arith.constant 0 : i32
    return %arg0, %c0_i32_0, %0 : i32, i32, i32
  }
  func.func @transform_2(%arg0: i32, %arg1: i32, %arg2: i32) -> (i32, i32, i32) {
    %c0_i32 = arith.constant 0 : i32
    %0 = arith.addi %c0_i32, %arg1 : i32
    %c0_i32_0 = arith.constant 0 : i32
    %c0_i32_1 = arith.constant 0 : i32
    return %arg0, %c0_i32_0, %0 : i32, i32, i32
  }
  func.func @transform_3(%arg0: i32, %arg1: i32, %arg2: i32) -> (i32, i32, i32) {
    %c0_i32 = arith.constant 0 : i32
    return %arg0, %arg2, %arg1 : i32, i32, i32
  }
  func.func @transform_4(%arg0: i32, %arg1: i32, %arg2: i32) -> (i32, i32, i32, i32) {
    %c0_i32 = arith.constant 0 : i32
    %c0_i32_0 = arith.constant 0 : i32
    return %arg0, %arg1, %arg2, %c0_i32 : i32, i32, i32, i32
  }
}

module attributes {stable_mosaic.version = 11 : i64} {
  func.func @_proj_bias_kernel(%arg0: i32, %arg1: i32, %arg2: i32, %arg3: memref<512x16xbf16, #tpu.memory_space<vmem>>, %arg4: memref<16x4xbf16, #tpu.memory_space<vmem>>, %arg5: memref<1x4xf32, #tpu.memory_space<vmem>>, %arg6: memref<512x4xf32, #tpu.memory_space<vmem>>, %arg7: memref<512x4xf32, #tpu.memory_space<vmem>>) attributes {dimension_semantics = [#tpu.dimension_semantics<parallel>, #tpu.dimension_semantics<parallel>, #tpu.dimension_semantics<arbitrary>], iteration_bounds = array<i64: 1, 1, 1>, scalar_prefetch = 0 : i64, scratch_operands = 1 : i64, tpu.core_type = #tpu.core_type<tc>, window_params = [{transform_indices = @transform_0, window_bounds = array<i64: 512, 16>}, {transform_indices = @transform_1, window_bounds = array<i64: 16, 4>}, {transform_indices = @transform_2, window_bounds = array<i64: 1, 4>}, {transform_indices = @transform_3, window_bounds = array<i64: 512, 4>}]} {
    %c0_i32 = arith.constant 0 : i32
    %0 = arith.cmpi eq, %arg2, %c0_i32 : i32
    %1 = arith.extui %0 : i1 to i32
    %c0_i32_0 = arith.constant 0 : i32
    %2 = arith.cmpi ne, %1, %c0_i32_0 : i32
    scf.if %2 {
      %cst_10 = arith.constant 0.000000e+00 : f32
      %12 = vector.broadcast %cst_10 : f32 to vector<512x4xf32>
      %c0_11 = arith.constant 0 : index
      %c0_12 = arith.constant 0 : index
      %13 = vector.load %arg7[%c0_11, %c0_12] : memref<512x4xf32, #tpu.memory_space<vmem>>, vector<512x4xf32>
      tpu.vector_store %arg7[%c0_11, %c0_12], %12 {strides = array<i32>} : memref<512x4xf32, #tpu.memory_space<vmem>>, vector<512x4xf32>,
    } else {
    }
    %c0 = arith.constant 0 : index
    %c0_1 = arith.constant 0 : index
    %3 = vector.load %arg7[%c0, %c0_1] : memref<512x4xf32, #tpu.memory_space<vmem>>, vector<512x4xf32>
    %c0_2 = arith.constant 0 : index
    %c0_3 = arith.constant 0 : index
    %4 = vector.load %arg3[%c0_2, %c0_3] : memref<512x16xbf16, #tpu.memory_space<vmem>>, vector<512x16xbf16>
    %c0_4 = arith.constant 0 : index
    %c0_5 = arith.constant 0 : index
    %5 = vector.load %arg4[%c0_4, %c0_5] : memref<16x4xbf16, #tpu.memory_space<vmem>>, vector<16x4xbf16>
    %cst = arith.constant dense<0.000000e+00> : vector<512x4xf32>
    %6 = tpu.matmul %4, %5, %cst {dimension_numbers = #tpu.dot_dimension_numbers<[1], [0], [0], [1], [0, 0, 1, 1], [], []>} : vector<512x16xbf16>, vector<16x4xbf16>, vector<512x4xf32> -> vector<512x4xf32>
    %7 = arith.addf %3, %6 : vector<512x4xf32>
    %c0_6 = arith.constant 0 : index
    %c0_7 = arith.constant 0 : index
    %8 = vector.load %arg7[%c0_6, %c0_7] : memref<512x4xf32, #tpu.memory_space<vmem>>, vector<512x4xf32>
    tpu.vector_store %arg7[%c0_6, %c0_7], %7 {strides = array<i32>} : memref<512x4xf32, #tpu.memory_space<vmem>>, vector<512x4xf32>,
    %c0_i32_8 = arith.constant 0 : i32
    %9 = arith.cmpi eq, %arg2, %c0_i32_8 : i32
    %10 = arith.extui %9 : i1 to i32
    %c0_i32_9 = arith.constant 0 : i32
    %11 = arith.cmpi ne, %10, %c0_i32_9 : i32
    scf.if %11 {
      %c0_10 = arith.constant 0 : index
      %c0_11 = arith.constant 0 : index
      %12 = vector.load %arg7[%c0_10, %c0_11] : memref<512x4xf32, #tpu.memory_space<vmem>>, vector<512x4xf32>
      %c0_12 = arith.constant 0 : index
      %c0_13 = arith.constant 0 : index
      %13 = vector.load %arg5[%c0_12, %c0_13] : memref<1x4xf32, #tpu.memory_space<vmem>>, vector<1x4xf32>
      %14 = vector.broadcast %13 : vector<1x4xf32> to vector<512x4xf32>
      %15 = arith.addf %12, %14 : vector<512x4xf32>
      %c0_14 = arith.constant 0 : index
      %c0_15 = arith.constant 0 : index
      %16 = vector.load %arg6[%c0_14, %c0_15] : memref<512x4xf32, #tpu.memory_space<vmem>>, vector<512x4xf32>
      tpu.vector_store %arg6[%c0_14, %c0_15], %15 {strides = array<i32>} : memref<512x4xf32, #tpu.memory_space<vmem>>, vector<512x4xf32>,
    } else {
    }
    return
  }
  func.func @transform_0(%arg0: i32, %arg1: i32, %arg2: i32) -> (i32, i32) {
    %c0_i32 = arith.constant 0 : i32
    return %arg0, %arg2 : i32, i32
  }
  func.func @transform_1(%arg0: i32, %arg1: i32, %arg2: i32) -> (i32, i32) {
    %c0_i32 = arith.constant 0 : i32
    return %arg2, %arg1 : i32, i32
  }
  func.func @transform_2(%arg0: i32, %arg1: i32, %arg2: i32) -> (i32, i32) {
    %c0_i32 = arith.constant 0 : i32
    %c0_i32_0 = arith.constant 0 : i32
    return %c0_i32, %arg1 : i32, i32
  }
  func.func @transform_3(%arg0: i32, %arg1: i32, %arg2: i32) -> (i32, i32) {
    %c0_i32 = arith.constant 0 : i32
    return %arg0, %arg1 : i32, i32
  }
}

</mosaic_0001>

<bundles_post_ra>
// kernel: attention2d_forward.3
= control target key start
LH: loop header
LB: loop body
LE: loop exit
PB: predicated region body
PF: predicated region fallthrough
CT: control target
= control target key end

     0   :  { %vm467_vm0 = vcmask 1041408   ;;  %vm370_vm1 = vcmask 31744   ;;  %vm16_vm2 = vcmask 392192   ;;  %v1609_v1 = vmov 0.0   ;;  %s2212_s1 = inlined_call_operand.vmem [shape: bf16[4,48], index: 1, kind: input, shape index: {}]   ;;  %s2213_s0 = inlined_call_operand.vmem [shape: bf16[512,4], index: 0, kind: input, shape index: {}]   ;;  %s2214_s2 = inlined_call_operand.vmem [shape: bf16[512,48], index: 2, kind: output, shape index: {}]  }
   0x1   :  { %v1628_v0 = vld [vmem:[%s2212_s1] sm:$0x3]  ;;  %19 = vst.msk [vmem:[#allocation2 + $0x10] sm:$0xff] %vm16_vm2, %v1609_v1  ;;  %17 = vst.msk [vmem:[#allocation2] sm:$0xff] %vm16_vm2, %v1609_v1  ;;  %v1579_v5 = vld [vmem:[%s2213_s0 + $0x8] sm:$0xff]   ;;  %vm1212_vm3 = vcmask 388096  }
   0x2   :  { %18 = vst.msk [vmem:[#allocation2 + $0x8] sm:$0xff] %vm16_vm2, %v1609_v1  ;;  %20 = vst.msk [vmem:[#allocation2 + $0x18] sm:$0xff] %vm16_vm2, %v1609_v1  ;;  %1574 = vmatprep.subr.msk.bf16.mxu0 %vm467_vm0, %v1628_v0  ;;  %1575 = vmatprep.subr.msk.bf16.mxu1 %vm467_vm0, %v1628_v0  ;;  %v469_v2 = vsel %vm467_vm0, %v1628_v0, 0  ;;  %v1577_v3 = vld [vmem:[%s2213_s0] sm:$0xff]   ;;  %v1580_v6 = vld [vmem:[%s2213_s0 + $0x88] sm:$0xff]  }
   0x3   :  { %21 = vst.msk [vmem:[#allocation2 + $0x20] sm:$0xff] %vm16_vm2, %v1609_v1  ;;  %22 = vst.msk [vmem:[#allocation2 + $0x28] sm:$0xff] %vm16_vm2, %v1609_v1  ;;  %1507 = vmatpush3.bf16.msra.mxu0 %v469_v2  ;;  %1573 = vmatpush3.bf16.msra.mxu1 %v469_v2  ;;  %v1578_v4 = vld [vmem:[%s2213_s0 + $0x80] sm:$0xff]   ;;  %v1581_v7 = vld [vmem:[%s2213_s0 + $0x10] sm:$0xff]  }
   0x4   :  { %23 = vst.msk [vmem:[#allocation2 + $0x30] sm:$0xff] %vm16_vm2, %v1609_v1  ;;  %24 = vst.msk [vmem:[#allocation2 + $0x38] sm:$0xff] %vm16_vm2, %v1609_v1  ;;  %1508 = vmatprep.mubr.msk.bf16.mxu0 %vm370_vm1, %v1577_v3  ;;  %1540 = vmatprep.mubr.msk.bf16.mxu1 %vm370_vm1, %v1578_v4  ;;  %v1582_v8 = vld [vmem:[%s2213_s0 + $0x90] sm:$0xff]   ;;  %v1583_v9 = vld [vmem:[%s2213_s0 + $0x18] sm:$0xff]  }
   0x5   :  { %25 = vst.msk [vmem:[#allocation2 + $0x40] sm:$0xff] %vm16_vm2, %v1609_v1  ;;  %26 = vst.msk [vmem:[#allocation2 + $0x48] sm:$0xff] %vm16_vm2, %v1609_v1  ;;  %v1584_v10 = vld [vmem:[%s2213_s0 + $0x98] sm:$0xff]   ;;  %v1585_v11 = vld [vmem:[%s2213_s0 + $0x20] sm:$0xff]  }
   0x6   :  { %27 = vst.msk [vmem:[#allocation2 + $0x50] sm:$0xff] %vm16_vm2, %v1609_v1  ;;  %28 = vst.msk [vmem:[#allocation2 + $0x58] sm:$0xff] %vm16_vm2, %v1609_v1  ;;  %1509 = vmatmul.mubr.msk.bf16.vlgmr.msra.gmra.mrb[0].mxu0 %vm370_vm1, %v1579_v5  ;;  %1541 = vmatmul.mubr.msk.bf16.vlgmr.msra.gmra.mrb[0].mxu1 %vm370_vm1, %v1580_v6  ;;  %v1586_v12 = vld [vmem:[%s2213_s0 + $0xa0] sm:$0xff]   ;;  %v1587_v13 = vld [vmem:[%s2213_s0 + $0x28] sm:$0xff]  }
   0x7   :  { %29 = vst.msk [vmem:[#allocation2 + $0x60] sm:$0xff] %vm16_vm2, %v1609_v1  ;;  %30 = vst.msk [vmem:[#allocation2 + $0x68] sm:$0xff] %vm16_vm2, %v1609_v1  ;;  %1512 = vmatprep.mubr.msk.bf16.mxu0 %vm370_vm1, %v1581_v7  ;;  %1544 = vmatprep.mubr.msk.bf16.mxu1 %vm370_vm1, %v1582_v8  ;;  %v1588_v14 = vld [vmem:[%s2213_s0 + $0xa8] sm:$0xff]   ;;  %v1589_v15 = vld [vmem:[%s2213_s0 + $0x30] sm:$0xff]  }
   0x8   :  { %31 = vst.msk [vmem:[#allocation2 + $0x70] sm:$0xff] %vm16_vm2, %v1609_v1  ;;  %32 = vst.msk [vmem:[#allocation2 + $0x78] sm:$0xff] %vm16_vm2, %v1609_v1  ;;  %v1590_v16 = vld [vmem:[%s2213_s0 + $0xb0] sm:$0xff]   ;;  %v1591_v17 = vld [vmem:[%s2213_s0 + $0x38] sm:$0xff]  }
   0x9   :  { %33 = vst.msk [vmem:[#allocation2 + $0x80] sm:$0xff] %vm16_vm2, %v1609_v1  ;;  %34 = vst.msk [vmem:[#allocation2 + $0x88] sm:$0xff] %vm16_vm2, %v1609_v1  ;;  %v1592_v18 = vld [vmem:[%s2213_s0 + $0xb8] sm:$0xff]   ;;  %v1593_v19 = vld [vmem:[%s2213_s0 + $0x40] sm:$0xff]  }
   0xa   :  { %35 = vst.msk [vmem:[#allocation2 + $0x90] sm:$0xff] %vm16_vm2, %v1609_v1  ;;  %36 = vst.msk [vmem:[#allocation2 + $0x98] sm:$0xff] %vm16_vm2, %v1609_v1  ;;  %v1594_v20 = vld [vmem:[%s2213_s0 + $0xc0] sm:$0xff]   ;;  %v1595_v21 = vld [vmem:[%s2213_s0 + $0x48] sm:$0xff]  }
   0xb   :  { %37 = vst.msk [vmem:[#allocation2 + $0xa0] sm:$0xff] %vm16_vm2, %v1609_v1  ;;  %38 = vst.msk [vmem:[#allocation2 + $0xa8] sm:$0xff] %vm16_vm2, %v1609_v1  ;;  %v1596_v22 = vld [vmem:[%s2213_s0 + $0xc8] sm:$0xff]   ;;  %v1597_v23 = vld [vmem:[%s2213_s0 + $0x50] sm:$0xff]  }
   0xc   :  { %39 = vst.msk [vmem:[#allocation2 + $0xb0] sm:$0xff] %vm16_vm2, %v1609_v1  ;;  %40 = vst.msk [vmem:[#allocation2 + $0xb8] sm:$0xff] %vm16_vm2, %v1609_v1  ;;  %v1598_v24 = vld [vmem:[%s2213_s0 + $0xd0] sm:$0xff]   ;;  %v1599_v25 = vld [vmem:[%s2213_s0 + $0x58] sm:$0xff]  }
   0xd   :  { %41 = vst.msk [vmem:[#allocation2 + $0xc0] sm:$0xff] %vm16_vm2, %v1609_v1  ;;  %42 = vst.msk [vmem:[#allocation2 + $0xc8] sm:$0xff] %vm16_vm2, %v1609_v1  ;;  %v1600_v26 = vld [vmem:[%s2213_s0 + $0xd8] sm:$0xff]   ;;  %v1601_v27 = vld [vmem:[%s2213_s0 + $0x60] sm:$0xff]  }
   0xe   :  { %43 = vst.msk [vmem:[#allocation2 + $0xd0] sm:$0xff] %vm16_vm2, %v1609_v1  ;;  %44 = vst.msk [vmem:[#allocation2 + $0xd8] sm:$0xff] %vm16_vm2, %v1609_v1  ;;  %1513 = vmatmul.mubr.msk.bf16.gmra.mrb[4].mxu0 %vm370_vm1, %v1583_v9  ;;  %1545 = vmatmul.mubr.msk.bf16.gmra.mrb[4].mxu1 %vm370_vm1, %v1584_v10  ;;  %v1602_v28 = vld [vmem:[%s2213_s0 + $0xe0] sm:$0xff]   ;;  %v1603_v29 = vld [vmem:[%s2213_s0 + $0x68] sm:$0xff]  }
   0xf   :  { %45 = vst.msk [vmem:[#allocation2 + $0xe0] sm:$0xff] %vm16_vm2, %v1609_v1  ;;  %46 = vst.msk [vmem:[#allocation2 + $0xe8] sm:$0xff] %vm16_vm2, %v1609_v1  ;;  %1516 = vmatprep.mubr.msk.bf16.mxu0 %vm370_vm1, %v1585_v11  ;;  %1548 = vmatprep.mubr.msk.bf16.mxu1 %vm370_vm1, %v1586_v12  ;;  %v1604_v30 = vld [vmem:[%s2213_s0 + $0xe8] sm:$0xff]   ;;  %v1605_v31 = vld [vmem:[%s2213_s0 + $0x70] sm:$0xff]  }
  0x10   :  { %47 = vst.msk [vmem:[#allocation2 + $0xf0] sm:$0xff] %vm16_vm2, %v1609_v1  ;;  %48 = vst.msk [vmem:[#allocation2 + $0xf8] sm:$0xff] %vm16_vm2, %v1609_v1  ;;  %v1606_v32 = vld [vmem:[%s2213_s0 + $0xf0] sm:$0xff]   ;;  %v1607_v33 = vld [vmem:[%s2213_s0 + $0x78] sm:$0xff]  }
  0x11   :  { %49 = vst.msk [vmem:[#allocation2 + $0x100] sm:$0xff] %vm16_vm2, %v1609_v1  ;;  %50 = vst.msk [vmem:[#allocation2 + $0x108] sm:$0xff] %vm16_vm2, %v1609_v1  ;;  %v1608_v34 = vld [vmem:[%s2213_s0 + $0xf8] sm:$0xff]   ;;  %v83_v35 = vld [vmem:[#allocation2 + $0x10] sm:$0xff] }
  0x12   :  { %51 = vst.msk [vmem:[#allocation2 + $0x110] sm:$0xff] %vm16_vm2, %v1609_v1  ;;  %52 = vst.msk [vmem:[#allocation2 + $0x118] sm:$0xff] %vm16_vm2, %v1609_v1  ;;  %v81_v37 = vld [vmem:[#allocation2] sm:$0xff]  ;;  %v84_v40 = vld [vmem:[#allocation2 + $0x18] sm:$0xff] }
  0x13   :  { %53 = vst.msk [vmem:[#allocation2 + $0x120] sm:$0xff] %vm16_vm2, %v1609_v1  ;;  %54 = vst.msk [vmem:[#allocation2 + $0x128] sm:$0xff] %vm16_vm2, %v1609_v1  ;;  %v82_v45 = vld [vmem:[#allocation2 + $0x8] sm:$0xff]  ;;  %v87_v59 = vld [vmem:[#allocation2 + $0x30] sm:$0xff] }
  0x14   :  { %55 = vst.msk [vmem:[#allocation2 + $0x130] sm:$0xff] %vm16_vm2, %v1609_v1  ;;  %56 = vst.msk [vmem:[#allocation2 + $0x138] sm:$0xff] %vm16_vm2, %v1609_v1  ;;  %v85_v61 = vld [vmem:[#allocation2 + $0x20] sm:$0xff]  ;;  %v88_v0 = vld [vmem:[#allocation2 + $0x38] sm:$0xff] }
  0x15   :  { %57 = vst.msk [vmem:[#allocation2 + $0x140] sm:$0xff] %vm16_vm2, %v1609_v1  ;;  %58 = vst.msk [vmem:[#allocation2 + $0x148] sm:$0xff] %vm16_vm2, %v1609_v1  ;;  %v86_v5 = vld [vmem:[#allocation2 + $0x28] sm:$0xff] }
  0x16   :  { %59 = vst.msk [vmem:[#allocation2 + $0x150] sm:$0xff] %vm16_vm2, %v1609_v1  ;;  %60 = vst.msk [vmem:[#allocation2 + $0x158] sm:$0xff] %vm16_vm2, %v1609_v1  ;;  %1517 = vmatmul.mubr.msk.bf16.gmra.mrb[8].mxu0 %vm370_vm1, %v1587_v13  ;;  %1549 = vmatmul.mubr.msk.bf16.gmra.mrb[8].mxu1 %vm370_vm1, %v1588_v14 }
  0x17   :  { %61 = vst.msk [vmem:[#allocation2 + $0x160] sm:$0xff] %vm16_vm2, %v1609_v1  ;;  %62 = vst.msk [vmem:[#allocation2 + $0x168] sm:$0xff] %vm16_vm2, %v1609_v1  ;;  %1520 = vmatprep.mubr.msk.bf16.mxu0 %vm370_vm1, %v1589_v15  ;;  %1552 = vmatprep.mubr.msk.bf16.mxu1 %vm370_vm1, %v1590_v16 }
  0x18   :  { %63 = vst.msk [vmem:[#allocation2 + $0x170] sm:$0xff] %vm16_vm2, %v1609_v1  ;;  %64 = vst.msk [vmem:[#allocation2 + $0x178] sm:$0xff] %vm16_vm2, %v1609_v1  ;;  %v113_v39 = vld [vmem:[#allocation2 + $0x100] sm:$0xff]  ;;  %v114_v50 = vld [vmem:[#allocation2 + $0x108] sm:$0xff] }
  0x19   :  { %65 = vst.msk [vmem:[#allocation2 + $0x180] sm:$0xff] %vm16_vm2, %v1609_v1  ;;  %66 = vst.msk [vmem:[#allocation2 + $0x188] sm:$0xff] %vm16_vm2, %v1609_v1  ;;  %v115_v36 = vld [vmem:[#allocation2 + $0x110] sm:$0xff]  ;;  %v116_v44 = vld [vmem:[#allocation2 + $0x118] sm:$0xff] }
  0x1a   :  { %67 = vst.msk [vmem:[#allocation2 + $0x190] sm:$0xff] %vm16_vm2, %v1609_v1  ;;  %68 = vst.msk [vmem:[#allocation2 + $0x198] sm:$0xff] %vm16_vm2, %v1609_v1  ;;  %v117_v63 = vld [vmem:[#allocation2 + $0x120] sm:$0xff]  ;;  %v118_v11 = vld [vmem:[#allocation2 + $0x128] sm:$0xff] }
  0x1b   :  { %69 = vst.msk [vmem:[#allocation2 + $0x1a0] sm:$0xff] %vm16_vm2, %v1609_v1  ;;  %70 = vst.msk [vmem:[#allocation2 + $0x1a8] sm:$0xff] %vm16_vm2, %v1609_v1  ;;  %v119_v60 = vld [vmem:[#allocation2 + $0x130] sm:$0xff]  ;;  %v120_v4 = vld [vmem:[#allocation2 + $0x138] sm:$0xff] }
  0x1c   :  { %71 = vst.msk [vmem:[#allocation2 + $0x1b0] sm:$0xff] %vm16_vm2, %v1609_v1  ;;  %72 = vst.msk [vmem:[#allocation2 + $0x1b8] sm:$0xff] %vm16_vm2, %v1609_v1 }
  0x1d   :  { %73 = vst.msk [vmem:[#allocation2 + $0x1c0] sm:$0xff] %vm16_vm2, %v1609_v1  ;;  %74 = vst.msk [vmem:[#allocation2 + $0x1c8] sm:$0xff] %vm16_vm2, %v1609_v1 }
  0x1e   :  { %75 = vst.msk [vmem:[#allocation2 + $0x1d0] sm:$0xff] %vm16_vm2, %v1609_v1  ;;  %76 = vst.msk [vmem:[#allocation2 + $0x1d8] sm:$0xff] %vm16_vm2, %v1609_v1  ;;  %1521 = vmatmul.mubr.msk.bf16.gmra.mrb[12].mxu0 %vm370_vm1, %v1591_v17  ;;  %1553 = vmatmul.mubr.msk.bf16.gmra.mrb[12].mxu1 %vm370_vm1, %v1592_v18 }
  0x1f   :  { %77 = vst.msk [vmem:[#allocation2 + $0x1e0] sm:$0xff] %vm16_vm2, %v1609_v1  ;;  %78 = vst.msk [vmem:[#allocation2 + $0x1e8] sm:$0xff] %vm16_vm2, %v1609_v1  ;;  %1524 = vmatprep.mubr.msk.bf16.mxu0 %vm370_vm1, %v1593_v19  ;;  %1556 = vmatprep.mubr.msk.bf16.mxu1 %vm370_vm1, %v1594_v20 }
  0x20   :  { %79 = vst.msk [vmem:[#allocation2 + $0x1f0] sm:$0xff] %vm16_vm2, %v1609_v1  ;;  %80 = vst.msk [vmem:[#allocation2 + $0x1f8] sm:$0xff] %vm16_vm2, %v1609_v1 }
  0x26   :  { %1525 = vmatmul.mubr.msk.bf16.gmra.mrb[16].mxu0 %vm370_vm1, %v1595_v21  ;;  %1557 = vmatmul.mubr.msk.bf16.gmra.mrb[16].mxu1 %vm370_vm1, %v1596_v22 }
  0x27   :  { %1528 = vmatprep.mubr.msk.bf16.mxu0 %vm370_vm1, %v1597_v23  ;;  %1560 = vmatprep.mubr.msk.bf16.mxu1 %vm370_vm1, %v1598_v24 }
  0x2e   :  { %1529 = vmatmul.mubr.msk.bf16.gmra.mrb[20].mxu0 %vm370_vm1, %v1599_v25  ;;  %1561 = vmatmul.mubr.msk.bf16.gmra.mrb[20].mxu1 %vm370_vm1, %v1600_v26 }
  0x2f   :  { %1532 = vmatprep.mubr.msk.bf16.mxu0 %vm370_vm1, %v1601_v27  ;;  %1564 = vmatprep.mubr.msk.bf16.mxu1 %vm370_vm1, %v1602_v28 }
  0x36   :  { %1533 = vmatmul.mubr.msk.bf16.gmra.mrb[24].mxu0 %vm370_vm1, %v1603_v29  ;;  %1565 = vmatmul.mubr.msk.bf16.gmra.mrb[24].mxu1 %vm370_vm1, %v1604_v30 }
  0x37   :  { %1536 = vmatprep.mubr.msk.bf16.mxu0 %vm370_vm1, %v1605_v31  ;;  %1568 = vmatprep.mubr.msk.bf16.mxu1 %vm370_vm1, %v1606_v32 }
  0x3e   :  { %1537 = vmatmul.mubr.msk.bf16.gmra.mrb[28].mxu0 %vm370_vm1, %v1607_v33  ;;  %1569 = vmatmul.mubr.msk.bf16.gmra.mrb[28].mxu1 %vm370_vm1, %v1608_v34  ;;  %v91_v34 = vld [vmem:[#allocation2 + $0x50] sm:$0xff] }
  0xd9   :  { %v1510_v38 = vpop.f32.mrb[0].mxu0  ;;  %v1542_v42 = vpop.f32.mrb[0].mxu1 }
  0xda   :  { %v762_v41 = vadd.f32 %v1510_v38, %v83_v35  ;;  %v505_v43 = vpop.f32.mrb[1].mxu0  ;;  %v794_v46 = vadd.f32 %v1542_v42, %v115_v36  ;;  %v633_v48 = vpop.f32.mrb[1].mxu1  ;;  %v123_v36 = vld [vmem:[#allocation2 + $0x150] sm:$0xff] }
  0xdb   :  { %v760_v47 = vadd.f32 %v505_v43, %v81_v37  ;;  %v1511_v49 = vpop.f32.mrb[2].mxu0  ;;  %v792_v51 = vadd.f32 %v633_v48, %v113_v39  ;;  %v1543_v53 = vpop.f32.mrb[2].mxu1  ;;  %v89_v37 = vld [vmem:[#allocation2 + $0x40] sm:$0xff] }
  0xdc   :  { %827 = vst.msk [vmem:[#allocation2 + $0x10] sm:$0xff] %vm16_vm2, %v762_v41  ;;  %v763_v52 = vadd.f32 %v1511_v49, %v84_v40  ;;  %v508_v54 = vpop.f32.mrb[3].mxu0  ;;  %859 = vst.msk [vmem:[#allocation2 + $0x110] sm:$0xff] %vm16_vm2, %v794_v46  ;;  %v795_v55 = vadd.f32 %v1543_v53, %v116_v44  ;;  %v636_v57 = vpop.f32.mrb[3].mxu1  ;;  %v121_v39 = vld [vmem:[#allocation2 + $0x140] sm:$0xff]  ;;  %v92_v40 = vld [vmem:[#allocation2 + $0x58] sm:$0xff] }
  0xdd   :  { %825 = vst.msk [vmem:[#allocation2] sm:$0xff] %vm16_vm2, %v760_v47  ;;  %v761_v56 = vadd.f32 %v508_v54, %v82_v45  ;;  %857 = vst.msk [vmem:[#allocation2 + $0x100] sm:$0xff] %vm16_vm2, %v792_v51  ;;  %v793_v58 = vadd.f32 %v636_v57, %v114_v50  ;;  %v124_v44 = vld [vmem:[#allocation2 + $0x158] sm:$0xff]  ;;  %v90_v45 = vld [vmem:[#allocation2 + $0x48] sm:$0xff] }
  0xde   :  { %828 = vst.msk [vmem:[#allocation2 + $0x18] sm:$0xff] %vm16_vm2, %v763_v52  ;;  %860 = vst.msk [vmem:[#allocation2 + $0x118] sm:$0xff] %vm16_vm2, %v795_v55  ;;  %v122_v51 = vld [vmem:[#allocation2 + $0x148] sm:$0xff] }
  0xdf   :  { %826 = vst.msk [vmem:[#allocation2 + $0x8] sm:$0xff] %vm16_vm2, %v761_v56  ;;  %858 = vst.msk [vmem:[#allocation2 + $0x108] sm:$0xff] %vm16_vm2, %v793_v58 }
  0xe1   :  { %v1514_v62 = vpop.f32.mrb[4].mxu0  ;;  %v1546_v2 = vpop.f32.mrb[4].mxu1 }
  0xe2   :  { %v766_v1 = vadd.f32 %v1514_v62, %v87_v59  ;;  %v521_v3 = vpop.f32.mrb[5].mxu0  ;;  %v798_v7 = vadd.f32 %v1546_v2, %v119_v60  ;;  %v649_v9 = vpop.f32.mrb[5].mxu1 }
  0xe3   :  { %v894_v6 = vld [vmem:[#allocation2 + $0x10] sm:$0xff]  ;;  %v764_v8 = vadd.f32 %v521_v3, %v85_v61  ;;  %v1515_v10 = vpop.f32.mrb[6].mxu0  ;;  %v796_v15 = vadd.f32 %v649_v9, %v117_v63  ;;  %v1547_v17 = vpop.f32.mrb[6].mxu1 }
  0xe4   :  { %v1411_v12 = vpack.c.bf16 %v894_v6, %v894_v6  ;;  %v926_v13 = vld [vmem:[#allocation2 + $0x110] sm:$0xff]  ;;  %v892_v14 = vld [vmem:[#allocation2] sm:$0xff]  ;;  %831 = vst.msk [vmem:[#allocation2 + $0x30] sm:$0xff] %vm16_vm2, %v766_v1  ;;  %v767_v16 = vadd.f32 %v1515_v10, %v88_v0  ;;  %v524_v18 = vpop.f32.mrb[7].mxu0  ;;  %863 = vst.msk [vmem:[#allocation2 + $0x130] sm:$0xff] %vm16_vm2, %v798_v7  ;;  %v799_v23 = vadd.f32 %v1547_v17, %v120_v4  ;;  %v652_v25 = vpop.f32.mrb[7].mxu1 }
  0xe5   :  { %v1443_v19 = vpack.c.bf16 %v926_v13, %v926_v13  ;;  %v1409_v20 = vpack.c.bf16 %v892_v14, %v892_v14  ;;  %v924_v21 = vld [vmem:[#allocation2 + $0x100] sm:$0xff]  ;;  %v895_v22 = vld [vmem:[#allocation2 + $0x18] sm:$0xff]  ;;  %829 = vst.msk [vmem:[#allocation2 + $0x20] sm:$0xff] %vm16_vm2, %v764_v8  ;;  %v765_v24 = vadd.f32 %v524_v18, %v86_v5  ;;  %861 = vst.msk [vmem:[#allocation2 + $0x120] sm:$0xff] %vm16_vm2, %v796_v15 }
  0xe6   :  { %1215 = vst.msk [vmem:[%s2214_s2 + $0x8] sm:$0xf] %vm1212_vm3, %v1411_v12  ;;  %v1441_v26 = vpack.c.bf16 %v924_v21, %v924_v21  ;;  %v1412_v27 = vpack.c.bf16 %v895_v22, %v895_v22  ;;  %v927_v28 = vld [vmem:[#allocation2 + $0x118] sm:$0xff]  ;;  %v893_v29 = vld [vmem:[#allocation2 + $0x8] sm:$0xff]  ;;  %v797_v30 = vadd.f32 %v652_v25, %v118_v11  ;;  %v95_v10 = vld [vmem:[#allocation2 + $0x70] sm:$0xff] }
  0xe7   :  { %832 = vst.msk [vmem:[#allocation2 + $0x38] sm:$0xff] %vm16_vm2, %v767_v16  ;;  %v1444_v31 = vpack.c.bf16 %v927_v28, %v927_v28  ;;  %v1410_v32 = vpack.c.bf16 %v893_v29, %v893_v29  ;;  %v925_v33 = vld [vmem:[#allocation2 + $0x108] sm:$0xff]  ;;  %864 = vst.msk [vmem:[#allocation2 + $0x138] sm:$0xff] %vm16_vm2, %v799_v23  ;;  %v127_v12 = vld [vmem:[#allocation2 + $0x170] sm:$0xff] }
  0xe8   :  { %1247 = vst.msk [vmem:[%s2214_s2 + $0x88] sm:$0xf] %vm1212_vm3, %v1443_v19  ;;  %1213 = vst.msk [vmem:[%s2214_s2] sm:$0xf] %vm1212_vm3, %v1409_v20  ;;  %v1442_v35 = vpack.c.bf16 %v925_v33, %v925_v33  ;;  %v93_v13 = vld [vmem:[#allocation2 + $0x60] sm:$0xff]  ;;  %v96_v16 = vld [vmem:[#allocation2 + $0x78] sm:$0xff] }
  0xe9   :  { %830 = vst.msk [vmem:[#allocation2 + $0x28] sm:$0xff] %vm16_vm2, %v765_v24  ;;  %862 = vst.msk [vmem:[#allocation2 + $0x128] sm:$0xff] %vm16_vm2, %v797_v30  ;;  %v1518_v38 = vpop.f32.mrb[8].mxu0  ;;  %v1550_v42 = vpop.f32.mrb[8].mxu1  ;;  %v125_v15 = vld [vmem:[#allocation2 + $0x160] sm:$0xff]  ;;  %v128_v20 = vld [vmem:[#allocation2 + $0x178] sm:$0xff] }
  0xea   :  { %1245 = vst.msk [vmem:[%s2214_s2 + $0x80] sm:$0xf] %vm1212_vm3, %v1441_v26  ;;  %1216 = vst.msk [vmem:[%s2214_s2 + $0xc] sm:$0xf] %vm1212_vm3, %v1412_v27  ;;  %v770_v41 = vadd.f32 %v1518_v38, %v91_v34  ;;  %v537_v43 = vpop.f32.mrb[9].mxu0  ;;  %v802_v47 = vadd.f32 %v1550_v42, %v123_v36  ;;  %v665_v49 = vpop.f32.mrb[9].mxu1 }
  0xeb   :  { %1248 = vst.msk [vmem:[%s2214_s2 + $0x8c] sm:$0xf] %vm1212_vm3, %v1444_v31  ;;  %1214 = vst.msk [vmem:[%s2214_s2 + $0x4] sm:$0xf] %vm1212_vm3, %v1410_v32  ;;  %v898_v46 = vld [vmem:[#allocation2 + $0x30] sm:$0xff]  ;;  %v768_v48 = vadd.f32 %v537_v43, %v89_v37  ;;  %v1519_v50 = vpop.f32.mrb[10].mxu0  ;;  %v800_v55 = vadd.f32 %v665_v49, %v121_v39 }
  0xec   :  { %1246 = vst.msk [vmem:[%s2214_s2 + $0x84] sm:$0xf] %vm1212_vm3, %v1442_v35  ;;  %v1415_v52 = vpack.c.bf16 %v898_v46, %v898_v46  ;;  %v930_v53 = vld [vmem:[#allocation2 + $0x130] sm:$0xff]  ;;  %v896_v54 = vld [vmem:[#allocation2 + $0x20] sm:$0xff]  ;;  %v771_v56 = vadd.f32 %v1519_v50, %v92_v40  ;;  %v1551_v57 = vpop.f32.mrb[10].mxu1  ;;  %v540_v58 = vpop.f32.mrb[11].mxu0 }
  0xed   :  { %835 = vst.msk [vmem:[#allocation2 + $0x50] sm:$0xff] %vm16_vm2, %v770_v41  ;;  %v1447_v59 = vpack.c.bf16 %v930_v53, %v930_v53  ;;  %v1413_v60 = vpack.c.bf16 %v896_v54, %v896_v54  ;;  %v928_v61 = vld [vmem:[#allocation2 + $0x120] sm:$0xff]  ;;  %867 = vst.msk [vmem:[#allocation2 + $0x150] sm:$0xff] %vm16_vm2, %v802_v47  ;;  %v803_v63 = vadd.f32 %v1551_v57, %v124_v44  ;;  %v668_v1 = vpop.f32.mrb[11].mxu1  ;;  %v94_v21 = vld [vmem:[#allocation2 + $0x68] sm:$0xff] }
  0xee   :  { %v899_v62 = vld [vmem:[#allocation2 + $0x38] sm:$0xff]  ;;  %833 = vst.msk [vmem:[#allocation2 + $0x40] sm:$0xff] %vm16_vm2, %v768_v48  ;;  %v769_v0 = vadd.f32 %v540_v58, %v90_v45  ;;  %v1445_v2 = vpack.c.bf16 %v928_v61, %v928_v61  ;;  %865 = vst.msk [vmem:[#allocation2 + $0x140] sm:$0xff] %vm16_vm2, %v800_v55  ;;  %v801_v6 = vadd.f32 %v668_v1, %v122_v51  ;;  %v126_v27 = vld [vmem:[#allocation2 + $0x168] sm:$0xff] }
  0xef   :  { %1219 = vst.msk [vmem:[%s2214_s2 + $0x18] sm:$0xf] %vm1212_vm3, %v1415_v52  ;;  %v1416_v3 = vpack.c.bf16 %v899_v62, %v899_v62  ;;  %v931_v4 = vld [vmem:[#allocation2 + $0x138] sm:$0xff]  ;;  %1251 = vst.msk [vmem:[%s2214_s2 + $0x98] sm:$0xf] %vm1212_vm3, %v1447_v59  ;;  %v99_v50 = vld [vmem:[#allocation2 + $0x90] sm:$0xff] }
  0xf0   :  { %v897_v5 = vld [vmem:[#allocation2 + $0x28] sm:$0xff]  ;;  %836 = vst.msk [vmem:[#allocation2 + $0x58] sm:$0xff] %vm16_vm2, %v771_v56  ;;  %v1448_v7 = vpack.c.bf16 %v931_v4, %v931_v4  ;;  %868 = vst.msk [vmem:[#allocation2 + $0x158] sm:$0xff] %vm16_vm2, %v803_v63  ;;  %v131_v52 = vld [vmem:[#allocation2 + $0x190] sm:$0xff] }
  0xf1   :  { %1217 = vst.msk [vmem:[%s2214_s2 + $0x10] sm:$0xf] %vm1212_vm3, %v1413_v60  ;;  %v1414_v8 = vpack.c.bf16 %v897_v5, %v897_v5  ;;  %v929_v9 = vld [vmem:[#allocation2 + $0x128] sm:$0xff]  ;;  %1249 = vst.msk [vmem:[%s2214_s2 + $0x90] sm:$0xf] %vm1212_vm3, %v1445_v2  ;;  %v1522_v14 = vpop.f32.mrb[12].mxu0 }
  0xf2   :  { %834 = vst.msk [vmem:[#allocation2 + $0x48] sm:$0xff] %vm16_vm2, %v769_v0  ;;  %v1446_v11 = vpack.c.bf16 %v929_v9, %v929_v9  ;;  %866 = vst.msk [vmem:[#allocation2 + $0x148] sm:$0xff] %vm16_vm2, %v801_v6  ;;  %v774_v17 = vadd.f32 %v1522_v14, %v95_v10  ;;  %v1554_v18 = vpop.f32.mrb[12].mxu1  ;;  %v553_v19 = vpop.f32.mrb[13].mxu0  ;;  %v97_v53 = vld [vmem:[#allocation2 + $0x80] sm:$0xff]  ;;  %v100_v56 = vld [vmem:[#allocation2 + $0x98] sm:$0xff] }
  0xf3   :  { %1220 = vst.msk [vmem:[%s2214_s2 + $0x1c] sm:$0xf] %vm1212_vm3, %v1416_v3  ;;  %1252 = vst.msk [vmem:[%s2214_s2 + $0x9c] sm:$0xf] %vm1212_vm3, %v1448_v7  ;;  %v806_v23 = vadd.f32 %v1554_v18, %v127_v12  ;;  %v772_v24 = vadd.f32 %v553_v19, %v93_v13  ;;  %v681_v25 = vpop.f32.mrb[13].mxu1  ;;  %v1523_v26 = vpop.f32.mrb[14].mxu0 }
  0xf4   :  { %1218 = vst.msk [vmem:[%s2214_s2 + $0x14] sm:$0xf] %vm1212_vm3, %v1414_v8  ;;  %1250 = vst.msk [vmem:[%s2214_s2 + $0x94] sm:$0xf] %vm1212_vm3, %v1446_v11  ;;  %v902_v22 = vld [vmem:[#allocation2 + $0x50] sm:$0xff]  ;;  %v804_v31 = vadd.f32 %v681_v25, %v125_v15  ;;  %v775_v32 = vadd.f32 %v1523_v26, %v96_v16  ;;  %v1555_v33 = vpop.f32.mrb[14].mxu1 }
  0xf5   :  { %v1419_v28 = vpack.c.bf16 %v902_v22, %v902_v22  ;;  %v934_v29 = vld [vmem:[#allocation2 + $0x150] sm:$0xff]  ;;  %v900_v30 = vld [vmem:[#allocation2 + $0x40] sm:$0xff]  ;;  %839 = vst.msk [vmem:[#allocation2 + $0x70] sm:$0xff] %vm16_vm2, %v774_v17  ;;  %v556_v34 = vpop.f32.mrb[15].mxu0  ;;  %871 = vst.msk [vmem:[#allocation2 + $0x170] sm:$0xff] %vm16_vm2, %v806_v23  ;;  %v807_v39 = vadd.f32 %v1555_v33, %v128_v20  ;;  %v684_v41 = vpop.f32.mrb[15].mxu1 }
  0xf6   :  { %v1451_v35 = vpack.c.bf16 %v934_v29, %v934_v29  ;;  %v1417_v36 = vpack.c.bf16 %v900_v30, %v900_v30  ;;  %v932_v37 = vld [vmem:[#allocation2 + $0x140] sm:$0xff]  ;;  %837 = vst.msk [vmem:[#allocation2 + $0x60] sm:$0xff] %vm16_vm2, %v772_v24  ;;  %v773_v40 = vadd.f32 %v556_v34, %v94_v21  ;;  %869 = vst.msk [vmem:[#allocation2 + $0x160] sm:$0xff] %vm16_vm2, %v804_v31  ;;  %v132_v60 = vld [vmem:[#allocation2 + $0x198] sm:$0xff] }
  0xf7   :  { %v903_v38 = vld [vmem:[#allocation2 + $0x58] sm:$0xff]  ;;  %1223 = vst.msk [vmem:[%s2214_s2 + $0x28] sm:$0xf] %vm1212_vm3, %v1419_v28  ;;  %v1449_v42 = vpack.c.bf16 %v932_v37, %v932_v37  ;;  %v805_v46 = vadd.f32 %v684_v41, %v126_v27  ;;  %v129_v55 = vld [vmem:[#allocation2 + $0x180] sm:$0xff]  ;;  %v98_v61 = vld [vmem:[#allocation2 + $0x88] sm:$0xff] }
  0xf8   :  { %v1420_v43 = vpack.c.bf16 %v903_v38, %v903_v38  ;;  %v935_v44 = vld [vmem:[#allocation2 + $0x158] sm:$0xff]  ;;  %840 = vst.msk [vmem:[#allocation2 + $0x78] sm:$0xff] %vm16_vm2, %v775_v32  ;;  %872 = vst.msk [vmem:[#allocation2 + $0x178] sm:$0xff] %vm16_vm2, %v807_v39  ;;  %v130_v3 = vld [vmem:[#allocation2 + $0x188] sm:$0xff] }
  0xf9   :  { %v901_v45 = vld [vmem:[#allocation2 + $0x48] sm:$0xff]  ;;  %1255 = vst.msk [vmem:[%s2214_s2 + $0xa8] sm:$0xf] %vm1212_vm3, %v1451_v35  ;;  %1221 = vst.msk [vmem:[%s2214_s2 + $0x20] sm:$0xf] %vm1212_vm3, %v1417_v36  ;;  %v1452_v47 = vpack.c.bf16 %v935_v44, %v935_v44  ;;  %v1526_v54 = vpop.f32.mrb[16].mxu0 }
  0xfa   :  { %v1418_v48 = vpack.c.bf16 %v901_v45, %v901_v45  ;;  %v933_v49 = vld [vmem:[#allocation2 + $0x148] sm:$0xff]  ;;  %838 = vst.msk [vmem:[#allocation2 + $0x68] sm:$0xff] %vm16_vm2, %v773_v40  ;;  %870 = vst.msk [vmem:[#allocation2 + $0x168] sm:$0xff] %vm16_vm2, %v805_v46  ;;  %v778_v57 = vadd.f32 %v1526_v54, %v99_v50  ;;  %v1558_v58 = vpop.f32.mrb[16].mxu1  ;;  %v569_v59 = vpop.f32.mrb[17].mxu0  ;;  %v103_v26 = vld [vmem:[#allocation2 + $0xb0] sm:$0xff] }
  0xfb   :  { %1253 = vst.msk [vmem:[%s2214_s2 + $0xa0] sm:$0xf] %vm1212_vm3, %v1449_v42  ;;  %1224 = vst.msk [vmem:[%s2214_s2 + $0x2c] sm:$0xf] %vm1212_vm3, %v1420_v43  ;;  %v1450_v51 = vpack.c.bf16 %v933_v49, %v933_v49  ;;  %v810_v63 = vadd.f32 %v1558_v58, %v131_v52  ;;  %v776_v0 = vadd.f32 %v569_v59, %v97_v53  ;;  %v697_v1 = vpop.f32.mrb[17].mxu1  ;;  %v1527_v2 = vpop.f32.mrb[18].mxu0 }
  0xfc   :  { %1256 = vst.msk [vmem:[%s2214_s2 + $0xac] sm:$0xf] %vm1212_vm3, %v1452_v47  ;;  %1222 = vst.msk [vmem:[%s2214_s2 + $0x24] sm:$0xf] %vm1212_vm3, %v1418_v48  ;;  %v906_v62 = vld [vmem:[#allocation2 + $0x70] sm:$0xff]  ;;  %v808_v7 = vadd.f32 %v697_v1, %v129_v55  ;;  %v779_v8 = vadd.f32 %v1527_v2, %v100_v56  ;;  %v1559_v9 = vpop.f32.mrb[18].mxu1 }
  0xfd   :  { %1254 = vst.msk [vmem:[%s2214_s2 + $0xa4] sm:$0xf] %vm1212_vm3, %v1450_v51  ;;  %v1423_v4 = vpack.c.bf16 %v906_v62, %v906_v62  ;;  %v938_v5 = vld [vmem:[#allocation2 + $0x170] sm:$0xff]  ;;  %v904_v6 = vld [vmem:[#allocation2 + $0x60] sm:$0xff]  ;;  %v572_v10 = vpop.f32.mrb[19].mxu0  ;;  %v811_v15 = vadd.f32 %v1559_v9, %v132_v60  ;;  %v700_v17 = vpop.f32.mrb[19].mxu1 }
  0xfe   :  { %843 = vst.msk [vmem:[#allocation2 + $0x90] sm:$0xff] %vm16_vm2, %v778_v57  ;;  %v1455_v11 = vpack.c.bf16 %v938_v5, %v938_v5  ;;  %v1421_v12 = vpack.c.bf16 %v904_v6, %v904_v6  ;;  %v936_v13 = vld [vmem:[#allocation2 + $0x160] sm:$0xff]  ;;  %875 = vst.msk [vmem:[#allocation2 + $0x190] sm:$0xff] %vm16_vm2, %v810_v63  ;;  %v777_v16 = vadd.f32 %v572_v10, %v98_v61  ;;  %v135_v28 = vld [vmem:[#allocation2 + $0x1b0] sm:$0xff] }
  0xff   :  { %v907_v14 = vld [vmem:[#allocation2 + $0x78] sm:$0xff]  ;;  %841 = vst.msk [vmem:[#allocation2 + $0x80] sm:$0xff] %vm16_vm2, %v776_v0  ;;  %v1453_v18 = vpack.c.bf16 %v936_v13, %v936_v13  ;;  %873 = vst.msk [vmem:[#allocation2 + $0x180] sm:$0xff] %vm16_vm2, %v808_v7  ;;  %v809_v22 = vadd.f32 %v700_v17, %v130_v3  ;;  %v101_v29 = vld [vmem:[#allocation2 + $0xa0] sm:$0xff] }
 0x100   :  { %1227 = vst.msk [vmem:[%s2214_s2 + $0x38] sm:$0xf] %vm1212_vm3, %v1423_v4  ;;  %v1424_v19 = vpack.c.bf16 %v907_v14, %v907_v14  ;;  %v939_v20 = vld [vmem:[#allocation2 + $0x178] sm:$0xff]  ;;  %1259 = vst.msk [vmem:[%s2214_s2 + $0xb8] sm:$0xf] %vm1212_vm3, %v1455_v11  ;;  %v133_v31 = vld [vmem:[#allocation2 + $0x1a0] sm:$0xff] }
 0x101   :  { %v905_v21 = vld [vmem:[#allocation2 + $0x68] sm:$0xff]  ;;  %844 = vst.msk [vmem:[#allocation2 + $0x98] sm:$0xff] %vm16_vm2, %v779_v8  ;;  %v1456_v23 = vpack.c.bf16 %v939_v20, %v939_v20  ;;  %876 = vst.msk [vmem:[#allocation2 + $0x198] sm:$0xff] %vm16_vm2, %v811_v15  ;;  %v1530_v30 = vpop.f32.mrb[20].mxu0  ;;  %v104_v32 = vld [vmem:[#allocation2 + $0xb8] sm:$0xff]  ;;  %v1562_v34 = vpop.f32.mrb[20].mxu1 }
 0x102   :  { %1225 = vst.msk [vmem:[%s2214_s2 + $0x30] sm:$0xf] %vm1212_vm3, %v1421_v12  ;;  %v1422_v24 = vpack.c.bf16 %v905_v21, %v905_v21  ;;  %v937_v25 = vld [vmem:[#allocation2 + $0x168] sm:$0xff]  ;;  %1257 = vst.msk [vmem:[%s2214_s2 + $0xb0] sm:$0xf] %vm1212_vm3, %v1453_v18  ;;  %v782_v33 = vadd.f32 %v1530_v30, %v103_v26  ;;  %v585_v35 = vpop.f32.mrb[21].mxu0  ;;  %v814_v39 = vadd.f32 %v1562_v34, %v135_v28 }
 0x103   :  { %842 = vst.msk [vmem:[#allocation2 + $0x88] sm:$0xff] %vm16_vm2, %v777_v16  ;;  %v1454_v27 = vpack.c.bf16 %v937_v25, %v937_v25  ;;  %874 = vst.msk [vmem:[#allocation2 + $0x188] sm:$0xff] %vm16_vm2, %v809_v22  ;;  %v136_v36 = vld [vmem:[#allocation2 + $0x1b8] sm:$0xff]  ;;  %v102_v37 = vld [vmem:[#allocation2 + $0xa8] sm:$0xff]  ;;  %v780_v40 = vadd.f32 %v585_v35, %v101_v29  ;;  %v713_v41 = vpop.f32.mrb[21].mxu1  ;;  %v1531_v42 = vpop.f32.mrb[22].mxu0 }
 0x104   :  { %1228 = vst.msk [vmem:[%s2214_s2 + $0x3c] sm:$0xf] %vm1212_vm3, %v1424_v19  ;;  %1260 = vst.msk [vmem:[%s2214_s2 + $0xbc] sm:$0xf] %vm1212_vm3, %v1456_v23  ;;  %v134_v43 = vld [vmem:[#allocation2 + $0x1a8] sm:$0xff]  ;;  %v812_v47 = vadd.f32 %v713_v41, %v133_v31  ;;  %v783_v48 = vadd.f32 %v1531_v42, %v104_v32  ;;  %v1563_v49 = vpop.f32.mrb[22].mxu1 }
 0x105   :  { %1226 = vst.msk [vmem:[%s2214_s2 + $0x34] sm:$0xf] %vm1212_vm3, %v1422_v24  ;;  %1258 = vst.msk [vmem:[%s2214_s2 + $0xb4] sm:$0xf] %vm1212_vm3, %v1454_v27  ;;  %v910_v38 = vld [vmem:[#allocation2 + $0x90] sm:$0xff]  ;;  %v588_v50 = vpop.f32.mrb[23].mxu0  ;;  %v815_v55 = vadd.f32 %v1563_v49, %v136_v36 }
 0x106   :  { %v1427_v44 = vpack.c.bf16 %v910_v38, %v910_v38  ;;  %v942_v45 = vld [vmem:[#allocation2 + $0x190] sm:$0xff]  ;;  %v908_v46 = vld [vmem:[#allocation2 + $0x80] sm:$0xff]  ;;  %847 = vst.msk [vmem:[#allocation2 + $0xb0] sm:$0xff] %vm16_vm2, %v782_v33  ;;  %879 = vst.msk [vmem:[#allocation2 + $0x1b0] sm:$0xff] %vm16_vm2, %v814_v39  ;;  %v781_v56 = vadd.f32 %v588_v50, %v102_v37  ;;  %v716_v57 = vpop.f32.mrb[23].mxu1 }
 0x107   :  { %v1459_v51 = vpack.c.bf16 %v942_v45, %v942_v45  ;;  %v1425_v52 = vpack.c.bf16 %v908_v46, %v908_v46  ;;  %v940_v53 = vld [vmem:[#allocation2 + $0x180] sm:$0xff]  ;;  %845 = vst.msk [vmem:[#allocation2 + $0xa0] sm:$0xff] %vm16_vm2, %v780_v40  ;;  %877 = vst.msk [vmem:[#allocation2 + $0x1a0] sm:$0xff] %vm16_vm2, %v812_v47  ;;  %v813_v62 = vadd.f32 %v716_v57, %v134_v43  ;;  %v107_v2 = vld [vmem:[#allocation2 + $0xd0] sm:$0xff] }
 0x108   :  { %v911_v54 = vld [vmem:[#allocation2 + $0x98] sm:$0xff]  ;;  %1231 = vst.msk [vmem:[%s2214_s2 + $0x48] sm:$0xf] %vm1212_vm3, %v1427_v44  ;;  %v1457_v58 = vpack.c.bf16 %v940_v53, %v940_v53  ;;  %v139_v4 = vld [vmem:[#allocation2 + $0x1d0] sm:$0xff]  ;;  %v105_v5 = vld [vmem:[#allocation2 + $0xc0] sm:$0xff] }
 0x109   :  { %v1428_v59 = vpack.c.bf16 %v911_v54, %v911_v54  ;;  %v943_v60 = vld [vmem:[#allocation2 + $0x198] sm:$0xff]  ;;  %848 = vst.msk [vmem:[#allocation2 + $0xb8] sm:$0xff] %vm16_vm2, %v783_v48  ;;  %880 = vst.msk [vmem:[#allocation2 + $0x1b8] sm:$0xff] %vm16_vm2, %v815_v55  ;;  %v1534_v6 = vpop.f32.mrb[24].mxu0  ;;  %v137_v7 = vld [vmem:[#allocation2 + $0x1c0] sm:$0xff]  ;;  %v1566_v10 = vpop.f32.mrb[24].mxu1 }
 0x10a   :  { %v909_v61 = vld [vmem:[#allocation2 + $0x88] sm:$0xff]  ;;  %1263 = vst.msk [vmem:[%s2214_s2 + $0xc8] sm:$0xf] %vm1212_vm3, %v1459_v51  ;;  %1229 = vst.msk [vmem:[%s2214_s2 + $0x40] sm:$0xf] %vm1212_vm3, %v1425_v52  ;;  %v1460_v63 = vpack.c.bf16 %v943_v60, %v943_v60  ;;  %v108_v8 = vld [vmem:[#allocation2 + $0xd8] sm:$0xff]  ;;  %v786_v9 = vadd.f32 %v1534_v6, %v107_v2  ;;  %v818_v15 = vadd.f32 %v1566_v10, %v139_v4 }
 0x10b   :  { %v1426_v0 = vpack.c.bf16 %v909_v61, %v909_v61  ;;  %v941_v1 = vld [vmem:[#allocation2 + $0x188] sm:$0xff]  ;;  %846 = vst.msk [vmem:[#allocation2 + $0xa8] sm:$0xff] %vm16_vm2, %v781_v56  ;;  %878 = vst.msk [vmem:[#allocation2 + $0x1a8] sm:$0xff] %vm16_vm2, %v813_v62  ;;  %v601_v11 = vpop.f32.mrb[25].mxu0  ;;  %v140_v12 = vld [vmem:[#allocation2 + $0x1d8] sm:$0xff]  ;;  %v729_v17 = vpop.f32.mrb[25].mxu1 }
 0x10c   :  { %1261 = vst.msk [vmem:[%s2214_s2 + $0xc0] sm:$0xf] %vm1212_vm3, %v1457_v58  ;;  %1232 = vst.msk [vmem:[%s2214_s2 + $0x4c] sm:$0xf] %vm1212_vm3, %v1428_v59  ;;  %v1458_v3 = vpack.c.bf16 %v941_v1, %v941_v1  ;;  %v106_v13 = vld [vmem:[#allocation2 + $0xc8] sm:$0xff]  ;;  %v784_v16 = vadd.f32 %v601_v11, %v105_v5  ;;  %v1535_v18 = vpop.f32.mrb[26].mxu0  ;;  %v816_v23 = vadd.f32 %v729_v17, %v137_v7 }
 0x10d   :  { %1264 = vst.msk [vmem:[%s2214_s2 + $0xcc] sm:$0xf] %vm1212_vm3, %v1460_v63  ;;  %1230 = vst.msk [vmem:[%s2214_s2 + $0x44] sm:$0xf] %vm1212_vm3, %v1426_v0  ;;  %v914_v14 = vld [vmem:[#allocation2 + $0xb0] sm:$0xff]  ;;  %v138_v19 = vld [vmem:[#allocation2 + $0x1c8] sm:$0xff]  ;;  %v787_v24 = vadd.f32 %v1535_v18, %v108_v8 }
 0x10e   :  { %1262 = vst.msk [vmem:[%s2214_s2 + $0xc4] sm:$0xf] %vm1212_vm3, %v1458_v3  ;;  %v1431_v20 = vpack.c.bf16 %v914_v14, %v914_v14  ;;  %v946_v21 = vld [vmem:[#allocation2 + $0x1b0] sm:$0xff]  ;;  %v912_v22 = vld [vmem:[#allocation2 + $0xa0] sm:$0xff]  ;;  %v1567_v25 = vpop.f32.mrb[26].mxu1  ;;  %v604_v26 = vpop.f32.mrb[27].mxu0 }
 0x10f   :  { %851 = vst.msk [vmem:[#allocation2 + $0xd0] sm:$0xff] %vm16_vm2, %v786_v9  ;;  %v1463_v27 = vpack.c.bf16 %v946_v21, %v946_v21  ;;  %v1429_v28 = vpack.c.bf16 %v912_v22, %v912_v22  ;;  %v944_v29 = vld [vmem:[#allocation2 + $0x1a0] sm:$0xff]  ;;  %883 = vst.msk [vmem:[#allocation2 + $0x1d0] sm:$0xff] %vm16_vm2, %v818_v15  ;;  %v819_v31 = vadd.f32 %v1567_v25, %v140_v12  ;;  %v732_v33 = vpop.f32.mrb[27].mxu1  ;;  %v111_v42 = vld [vmem:[#allocation2 + $0xf0] sm:$0xff] }
 0x110   :  { %v915_v30 = vld [vmem:[#allocation2 + $0xb8] sm:$0xff]  ;;  %849 = vst.msk [vmem:[#allocation2 + $0xc0] sm:$0xff] %vm16_vm2, %v784_v16  ;;  %v785_v32 = vadd.f32 %v604_v26, %v106_v13  ;;  %v1461_v34 = vpack.c.bf16 %v944_v29, %v944_v29  ;;  %881 = vst.msk [vmem:[#allocation2 + $0x1c0] sm:$0xff] %vm16_vm2, %v816_v23  ;;  %v817_v38 = vadd.f32 %v732_v33, %v138_v19  ;;  %v143_v44 = vld [vmem:[#allocation2 + $0x1f0] sm:$0xff] }
 0x111   :  { %1235 = vst.msk [vmem:[%s2214_s2 + $0x58] sm:$0xf] %vm1212_vm3, %v1431_v20  ;;  %v1432_v35 = vpack.c.bf16 %v915_v30, %v915_v30  ;;  %v947_v36 = vld [vmem:[#allocation2 + $0x1b8] sm:$0xff]  ;;  %1267 = vst.msk [vmem:[%s2214_s2 + $0xd8] sm:$0xf] %vm1212_vm3, %v1463_v27  ;;  %v109_v45 = vld [vmem:[#allocation2 + $0xe0] sm:$0xff] }
 0x112   :  { %v913_v37 = vld [vmem:[#allocation2 + $0xa8] sm:$0xff]  ;;  %852 = vst.msk [vmem:[#allocation2 + $0xd8] sm:$0xff] %vm16_vm2, %v787_v24  ;;  %v1464_v39 = vpack.c.bf16 %v947_v36, %v947_v36  ;;  %884 = vst.msk [vmem:[#allocation2 + $0x1d8] sm:$0xff] %vm16_vm2, %v819_v31  ;;  %v1538_v46 = vpop.f32.mrb[28].mxu0  ;;  %v141_v47 = vld [vmem:[#allocation2 + $0x1e0] sm:$0xff]  ;;  %v1570_v50 = vpop.f32.mrb[28].mxu1 }
 0x113   :  { %1233 = vst.msk [vmem:[%s2214_s2 + $0x50] sm:$0xf] %vm1212_vm3, %v1429_v28  ;;  %v1430_v40 = vpack.c.bf16 %v913_v37, %v913_v37  ;;  %v945_v41 = vld [vmem:[#allocation2 + $0x1a8] sm:$0xff]  ;;  %1265 = vst.msk [vmem:[%s2214_s2 + $0xd0] sm:$0xf] %vm1212_vm3, %v1461_v34  ;;  %v112_v48 = vld [vmem:[#allocation2 + $0xf8] sm:$0xff]  ;;  %v790_v49 = vadd.f32 %v1538_v46, %v111_v42  ;;  %v822_v55 = vadd.f32 %v1570_v50, %v143_v44 }
 0x114   :  { %850 = vst.msk [vmem:[#allocation2 + $0xc8] sm:$0xff] %vm16_vm2, %v785_v32  ;;  %v1462_v43 = vpack.c.bf16 %v945_v41, %v945_v41  ;;  %882 = vst.msk [vmem:[#allocation2 + $0x1c8] sm:$0xff] %vm16_vm2, %v817_v38  ;;  %v617_v51 = vpop.f32.mrb[29].mxu0  ;;  %v144_v52 = vld [vmem:[#allocation2 + $0x1f8] sm:$0xff]  ;;  %v110_v53 = vld [vmem:[#allocation2 + $0xe8] sm:$0xff]  ;;  %v745_v57 = vpop.f32.mrb[29].mxu1 }
 0x115   :  { %1236 = vst.msk [vmem:[%s2214_s2 + $0x5c] sm:$0xf] %vm1212_vm3, %v1432_v35  ;;  %1268 = vst.msk [vmem:[%s2214_s2 + $0xdc] sm:$0xf] %vm1212_vm3, %v1464_v39  ;;  %v788_v56 = vadd.f32 %v617_v51, %v109_v45  ;;  %v1539_v58 = vpop.f32.mrb[30].mxu0  ;;  %v142_v59 = vld [vmem:[#allocation2 + $0x1e8] sm:$0xff]  ;;  %v820_v63 = vadd.f32 %v745_v57, %v141_v47 }
 0x116   :  { %1234 = vst.msk [vmem:[%s2214_s2 + $0x54] sm:$0xf] %vm1212_vm3, %v1430_v40  ;;  %1266 = vst.msk [vmem:[%s2214_s2 + $0xd4] sm:$0xf] %vm1212_vm3, %v1462_v43  ;;  %v918_v54 = vld [vmem:[#allocation2 + $0xd0] sm:$0xff]  ;;  %v791_v0 = vadd.f32 %v1539_v58, %v112_v48  ;;  %v1571_v1 = vpop.f32.mrb[30].mxu1 }
 0x117   :  { %v1435_v60 = vpack.c.bf16 %v918_v54, %v918_v54  ;;  %v950_v61 = vld [vmem:[#allocation2 + $0x1d0] sm:$0xff]  ;;  %v916_v62 = vld [vmem:[#allocation2 + $0xc0] sm:$0xff]  ;;  %855 = vst.msk [vmem:[#allocation2 + $0xf0] sm:$0xff] %vm16_vm2, %v790_v49  ;;  %v620_v2 = vpop.f32.mrb[31].mxu0  ;;  %887 = vst.msk [vmem:[#allocation2 + $0x1f0] sm:$0xff] %vm16_vm2, %v822_v55  ;;  %v823_v7 = vadd.f32 %v1571_v1, %v144_v52  ;;  %v748_v9 = vpop.f32.mrb[31].mxu1 }
 0x118   :  { %v1467_v3 = vpack.c.bf16 %v950_v61, %v950_v61  ;;  %v1433_v4 = vpack.c.bf16 %v916_v62, %v916_v62  ;;  %v948_v5 = vld [vmem:[#allocation2 + $0x1c0] sm:$0xff]  ;;  %853 = vst.msk [vmem:[#allocation2 + $0xe0] sm:$0xff] %vm16_vm2, %v788_v56  ;;  %v789_v8 = vadd.f32 %v620_v2, %v110_v53  ;;  %885 = vst.msk [vmem:[#allocation2 + $0x1e0] sm:$0xff] %vm16_vm2, %v820_v63 }
 0x119   :  { %v919_v6 = vld [vmem:[#allocation2 + $0xd8] sm:$0xff]  ;;  %1239 = vst.msk [vmem:[%s2214_s2 + $0x68] sm:$0xf] %vm1212_vm3, %v1435_v60  ;;  %v1465_v10 = vpack.c.bf16 %v948_v5, %v948_v5  ;;  %v821_v14 = vadd.f32 %v748_v9, %v142_v59 }
 0x11a   :  { %v1436_v11 = vpack.c.bf16 %v919_v6, %v919_v6  ;;  %v951_v12 = vld [vmem:[#allocation2 + $0x1d8] sm:$0xff]  ;;  %856 = vst.msk [vmem:[#allocation2 + $0xf8] sm:$0xff] %vm16_vm2, %v791_v0  ;;  %888 = vst.msk [vmem:[#allocation2 + $0x1f8] sm:$0xff] %vm16_vm2, %v823_v7 }
 0x11b   :  { %v917_v13 = vld [vmem:[#allocation2 + $0xc8] sm:$0xff]  ;;  %1271 = vst.msk [vmem:[%s2214_s2 + $0xe8] sm:$0xf] %vm1212_vm3, %v1467_v3  ;;  %1237 = vst.msk [vmem:[%s2214_s2 + $0x60] sm:$0xf] %vm1212_vm3, %v1433_v4  ;;  %v1468_v15 = vpack.c.bf16 %v951_v12, %v951_v12 }
 0x11c   :  { %v1434_v16 = vpack.c.bf16 %v917_v13, %v917_v13  ;;  %v949_v17 = vld [vmem:[#allocation2 + $0x1c8] sm:$0xff]  ;;  %854 = vst.msk [vmem:[#allocation2 + $0xe8] sm:$0xff] %vm16_vm2, %v789_v8  ;;  %886 = vst.msk [vmem:[#allocation2 + $0x1e8] sm:$0xff] %vm16_vm2, %v821_v14 }
 0x11d   :  { %1269 = vst.msk [vmem:[%s2214_s2 + $0xe0] sm:$0xf] %vm1212_vm3, %v1465_v10  ;;  %1240 = vst.msk [vmem:[%s2214_s2 + $0x6c] sm:$0xf] %vm1212_vm3, %v1436_v11  ;;  %v1466_v18 = vpack.c.bf16 %v949_v17, %v949_v17 }
 0x11e   :  { %1272 = vst.msk [vmem:[%s2214_s2 + $0xec] sm:$0xf] %vm1212_vm3, %v1468_v15  ;;  %1238 = vst.msk [vmem:[%s2214_s2 + $0x64] sm:$0xf] %vm1212_vm3, %v1434_v16  ;;  %v922_v19 = vld [vmem:[#allocation2 + $0xf0] sm:$0xff] }
 0x11f   :  { %1270 = vst.msk [vmem:[%s2214_s2 + $0xe4] sm:$0xf] %vm1212_vm3, %v1466_v18  ;;  %v1439_v20 = vpack.c.bf16 %v922_v19, %v922_v19  ;;  %v954_v21 = vld [vmem:[#allocation2 + $0x1f0] sm:$0xff]  ;;  %v920_v22 = vld [vmem:[#allocation2 + $0xe0] sm:$0xff] }
 0x120   :  { %v1471_v23 = vpack.c.bf16 %v954_v21, %v954_v21  ;;  %v1437_v24 = vpack.c.bf16 %v920_v22, %v920_v22  ;;  %v952_v25 = vld [vmem:[#allocation2 + $0x1e0] sm:$0xff] }
 0x121   :  { %v923_v26 = vld [vmem:[#allocation2 + $0xf8] sm:$0xff]  ;;  %1243 = vst.msk [vmem:[%s2214_s2 + $0x78] sm:$0xf] %vm1212_vm3, %v1439_v20  ;;  %v1469_v27 = vpack.c.bf16 %v952_v25, %v952_v25 }
 0x122   :  { %v1440_v28 = vpack.c.bf16 %v923_v26, %v923_v26  ;;  %v955_v29 = vld [vmem:[#allocation2 + $0x1f8] sm:$0xff]  ;;  %1275 = vst.msk [vmem:[%s2214_s2 + $0xf8] sm:$0xf] %vm1212_vm3, %v1471_v23  ;;  %1241 = vst.msk [vmem:[%s2214_s2 + $0x70] sm:$0xf] %vm1212_vm3, %v1437_v24 }
 0x123   :  { %v921_v30 = vld [vmem:[#allocation2 + $0xe8] sm:$0xff]  ;;  %v1472_v31 = vpack.c.bf16 %v955_v29, %v955_v29  ;;  %1273 = vst.msk [vmem:[%s2214_s2 + $0xf0] sm:$0xf] %vm1212_vm3, %v1469_v27 }
 0x124   :  { %v1438_v32 = vpack.c.bf16 %v921_v30, %v921_v30  ;;  %v953_v33 = vld [vmem:[#allocation2 + $0x1e8] sm:$0xff]  ;;  %1244 = vst.msk [vmem:[%s2214_s2 + $0x7c] sm:$0xf] %vm1212_vm3, %v1440_v28 }
 0x125   :  { %v1470_v34 = vpack.c.bf16 %v953_v33, %v953_v33  ;;  %1276 = vst.msk [vmem:[%s2214_s2 + $0xfc] sm:$0xf] %vm1212_vm3, %v1472_v31 }
 0x126   :  { %1242 = vst.msk [vmem:[%s2214_s2 + $0x74] sm:$0xf] %vm1212_vm3, %v1438_v32 }
 0x127   :  { %1274 = vst.msk [vmem:[%s2214_s2 + $0xf4] sm:$0xf] %vm1212_vm3, %v1470_v34 }

// kernel: attention2d_forward.5
= control target key start
LH: loop header
LB: loop body
LE: loop exit
PB: predicated region body
PF: predicated region fallthrough
CT: control target
= control target key end

     0   :  { %vm19_vm0 = vcmask 31744   ;;  %v1302_v1 = vmov 0.0   ;;  %vm380_vm1 = vcmask 130048   ;;  %s1977_s1 = inlined_call_operand.vmem [shape: bf16[16,4], index: 1, kind: input, shape index: {}]   ;;  %s1978_s0 = inlined_call_operand.vmem [shape: bf16[512,16], index: 0, kind: input, shape index: {}]   ;;  %s1979_s2 = inlined_call_operand.vmem [shape: f32[1,4], index: 2, kind: input, shape index: {}]   ;;  %s1980_s3 = inlined_call_operand.vmem [shape: f32[512,4], index: 3, kind: output, shape index: {}]  }
   0x1   :  { %v1326_v0 = vld [vmem:[%s1977_s1] sm:$0xff]   ;;  %22 = vst.msk [vmem:[#allocation2 + $0x10] sm:$0xff] %vm19_vm0, %v1302_v1  ;;  %20 = vst.msk [vmem:[#allocation2] sm:$0xff] %vm19_vm0, %v1302_v1  ;;  %v1272_v4 = vld [vmem:[%s1978_s0 + $0x8] sm:$0xff]  }
   0x2   :  { %21 = vst.msk [vmem:[#allocation2 + $0x8] sm:$0xff] %vm19_vm0, %v1302_v1  ;;  %23 = vst.msk [vmem:[#allocation2 + $0x18] sm:$0xff] %vm19_vm0, %v1302_v1  ;;  %v1270_v2 = vld [vmem:[%s1978_s0] sm:$0xff]   ;;  %1200 = vmatprep.subr.bf16.mxu0 %v1326_v0  ;;  %1266 = vmatprep.subr.bf16.mxu1 %v1326_v0  ;;  %v1273_v5 = vld [vmem:[%s1978_s0 + $0x88] sm:$0xff]  }
   0x3   :  { %24 = vst.msk [vmem:[#allocation2 + $0x20] sm:$0xff] %vm19_vm0, %v1302_v1  ;;  %25 = vst.msk [vmem:[#allocation2 + $0x28] sm:$0xff] %vm19_vm0, %v1302_v1  ;;  %v1271_v3 = vld [vmem:[%s1978_s0 + $0x80] sm:$0xff]   ;;  %1201 = vmatpush3.bf16.msra.mxu0 %v1326_v0  ;;  %1267 = vmatpush3.bf16.msra.mxu1 %v1326_v0  ;;  %v1274_v6 = vld [vmem:[%s1978_s0 + $0x10] sm:$0xff]  }
   0x4   :  { %26 = vst.msk [vmem:[#allocation2 + $0x30] sm:$0xff] %vm19_vm0, %v1302_v1  ;;  %27 = vst.msk [vmem:[#allocation2 + $0x38] sm:$0xff] %vm19_vm0, %v1302_v1  ;;  %1202 = vmatprep.mubr.msk.bf16.mxu0 %vm380_vm1, %v1270_v2  ;;  %1234 = vmatprep.mubr.msk.bf16.mxu1 %vm380_vm1, %v1271_v3  ;;  %v1275_v7 = vld [vmem:[%s1978_s0 + $0x90] sm:$0xff]   ;;  %v1276_v8 = vld [vmem:[%s1978_s0 + $0x18] sm:$0xff]  }
   0x5   :  { %28 = vst.msk [vmem:[#allocation2 + $0x40] sm:$0xff] %vm19_vm0, %v1302_v1  ;;  %29 = vst.msk [vmem:[#allocation2 + $0x48] sm:$0xff] %vm19_vm0, %v1302_v1  ;;  %v1277_v9 = vld [vmem:[%s1978_s0 + $0x98] sm:$0xff]   ;;  %v1278_v10 = vld [vmem:[%s1978_s0 + $0x20] sm:$0xff]  }
   0x6   :  { %30 = vst.msk [vmem:[#allocation2 + $0x50] sm:$0xff] %vm19_vm0, %v1302_v1  ;;  %31 = vst.msk [vmem:[#allocation2 + $0x58] sm:$0xff] %vm19_vm0, %v1302_v1  ;;  %1203 = vmatmul.mubr.msk.bf16.vlgmr.msra.gmra.mrb[0].mxu0 %vm380_vm1, %v1272_v4  ;;  %1235 = vmatmul.mubr.msk.bf16.vlgmr.msra.gmra.mrb[0].mxu1 %vm380_vm1, %v1273_v5  ;;  %v1279_v11 = vld [vmem:[%s1978_s0 + $0xa0] sm:$0xff]   ;;  %v1280_v12 = vld [vmem:[%s1978_s0 + $0x28] sm:$0xff]  }
   0x7   :  { %32 = vst.msk [vmem:[#allocation2 + $0x60] sm:$0xff] %vm19_vm0, %v1302_v1  ;;  %33 = vst.msk [vmem:[#allocation2 + $0x68] sm:$0xff] %vm19_vm0, %v1302_v1  ;;  %1206 = vmatprep.mubr.msk.bf16.mxu0 %vm380_vm1, %v1274_v6  ;;  %1238 = vmatprep.mubr.msk.bf16.mxu1 %vm380_vm1, %v1275_v7  ;;  %v1281_v13 = vld [vmem:[%s1978_s0 + $0xa8] sm:$0xff]   ;;  %v1282_v14 = vld [vmem:[%s1978_s0 + $0x30] sm:$0xff]  }
   0x8   :  { %34 = vst.msk [vmem:[#allocation2 + $0x70] sm:$0xff] %vm19_vm0, %v1302_v1  ;;  %35 = vst.msk [vmem:[#allocation2 + $0x78] sm:$0xff] %vm19_vm0, %v1302_v1  ;;  %v1283_v15 = vld [vmem:[%s1978_s0 + $0xb0] sm:$0xff]   ;;  %v1284_v16 = vld [vmem:[%s1978_s0 + $0x38] sm:$0xff]  }
   0x9   :  { %36 = vst.msk [vmem:[#allocation2 + $0x80] sm:$0xff] %vm19_vm0, %v1302_v1  ;;  %37 = vst.msk [vmem:[#allocation2 + $0x88] sm:$0xff] %vm19_vm0, %v1302_v1  ;;  %v1285_v17 = vld [vmem:[%s1978_s0 + $0xb8] sm:$0xff]   ;;  %v1286_v18 = vld [vmem:[%s1978_s0 + $0x40] sm:$0xff]  }
   0xa   :  { %38 = vst.msk [vmem:[#allocation2 + $0x90] sm:$0xff] %vm19_vm0, %v1302_v1  ;;  %39 = vst.msk [vmem:[#allocation2 + $0x98] sm:$0xff] %vm19_vm0, %v1302_v1  ;;  %v1287_v19 = vld [vmem:[%s1978_s0 + $0xc0] sm:$0xff]   ;;  %v1288_v20 = vld [vmem:[%s1978_s0 + $0x48] sm:$0xff]  }
   0xb   :  { %40 = vst.msk [vmem:[#allocation2 + $0xa0] sm:$0xff] %vm19_vm0, %v1302_v1  ;;  %41 = vst.msk [vmem:[#allocation2 + $0xa8] sm:$0xff] %vm19_vm0, %v1302_v1  ;;  %v1289_v21 = vld [vmem:[%s1978_s0 + $0xc8] sm:$0xff]   ;;  %v1290_v22 = vld [vmem:[%s1978_s0 + $0x50] sm:$0xff]  }
   0xc   :  { %42 = vst.msk [vmem:[#allocation2 + $0xb0] sm:$0xff] %vm19_vm0, %v1302_v1  ;;  %43 = vst.msk [vmem:[#allocation2 + $0xb8] sm:$0xff] %vm19_vm0, %v1302_v1  ;;  %v1291_v23 = vld [vmem:[%s1978_s0 + $0xd0] sm:$0xff]   ;;  %v1292_v24 = vld [vmem:[%s1978_s0 + $0x58] sm:$0xff]  }
   0xd   :  { %44 = vst.msk [vmem:[#allocation2 + $0xc0] sm:$0xff] %vm19_vm0, %v1302_v1  ;;  %45 = vst.msk [vmem:[#allocation2 + $0xc8] sm:$0xff] %vm19_vm0, %v1302_v1  ;;  %v1293_v25 = vld [vmem:[%s1978_s0 + $0xd8] sm:$0xff]   ;;  %v1294_v26 = vld [vmem:[%s1978_s0 + $0x60] sm:$0xff]  }
   0xe   :  { %46 = vst.msk [vmem:[#allocation2 + $0xd0] sm:$0xff] %vm19_vm0, %v1302_v1  ;;  %47 = vst.msk [vmem:[#allocation2 + $0xd8] sm:$0xff] %vm19_vm0, %v1302_v1  ;;  %1207 = vmatmul.mubr.msk.bf16.gmra.mrb[4].mxu0 %vm380_vm1, %v1276_v8  ;;  %1239 = vmatmul.mubr.msk.bf16.gmra.mrb[4].mxu1 %vm380_vm1, %v1277_v9  ;;  %v1295_v27 = vld [vmem:[%s1978_s0 + $0xe0] sm:$0xff]   ;;  %v1296_v28 = vld [vmem:[%s1978_s0 + $0x68] sm:$0xff]  }
   0xf   :  { %48 = vst.msk [vmem:[#allocation2 + $0xe0] sm:$0xff] %vm19_vm0, %v1302_v1  ;;  %49 = vst.msk [vmem:[#allocation2 + $0xe8] sm:$0xff] %vm19_vm0, %v1302_v1  ;;  %1210 = vmatprep.mubr.msk.bf16.mxu0 %vm380_vm1, %v1278_v10  ;;  %1242 = vmatprep.mubr.msk.bf16.mxu1 %vm380_vm1, %v1279_v11  ;;  %v1297_v29 = vld [vmem:[%s1978_s0 + $0xe8] sm:$0xff]   ;;  %v1298_v30 = vld [vmem:[%s1978_s0 + $0x70] sm:$0xff]  }
  0x10   :  { %50 = vst.msk [vmem:[#allocation2 + $0xf0] sm:$0xff] %vm19_vm0, %v1302_v1  ;;  %51 = vst.msk [vmem:[#allocation2 + $0xf8] sm:$0xff] %vm19_vm0, %v1302_v1  ;;  %v1299_v31 = vld [vmem:[%s1978_s0 + $0xf0] sm:$0xff]   ;;  %v1300_v32 = vld [vmem:[%s1978_s0 + $0x78] sm:$0xff]  }
  0x11   :  { %52 = vst.msk [vmem:[#allocation2 + $0x100] sm:$0xff] %vm19_vm0, %v1302_v1  ;;  %53 = vst.msk [vmem:[#allocation2 + $0x108] sm:$0xff] %vm19_vm0, %v1302_v1  ;;  %v1301_v33 = vld [vmem:[%s1978_s0 + $0xf8] sm:$0xff]   ;;  %v86_v34 = vld [vmem:[#allocation2 + $0x10] sm:$0xff] }
  0x12   :  { %54 = vst.msk [vmem:[#allocation2 + $0x110] sm:$0xff] %vm19_vm0, %v1302_v1  ;;  %55 = vst.msk [vmem:[#allocation2 + $0x118] sm:$0xff] %vm19_vm0, %v1302_v1  ;;  %v84_v36 = vld [vmem:[#allocation2] sm:$0xff]  ;;  %v87_v40 = vld [vmem:[#allocation2 + $0x18] sm:$0xff] }
  0x13   :  { %56 = vst.msk [vmem:[#allocation2 + $0x120] sm:$0xff] %vm19_vm0, %v1302_v1  ;;  %57 = vst.msk [vmem:[#allocation2 + $0x128] sm:$0xff] %vm19_vm0, %v1302_v1  ;;  %v85_v46 = vld [vmem:[#allocation2 + $0x8] sm:$0xff]  ;;  %v90_v58 = vld [vmem:[#allocation2 + $0x30] sm:$0xff] }
  0x14   :  { %58 = vst.msk [vmem:[#allocation2 + $0x130] sm:$0xff] %vm19_vm0, %v1302_v1  ;;  %59 = vst.msk [vmem:[#allocation2 + $0x138] sm:$0xff] %vm19_vm0, %v1302_v1  ;;  %v88_v60 = vld [vmem:[#allocation2 + $0x20] sm:$0xff]  ;;  %v89_v7 = vld [vmem:[#allocation2 + $0x28] sm:$0xff] }
  0x15   :  { %60 = vst.msk [vmem:[#allocation2 + $0x140] sm:$0xff] %vm19_vm0, %v1302_v1  ;;  %61 = vst.msk [vmem:[#allocation2 + $0x148] sm:$0xff] %vm19_vm0, %v1302_v1  ;;  %v1599_v62 = vld [vmem:[%s1979_s2] ss:$0 sm:$0xff] }
  0x16   :  { %62 = vst.msk [vmem:[#allocation2 + $0x150] sm:$0xff] %vm19_vm0, %v1302_v1  ;;  %63 = vst.msk [vmem:[#allocation2 + $0x158] sm:$0xff] %vm19_vm0, %v1302_v1  ;;  %1211 = vmatmul.mubr.msk.bf16.gmra.mrb[8].mxu0 %vm380_vm1, %v1280_v12  ;;  %1243 = vmatmul.mubr.msk.bf16.gmra.mrb[8].mxu1 %vm380_vm1, %v1281_v13 }
  0x17   :  { %64 = vst.msk [vmem:[#allocation2 + $0x160] sm:$0xff] %vm19_vm0, %v1302_v1  ;;  %65 = vst.msk [vmem:[#allocation2 + $0x168] sm:$0xff] %vm19_vm0, %v1302_v1  ;;  %1214 = vmatprep.mubr.msk.bf16.mxu0 %vm380_vm1, %v1282_v14  ;;  %1246 = vmatprep.mubr.msk.bf16.mxu1 %vm380_vm1, %v1283_v15 }
  0x18   :  { %66 = vst.msk [vmem:[#allocation2 + $0x170] sm:$0xff] %vm19_vm0, %v1302_v1  ;;  %67 = vst.msk [vmem:[#allocation2 + $0x178] sm:$0xff] %vm19_vm0, %v1302_v1  ;;  %v116_v37 = vld [vmem:[#allocation2 + $0x100] sm:$0xff]  ;;  %v117_v47 = vld [vmem:[#allocation2 + $0x108] sm:$0xff] }
  0x19   :  { %68 = vst.msk [vmem:[#allocation2 + $0x180] sm:$0xff] %vm19_vm0, %v1302_v1  ;;  %69 = vst.msk [vmem:[#allocation2 + $0x188] sm:$0xff] %vm19_vm0, %v1302_v1  ;;  %v118_v35 = vld [vmem:[#allocation2 + $0x110] sm:$0xff]  ;;  %v119_v41 = vld [vmem:[#allocation2 + $0x118] sm:$0xff] }
  0x1a   :  { %70 = vst.msk [vmem:[#allocation2 + $0x190] sm:$0xff] %vm19_vm0, %v1302_v1  ;;  %71 = vst.msk [vmem:[#allocation2 + $0x198] sm:$0xff] %vm19_vm0, %v1302_v1  ;;  %v120_v61 = vld [vmem:[#allocation2 + $0x120] sm:$0xff]  ;;  %v121_v8 = vld [vmem:[#allocation2 + $0x128] sm:$0xff] }
  0x1b   :  { %72 = vst.msk [vmem:[#allocation2 + $0x1a0] sm:$0xff] %vm19_vm0, %v1302_v1  ;;  %73 = vst.msk [vmem:[#allocation2 + $0x1a8] sm:$0xff] %vm19_vm0, %v1302_v1  ;;  %v122_v59 = vld [vmem:[#allocation2 + $0x130] sm:$0xff]  ;;  %v123_v2 = vld [vmem:[#allocation2 + $0x138] sm:$0xff] }
  0x1c   :  { %74 = vst.msk [vmem:[#allocation2 + $0x1b0] sm:$0xff] %vm19_vm0, %v1302_v1  ;;  %75 = vst.msk [vmem:[#allocation2 + $0x1b8] sm:$0xff] %vm19_vm0, %v1302_v1 }
  0x1d   :  { %76 = vst.msk [vmem:[#allocation2 + $0x1c0] sm:$0xff] %vm19_vm0, %v1302_v1  ;;  %77 = vst.msk [vmem:[#allocation2 + $0x1c8] sm:$0xff] %vm19_vm0, %v1302_v1 }
  0x1e   :  { %78 = vst.msk [vmem:[#allocation2 + $0x1d0] sm:$0xff] %vm19_vm0, %v1302_v1  ;;  %79 = vst.msk [vmem:[#allocation2 + $0x1d8] sm:$0xff] %vm19_vm0, %v1302_v1  ;;  %1215 = vmatmul.mubr.msk.bf16.gmra.mrb[12].mxu0 %vm380_vm1, %v1284_v16  ;;  %1247 = vmatmul.mubr.msk.bf16.gmra.mrb[12].mxu1 %vm380_vm1, %v1285_v17 }
  0x1f   :  { %80 = vst.msk [vmem:[#allocation2 + $0x1e0] sm:$0xff] %vm19_vm0, %v1302_v1  ;;  %81 = vst.msk [vmem:[#allocation2 + $0x1e8] sm:$0xff] %vm19_vm0, %v1302_v1  ;;  %1218 = vmatprep.mubr.msk.bf16.mxu0 %vm380_vm1, %v1286_v18  ;;  %1250 = vmatprep.mubr.msk.bf16.mxu1 %vm380_vm1, %v1287_v19 }
  0x20   :  { %82 = vst.msk [vmem:[#allocation2 + $0x1f0] sm:$0xff] %vm19_vm0, %v1302_v1  ;;  %83 = vst.msk [vmem:[#allocation2 + $0x1f8] sm:$0xff] %vm19_vm0, %v1302_v1  ;;  %v91_v1 = vld [vmem:[#allocation2 + $0x38] sm:$0xff] }
  0x26   :  { %1219 = vmatmul.mubr.msk.bf16.gmra.mrb[16].mxu0 %vm380_vm1, %v1288_v20  ;;  %1251 = vmatmul.mubr.msk.bf16.gmra.mrb[16].mxu1 %vm380_vm1, %v1289_v21 }
  0x27   :  { %1222 = vmatprep.mubr.msk.bf16.mxu0 %vm380_vm1, %v1290_v22  ;;  %1254 = vmatprep.mubr.msk.bf16.mxu1 %vm380_vm1, %v1291_v23 }
  0x2e   :  { %1223 = vmatmul.mubr.msk.bf16.gmra.mrb[20].mxu0 %vm380_vm1, %v1292_v24  ;;  %1255 = vmatmul.mubr.msk.bf16.gmra.mrb[20].mxu1 %vm380_vm1, %v1293_v25 }
  0x2f   :  { %1226 = vmatprep.mubr.msk.bf16.mxu0 %vm380_vm1, %v1294_v26  ;;  %1258 = vmatprep.mubr.msk.bf16.mxu1 %vm380_vm1, %v1295_v27 }
  0x36   :  { %1227 = vmatmul.mubr.msk.bf16.gmra.mrb[24].mxu0 %vm380_vm1, %v1296_v28  ;;  %1259 = vmatmul.mubr.msk.bf16.gmra.mrb[24].mxu1 %vm380_vm1, %v1297_v29 }
  0x37   :  { %1230 = vmatprep.mubr.msk.bf16.mxu0 %vm380_vm1, %v1298_v30  ;;  %1262 = vmatprep.mubr.msk.bf16.mxu1 %vm380_vm1, %v1299_v31 }
  0x3e   :  { %1231 = vmatmul.mubr.msk.bf16.gmra.mrb[28].mxu0 %vm380_vm1, %v1300_v32  ;;  %1263 = vmatmul.mubr.msk.bf16.gmra.mrb[28].mxu1 %vm380_vm1, %v1301_v33 }
  0xd9   :  { %v1204_v38 = vpop.f32.mrb[0].mxu0  ;;  %v1236_v39 = vpop.f32.mrb[0].mxu1 }
  0xda   :  { %v768_v42 = vadd.f32 %v1204_v38, %v86_v34  ;;  %v800_v43 = vadd.f32 %v1236_v39, %v118_v35  ;;  %v511_v44 = vpop.f32.mrb[1].mxu0  ;;  %v639_v45 = vpop.f32.mrb[1].mxu1  ;;  %v94_v35 = vld [vmem:[#allocation2 + $0x50] sm:$0xff]  ;;  %v124_v38 = vld [vmem:[#allocation2 + $0x140] sm:$0xff] }
  0xdb   :  { %v766_v48 = vadd.f32 %v511_v44, %v84_v36  ;;  %v798_v49 = vadd.f32 %v639_v45, %v116_v37  ;;  %v1205_v50 = vpop.f32.mrb[2].mxu0  ;;  %v1237_v51 = vpop.f32.mrb[2].mxu1  ;;  %v126_v36 = vld [vmem:[#allocation2 + $0x150] sm:$0xff]  ;;  %v92_v37 = vld [vmem:[#allocation2 + $0x40] sm:$0xff] }
  0xdc   :  { %833 = vst.msk [vmem:[#allocation2 + $0x10] sm:$0xff] %vm19_vm0, %v768_v42  ;;  %865 = vst.msk [vmem:[#allocation2 + $0x110] sm:$0xff] %vm19_vm0, %v800_v43  ;;  %v769_v52 = vadd.f32 %v1205_v50, %v87_v40  ;;  %v801_v53 = vadd.f32 %v1237_v51, %v119_v41  ;;  %v514_v54 = vpop.f32.mrb[3].mxu0  ;;  %v642_v55 = vpop.f32.mrb[3].mxu1  ;;  %v95_v41 = vld [vmem:[#allocation2 + $0x58] sm:$0xff] }
  0xdd   :  { %831 = vst.msk [vmem:[#allocation2] sm:$0xff] %vm19_vm0, %v766_v48  ;;  %863 = vst.msk [vmem:[#allocation2 + $0x100] sm:$0xff] %vm19_vm0, %v798_v49  ;;  %v767_v56 = vadd.f32 %v514_v54, %v85_v46  ;;  %v799_v57 = vadd.f32 %v642_v55, %v117_v47  ;;  %v127_v42 = vld [vmem:[#allocation2 + $0x158] sm:$0xff]  ;;  %v93_v47 = vld [vmem:[#allocation2 + $0x48] sm:$0xff] }
  0xde   :  { %834 = vst.msk [vmem:[#allocation2 + $0x18] sm:$0xff] %vm19_vm0, %v769_v52  ;;  %866 = vst.msk [vmem:[#allocation2 + $0x118] sm:$0xff] %vm19_vm0, %v801_v53  ;;  %v125_v48 = vld [vmem:[#allocation2 + $0x148] sm:$0xff] }
  0xdf   :  { %832 = vst.msk [vmem:[#allocation2 + $0x8] sm:$0xff] %vm19_vm0, %v767_v56  ;;  %864 = vst.msk [vmem:[#allocation2 + $0x108] sm:$0xff] %vm19_vm0, %v799_v57 }
  0xe1   :  { %v1208_v63 = vpop.f32.mrb[4].mxu0  ;;  %v1240_v0 = vpop.f32.mrb[4].mxu1 }
  0xe2   :  { %v772_v3 = vadd.f32 %v1208_v63, %v90_v58  ;;  %v804_v4 = vadd.f32 %v1240_v0, %v122_v59  ;;  %v527_v5 = vpop.f32.mrb[5].mxu0  ;;  %v655_v6 = vpop.f32.mrb[5].mxu1 }
  0xe3   :  { %v900_v9 = vld [vmem:[#allocation2 + $0x10] sm:$0xff]  ;;  %v770_v11 = vadd.f32 %v527_v5, %v88_v60  ;;  %v802_v12 = vadd.f32 %v655_v6, %v120_v61  ;;  %v1209_v13 = vpop.f32.mrb[6].mxu0  ;;  %v1241_v14 = vpop.f32.mrb[6].mxu1 }
  0xe4   :  { %v932_v10 = vld [vmem:[#allocation2 + $0x110] sm:$0xff]  ;;  %v971_v15 = vadd.f32 %v1599_v62, %v900_v9  ;;  %v898_v17 = vld [vmem:[#allocation2] sm:$0xff]  ;;  %837 = vst.msk [vmem:[#allocation2 + $0x30] sm:$0xff] %vm19_vm0, %v772_v3  ;;  %869 = vst.msk [vmem:[#allocation2 + $0x130] sm:$0xff] %vm19_vm0, %v804_v4  ;;  %v773_v19 = vadd.f32 %v1209_v13, %v91_v1  ;;  %v805_v20 = vadd.f32 %v1241_v14, %v123_v2  ;;  %v530_v21 = vpop.f32.mrb[7].mxu0  ;;  %v658_v22 = vpop.f32.mrb[7].mxu1 }
  0xe5   :  { %v1003_v16 = vadd.f32 %v1599_v62, %v932_v10  ;;  %v930_v18 = vld [vmem:[#allocation2 + $0x100] sm:$0xff]  ;;  %v969_v23 = vadd.f32 %v1599_v62, %v898_v17  ;;  %v901_v25 = vld [vmem:[#allocation2 + $0x18] sm:$0xff]  ;;  %835 = vst.msk [vmem:[#allocation2 + $0x20] sm:$0xff] %vm19_vm0, %v770_v11  ;;  %867 = vst.msk [vmem:[#allocation2 + $0x120] sm:$0xff] %vm19_vm0, %v802_v12  ;;  %v771_v27 = vadd.f32 %v530_v21, %v89_v7 }
  0xe6   :  { %v1001_v24 = vadd.f32 %v1599_v62, %v930_v18  ;;  %v933_v26 = vld [vmem:[#allocation2 + $0x118] sm:$0xff]  ;;  %v803_v28 = vadd.f32 %v658_v22, %v121_v8  ;;  %1035 = vst.msk [vmem:[%s1980_s3 + $0x10] sm:$0xff] %vm19_vm0, %v971_v15  ;;  %v972_v29 = vadd.f32 %v1599_v62, %v901_v25  ;;  %v899_v31 = vld [vmem:[#allocation2 + $0x8] sm:$0xff]  ;;  %838 = vst.msk [vmem:[#allocation2 + $0x38] sm:$0xff] %vm19_vm0, %v773_v19 }
  0xe7   :  { %1067 = vst.msk [vmem:[%s1980_s3 + $0x110] sm:$0xff] %vm19_vm0, %v1003_v16  ;;  %v1004_v30 = vadd.f32 %v1599_v62, %v933_v26  ;;  %v931_v32 = vld [vmem:[#allocation2 + $0x108] sm:$0xff]  ;;  %870 = vst.msk [vmem:[#allocation2 + $0x138] sm:$0xff] %vm19_vm0, %v805_v20  ;;  %v970_v33 = vadd.f32 %v1599_v62, %v899_v31  ;;  %v98_v12 = vld [vmem:[#allocation2 + $0x70] sm:$0xff] }
  0xe8   :  { %1033 = vst.msk [vmem:[%s1980_s3] sm:$0xff] %vm19_vm0, %v969_v23  ;;  %1065 = vst.msk [vmem:[%s1980_s3 + $0x100] sm:$0xff] %vm19_vm0, %v1001_v24  ;;  %v1002_v34 = vadd.f32 %v1599_v62, %v931_v32  ;;  %v130_v13 = vld [vmem:[#allocation2 + $0x170] sm:$0xff]  ;;  %v96_v14 = vld [vmem:[#allocation2 + $0x60] sm:$0xff] }
  0xe9   :  { %836 = vst.msk [vmem:[#allocation2 + $0x28] sm:$0xff] %vm19_vm0, %v771_v27  ;;  %868 = vst.msk [vmem:[#allocation2 + $0x128] sm:$0xff] %vm19_vm0, %v803_v28  ;;  %v1212_v39 = vpop.f32.mrb[8].mxu0  ;;  %v1244_v40 = vpop.f32.mrb[8].mxu1  ;;  %v128_v15 = vld [vmem:[#allocation2 + $0x160] sm:$0xff]  ;;  %v99_v18 = vld [vmem:[#allocation2 + $0x78] sm:$0xff] }
  0xea   :  { %1036 = vst.msk [vmem:[%s1980_s3 + $0x18] sm:$0xff] %vm19_vm0, %v972_v29  ;;  %1068 = vst.msk [vmem:[%s1980_s3 + $0x118] sm:$0xff] %vm19_vm0, %v1004_v30  ;;  %v776_v43 = vadd.f32 %v1212_v39, %v94_v35  ;;  %v808_v44 = vadd.f32 %v1244_v40, %v126_v36  ;;  %v543_v45 = vpop.f32.mrb[9].mxu0  ;;  %v671_v46 = vpop.f32.mrb[9].mxu1  ;;  %v131_v19 = vld [vmem:[#allocation2 + $0x178] sm:$0xff]  ;;  %v97_v24 = vld [vmem:[#allocation2 + $0x68] sm:$0xff] }
  0xeb   :  { %1034 = vst.msk [vmem:[%s1980_s3 + $0x8] sm:$0xff] %vm19_vm0, %v970_v33  ;;  %1066 = vst.msk [vmem:[%s1980_s3 + $0x108] sm:$0xff] %vm19_vm0, %v1002_v34  ;;  %v904_v49 = vld [vmem:[#allocation2 + $0x30] sm:$0xff]  ;;  %v774_v51 = vadd.f32 %v543_v45, %v92_v37  ;;  %v806_v52 = vadd.f32 %v671_v46, %v124_v38  ;;  %v1213_v53 = vpop.f32.mrb[10].mxu0  ;;  %v1245_v54 = vpop.f32.mrb[10].mxu1  ;;  %v129_v25 = vld [vmem:[#allocation2 + $0x168] sm:$0xff] }
  0xec   :  { %v936_v50 = vld [vmem:[#allocation2 + $0x130] sm:$0xff]  ;;  %v975_v55 = vadd.f32 %v1599_v62, %v904_v49  ;;  %v902_v57 = vld [vmem:[#allocation2 + $0x20] sm:$0xff]  ;;  %841 = vst.msk [vmem:[#allocation2 + $0x50] sm:$0xff] %vm19_vm0, %v776_v43  ;;  %873 = vst.msk [vmem:[#allocation2 + $0x150] sm:$0xff] %vm19_vm0, %v808_v44  ;;  %v777_v59 = vadd.f32 %v1213_v53, %v95_v41  ;;  %v809_v60 = vadd.f32 %v1245_v54, %v127_v42  ;;  %v546_v61 = vpop.f32.mrb[11].mxu0  ;;  %v674_v63 = vpop.f32.mrb[11].mxu1 }
  0xed   :  { %v1007_v56 = vadd.f32 %v1599_v62, %v936_v50  ;;  %v934_v58 = vld [vmem:[#allocation2 + $0x120] sm:$0xff]  ;;  %v973_v0 = vadd.f32 %v1599_v62, %v902_v57  ;;  %v905_v2 = vld [vmem:[#allocation2 + $0x38] sm:$0xff]  ;;  %839 = vst.msk [vmem:[#allocation2 + $0x40] sm:$0xff] %vm19_vm0, %v774_v51  ;;  %871 = vst.msk [vmem:[#allocation2 + $0x140] sm:$0xff] %vm19_vm0, %v806_v52  ;;  %v775_v4 = vadd.f32 %v546_v61, %v93_v47 }
  0xee   :  { %v1005_v1 = vadd.f32 %v1599_v62, %v934_v58  ;;  %v937_v3 = vld [vmem:[#allocation2 + $0x138] sm:$0xff]  ;;  %v807_v5 = vadd.f32 %v674_v63, %v125_v48  ;;  %1039 = vst.msk [vmem:[%s1980_s3 + $0x30] sm:$0xff] %vm19_vm0, %v975_v55  ;;  %v976_v6 = vadd.f32 %v1599_v62, %v905_v2  ;;  %842 = vst.msk [vmem:[#allocation2 + $0x58] sm:$0xff] %vm19_vm0, %v777_v59  ;;  %v102_v52 = vld [vmem:[#allocation2 + $0x90] sm:$0xff] }
  0xef   :  { %1071 = vst.msk [vmem:[%s1980_s3 + $0x130] sm:$0xff] %vm19_vm0, %v1007_v56  ;;  %v1008_v7 = vadd.f32 %v1599_v62, %v937_v3  ;;  %874 = vst.msk [vmem:[#allocation2 + $0x158] sm:$0xff] %vm19_vm0, %v809_v60  ;;  %v134_v53 = vld [vmem:[#allocation2 + $0x190] sm:$0xff]  ;;  %v100_v54 = vld [vmem:[#allocation2 + $0x80] sm:$0xff] }
  0xf0   :  { %v903_v8 = vld [vmem:[#allocation2 + $0x28] sm:$0xff]  ;;  %1037 = vst.msk [vmem:[%s1980_s3 + $0x20] sm:$0xff] %vm19_vm0, %v973_v0  ;;  %1069 = vst.msk [vmem:[%s1980_s3 + $0x120] sm:$0xff] %vm19_vm0, %v1005_v1  ;;  %v132_v55 = vld [vmem:[#allocation2 + $0x180] sm:$0xff] }
  0xf1   :  { %v935_v9 = vld [vmem:[#allocation2 + $0x128] sm:$0xff]  ;;  %v974_v10 = vadd.f32 %v1599_v62, %v903_v8  ;;  %840 = vst.msk [vmem:[#allocation2 + $0x48] sm:$0xff] %vm19_vm0, %v775_v4  ;;  %872 = vst.msk [vmem:[#allocation2 + $0x148] sm:$0xff] %vm19_vm0, %v807_v5  ;;  %v1216_v16 = vpop.f32.mrb[12].mxu0  ;;  %v1248_v17 = vpop.f32.mrb[12].mxu1  ;;  %v103_v58 = vld [vmem:[#allocation2 + $0x98] sm:$0xff] }
  0xf2   :  { %v1006_v11 = vadd.f32 %v1599_v62, %v935_v9  ;;  %1040 = vst.msk [vmem:[%s1980_s3 + $0x38] sm:$0xff] %vm19_vm0, %v976_v6  ;;  %1072 = vst.msk [vmem:[%s1980_s3 + $0x138] sm:$0xff] %vm19_vm0, %v1008_v7  ;;  %v780_v20 = vadd.f32 %v1216_v16, %v98_v12  ;;  %v812_v21 = vadd.f32 %v1248_v17, %v130_v13  ;;  %v559_v22 = vpop.f32.mrb[13].mxu0  ;;  %v687_v23 = vpop.f32.mrb[13].mxu1  ;;  %v135_v59 = vld [vmem:[#allocation2 + $0x198] sm:$0xff]  ;;  %v101_v1 = vld [vmem:[#allocation2 + $0x88] sm:$0xff] }
  0xf3   :  { %1038 = vst.msk [vmem:[%s1980_s3 + $0x28] sm:$0xff] %vm19_vm0, %v974_v10  ;;  %v908_v26 = vld [vmem:[#allocation2 + $0x50] sm:$0xff]  ;;  %v778_v28 = vadd.f32 %v559_v22, %v96_v14  ;;  %v810_v29 = vadd.f32 %v687_v23, %v128_v15  ;;  %v1217_v30 = vpop.f32.mrb[14].mxu0  ;;  %v1249_v31 = vpop.f32.mrb[14].mxu1  ;;  %v133_v2 = vld [vmem:[#allocation2 + $0x188] sm:$0xff] }
  0xf4   :  { %1070 = vst.msk [vmem:[%s1980_s3 + $0x128] sm:$0xff] %vm19_vm0, %v1006_v11  ;;  %v940_v27 = vld [vmem:[#allocation2 + $0x150] sm:$0xff]  ;;  %v979_v32 = vadd.f32 %v1599_v62, %v908_v26  ;;  %v906_v34 = vld [vmem:[#allocation2 + $0x40] sm:$0xff]  ;;  %845 = vst.msk [vmem:[#allocation2 + $0x70] sm:$0xff] %vm19_vm0, %v780_v20  ;;  %v781_v36 = vadd.f32 %v1217_v30, %v99_v18  ;;  %v813_v37 = vadd.f32 %v1249_v31, %v131_v19  ;;  %v562_v38 = vpop.f32.mrb[15].mxu0  ;;  %v690_v39 = vpop.f32.mrb[15].mxu1 }
  0xf5   :  { %v1011_v33 = vadd.f32 %v1599_v62, %v940_v27  ;;  %v938_v35 = vld [vmem:[#allocation2 + $0x140] sm:$0xff]  ;;  %877 = vst.msk [vmem:[#allocation2 + $0x170] sm:$0xff] %vm19_vm0, %v812_v21  ;;  %v977_v40 = vadd.f32 %v1599_v62, %v906_v34  ;;  %v909_v42 = vld [vmem:[#allocation2 + $0x58] sm:$0xff]  ;;  %843 = vst.msk [vmem:[#allocation2 + $0x60] sm:$0xff] %vm19_vm0, %v778_v28  ;;  %v779_v44 = vadd.f32 %v562_v38, %v97_v24 }
  0xf6   :  { %v1009_v41 = vadd.f32 %v1599_v62, %v938_v35  ;;  %v941_v43 = vld [vmem:[#allocation2 + $0x158] sm:$0xff]  ;;  %875 = vst.msk [vmem:[#allocation2 + $0x160] sm:$0xff] %vm19_vm0, %v810_v29  ;;  %v811_v45 = vadd.f32 %v690_v39, %v129_v25  ;;  %1043 = vst.msk [vmem:[%s1980_s3 + $0x50] sm:$0xff] %vm19_vm0, %v979_v32  ;;  %v980_v46 = vadd.f32 %v1599_v62, %v909_v42  ;;  %v106_v29 = vld [vmem:[#allocation2 + $0xb0] sm:$0xff] }
  0xf7   :  { %1075 = vst.msk [vmem:[%s1980_s3 + $0x150] sm:$0xff] %vm19_vm0, %v1011_v33  ;;  %v1012_v47 = vadd.f32 %v1599_v62, %v941_v43  ;;  %846 = vst.msk [vmem:[#allocation2 + $0x78] sm:$0xff] %vm19_vm0, %v781_v36  ;;  %v138_v30 = vld [vmem:[#allocation2 + $0x1b0] sm:$0xff]  ;;  %v104_v31 = vld [vmem:[#allocation2 + $0xa0] sm:$0xff] }
  0xf8   :  { %v907_v48 = vld [vmem:[#allocation2 + $0x48] sm:$0xff]  ;;  %878 = vst.msk [vmem:[#allocation2 + $0x178] sm:$0xff] %vm19_vm0, %v813_v37  ;;  %1041 = vst.msk [vmem:[%s1980_s3 + $0x40] sm:$0xff] %vm19_vm0, %v977_v40  ;;  %v136_v32 = vld [vmem:[#allocation2 + $0x1a0] sm:$0xff] }
  0xf9   :  { %v939_v49 = vld [vmem:[#allocation2 + $0x148] sm:$0xff]  ;;  %1073 = vst.msk [vmem:[%s1980_s3 + $0x140] sm:$0xff] %vm19_vm0, %v1009_v41  ;;  %v978_v50 = vadd.f32 %v1599_v62, %v907_v48  ;;  %844 = vst.msk [vmem:[#allocation2 + $0x68] sm:$0xff] %vm19_vm0, %v779_v44  ;;  %v1220_v56 = vpop.f32.mrb[16].mxu0  ;;  %v1252_v57 = vpop.f32.mrb[16].mxu1  ;;  %v107_v35 = vld [vmem:[#allocation2 + $0xb8] sm:$0xff] }
  0xfa   :  { %v1010_v51 = vadd.f32 %v1599_v62, %v939_v49  ;;  %876 = vst.msk [vmem:[#allocation2 + $0x168] sm:$0xff] %vm19_vm0, %v811_v45  ;;  %1044 = vst.msk [vmem:[%s1980_s3 + $0x58] sm:$0xff] %vm19_vm0, %v980_v46  ;;  %v784_v60 = vadd.f32 %v1220_v56, %v102_v52  ;;  %v816_v61 = vadd.f32 %v1252_v57, %v134_v53  ;;  %v575_v63 = vpop.f32.mrb[17].mxu0  ;;  %v703_v0 = vpop.f32.mrb[17].mxu1  ;;  %v139_v36 = vld [vmem:[#allocation2 + $0x1b8] sm:$0xff]  ;;  %v105_v41 = vld [vmem:[#allocation2 + $0xa8] sm:$0xff] }
  0xfb   :  { %1076 = vst.msk [vmem:[%s1980_s3 + $0x158] sm:$0xff] %vm19_vm0, %v1012_v47  ;;  %1042 = vst.msk [vmem:[%s1980_s3 + $0x48] sm:$0xff] %vm19_vm0, %v978_v50  ;;  %v912_v3 = vld [vmem:[#allocation2 + $0x70] sm:$0xff]  ;;  %v782_v5 = vadd.f32 %v575_v63, %v100_v54  ;;  %v814_v6 = vadd.f32 %v703_v0, %v132_v55  ;;  %v1221_v7 = vpop.f32.mrb[18].mxu0  ;;  %v1253_v8 = vpop.f32.mrb[18].mxu1  ;;  %v137_v42 = vld [vmem:[#allocation2 + $0x1a8] sm:$0xff] }
  0xfc   :  { %1074 = vst.msk [vmem:[%s1980_s3 + $0x148] sm:$0xff] %vm19_vm0, %v1010_v51  ;;  %v944_v4 = vld [vmem:[#allocation2 + $0x170] sm:$0xff]  ;;  %v983_v9 = vadd.f32 %v1599_v62, %v912_v3  ;;  %v910_v11 = vld [vmem:[#allocation2 + $0x60] sm:$0xff]  ;;  %849 = vst.msk [vmem:[#allocation2 + $0x90] sm:$0xff] %vm19_vm0, %v784_v60  ;;  %v785_v13 = vadd.f32 %v1221_v7, %v103_v58  ;;  %v817_v14 = vadd.f32 %v1253_v8, %v135_v59  ;;  %v578_v15 = vpop.f32.mrb[19].mxu0  ;;  %v706_v16 = vpop.f32.mrb[19].mxu1 }
  0xfd   :  { %v1015_v10 = vadd.f32 %v1599_v62, %v944_v4  ;;  %v942_v12 = vld [vmem:[#allocation2 + $0x160] sm:$0xff]  ;;  %881 = vst.msk [vmem:[#allocation2 + $0x190] sm:$0xff] %vm19_vm0, %v816_v61  ;;  %v981_v17 = vadd.f32 %v1599_v62, %v910_v11  ;;  %847 = vst.msk [vmem:[#allocation2 + $0x80] sm:$0xff] %vm19_vm0, %v782_v5  ;;  %v783_v21 = vadd.f32 %v578_v15, %v101_v1  ;;  %v142_v7 = vld [vmem:[#allocation2 + $0x1d0] sm:$0xff] }
  0xfe   :  { %v1013_v18 = vadd.f32 %v1599_v62, %v942_v12  ;;  %v913_v19 = vld [vmem:[#allocation2 + $0x78] sm:$0xff]  ;;  %879 = vst.msk [vmem:[#allocation2 + $0x180] sm:$0xff] %vm19_vm0, %v814_v6  ;;  %v815_v22 = vadd.f32 %v706_v16, %v133_v2  ;;  %1047 = vst.msk [vmem:[%s1980_s3 + $0x70] sm:$0xff] %vm19_vm0, %v983_v9  ;;  %v110_v6 = vld [vmem:[#allocation2 + $0xd0] sm:$0xff] }
  0xff   :  { %v945_v20 = vld [vmem:[#allocation2 + $0x178] sm:$0xff]  ;;  %1079 = vst.msk [vmem:[%s1980_s3 + $0x170] sm:$0xff] %vm19_vm0, %v1015_v10  ;;  %v984_v23 = vadd.f32 %v1599_v62, %v913_v19  ;;  %850 = vst.msk [vmem:[#allocation2 + $0x98] sm:$0xff] %vm19_vm0, %v785_v13  ;;  %v108_v8 = vld [vmem:[#allocation2 + $0xc0] sm:$0xff] }
 0x100   :  { %v1016_v24 = vadd.f32 %v1599_v62, %v945_v20  ;;  %v911_v25 = vld [vmem:[#allocation2 + $0x68] sm:$0xff]  ;;  %882 = vst.msk [vmem:[#allocation2 + $0x198] sm:$0xff] %vm19_vm0, %v817_v14  ;;  %1045 = vst.msk [vmem:[%s1980_s3 + $0x60] sm:$0xff] %vm19_vm0, %v981_v17  ;;  %v140_v9 = vld [vmem:[#allocation2 + $0x1c0] sm:$0xff] }
 0x101   :  { %v943_v26 = vld [vmem:[#allocation2 + $0x168] sm:$0xff]  ;;  %1077 = vst.msk [vmem:[%s1980_s3 + $0x160] sm:$0xff] %vm19_vm0, %v1013_v18  ;;  %v982_v27 = vadd.f32 %v1599_v62, %v911_v25  ;;  %848 = vst.msk [vmem:[#allocation2 + $0x88] sm:$0xff] %vm19_vm0, %v783_v21  ;;  %v1224_v33 = vpop.f32.mrb[20].mxu0  ;;  %v1256_v34 = vpop.f32.mrb[20].mxu1  ;;  %v111_v12 = vld [vmem:[#allocation2 + $0xd8] sm:$0xff] }
 0x102   :  { %v1014_v28 = vadd.f32 %v1599_v62, %v943_v26  ;;  %880 = vst.msk [vmem:[#allocation2 + $0x188] sm:$0xff] %vm19_vm0, %v815_v22  ;;  %1048 = vst.msk [vmem:[%s1980_s3 + $0x78] sm:$0xff] %vm19_vm0, %v984_v23  ;;  %v788_v37 = vadd.f32 %v1224_v33, %v106_v29  ;;  %v820_v38 = vadd.f32 %v1256_v34, %v138_v30  ;;  %v591_v39 = vpop.f32.mrb[21].mxu0  ;;  %v719_v40 = vpop.f32.mrb[21].mxu1  ;;  %v143_v13 = vld [vmem:[#allocation2 + $0x1d8] sm:$0xff]  ;;  %v109_v18 = vld [vmem:[#allocation2 + $0xc8] sm:$0xff] }
 0x103   :  { %1080 = vst.msk [vmem:[%s1980_s3 + $0x178] sm:$0xff] %vm19_vm0, %v1016_v24  ;;  %1046 = vst.msk [vmem:[%s1980_s3 + $0x68] sm:$0xff] %vm19_vm0, %v982_v27  ;;  %v916_v43 = vld [vmem:[#allocation2 + $0x90] sm:$0xff]  ;;  %v786_v45 = vadd.f32 %v591_v39, %v104_v31  ;;  %v818_v46 = vadd.f32 %v719_v40, %v136_v32  ;;  %v1225_v47 = vpop.f32.mrb[22].mxu0  ;;  %v1257_v48 = vpop.f32.mrb[22].mxu1  ;;  %v141_v19 = vld [vmem:[#allocation2 + $0x1c8] sm:$0xff] }
 0x104   :  { %1078 = vst.msk [vmem:[%s1980_s3 + $0x168] sm:$0xff] %vm19_vm0, %v1014_v28  ;;  %v948_v44 = vld [vmem:[#allocation2 + $0x190] sm:$0xff]  ;;  %v987_v49 = vadd.f32 %v1599_v62, %v916_v43  ;;  %v914_v51 = vld [vmem:[#allocation2 + $0x80] sm:$0xff]  ;;  %853 = vst.msk [vmem:[#allocation2 + $0xb0] sm:$0xff] %vm19_vm0, %v788_v37  ;;  %v789_v53 = vadd.f32 %v1225_v47, %v107_v35  ;;  %v821_v54 = vadd.f32 %v1257_v48, %v139_v36  ;;  %v594_v55 = vpop.f32.mrb[23].mxu0  ;;  %v722_v56 = vpop.f32.mrb[23].mxu1 }
 0x105   :  { %v1019_v50 = vadd.f32 %v1599_v62, %v948_v44  ;;  %v946_v52 = vld [vmem:[#allocation2 + $0x180] sm:$0xff]  ;;  %885 = vst.msk [vmem:[#allocation2 + $0x1b0] sm:$0xff] %vm19_vm0, %v820_v38  ;;  %v985_v57 = vadd.f32 %v1599_v62, %v914_v51  ;;  %851 = vst.msk [vmem:[#allocation2 + $0xa0] sm:$0xff] %vm19_vm0, %v786_v45  ;;  %v787_v61 = vadd.f32 %v594_v55, %v105_v41  ;;  %v146_v47 = vld [vmem:[#allocation2 + $0x1f0] sm:$0xff] }
 0x106   :  { %v1017_v58 = vadd.f32 %v1599_v62, %v946_v52  ;;  %v917_v59 = vld [vmem:[#allocation2 + $0x98] sm:$0xff]  ;;  %883 = vst.msk [vmem:[#allocation2 + $0x1a0] sm:$0xff] %vm19_vm0, %v818_v46  ;;  %v819_v63 = vadd.f32 %v722_v56, %v137_v42  ;;  %1051 = vst.msk [vmem:[%s1980_s3 + $0x90] sm:$0xff] %vm19_vm0, %v987_v49  ;;  %v114_v46 = vld [vmem:[#allocation2 + $0xf0] sm:$0xff] }
 0x107   :  { %v949_v60 = vld [vmem:[#allocation2 + $0x198] sm:$0xff]  ;;  %1083 = vst.msk [vmem:[%s1980_s3 + $0x190] sm:$0xff] %vm19_vm0, %v1019_v50  ;;  %v988_v0 = vadd.f32 %v1599_v62, %v917_v59  ;;  %854 = vst.msk [vmem:[#allocation2 + $0xb8] sm:$0xff] %vm19_vm0, %v789_v53  ;;  %v112_v48 = vld [vmem:[#allocation2 + $0xe0] sm:$0xff] }
 0x108   :  { %v1020_v1 = vadd.f32 %v1599_v62, %v949_v60  ;;  %v915_v2 = vld [vmem:[#allocation2 + $0x88] sm:$0xff]  ;;  %886 = vst.msk [vmem:[#allocation2 + $0x1b8] sm:$0xff] %vm19_vm0, %v821_v54  ;;  %1049 = vst.msk [vmem:[%s1980_s3 + $0x80] sm:$0xff] %vm19_vm0, %v985_v57  ;;  %v144_v49 = vld [vmem:[#allocation2 + $0x1e0] sm:$0xff] }
 0x109   :  { %v947_v3 = vld [vmem:[#allocation2 + $0x188] sm:$0xff]  ;;  %1081 = vst.msk [vmem:[%s1980_s3 + $0x180] sm:$0xff] %vm19_vm0, %v1017_v58  ;;  %v986_v4 = vadd.f32 %v1599_v62, %v915_v2  ;;  %852 = vst.msk [vmem:[#allocation2 + $0xa8] sm:$0xff] %vm19_vm0, %v787_v61  ;;  %v1228_v10 = vpop.f32.mrb[24].mxu0  ;;  %v1260_v11 = vpop.f32.mrb[24].mxu1  ;;  %v115_v52 = vld [vmem:[#allocation2 + $0xf8] sm:$0xff] }
 0x10a   :  { %v1018_v5 = vadd.f32 %v1599_v62, %v947_v3  ;;  %884 = vst.msk [vmem:[#allocation2 + $0x1a8] sm:$0xff] %vm19_vm0, %v819_v63  ;;  %1052 = vst.msk [vmem:[%s1980_s3 + $0x98] sm:$0xff] %vm19_vm0, %v988_v0  ;;  %v792_v14 = vadd.f32 %v1228_v10, %v110_v6  ;;  %v824_v15 = vadd.f32 %v1260_v11, %v142_v7  ;;  %v607_v16 = vpop.f32.mrb[25].mxu0  ;;  %v735_v17 = vpop.f32.mrb[25].mxu1  ;;  %v147_v53 = vld [vmem:[#allocation2 + $0x1f8] sm:$0xff]  ;;  %v113_v58 = vld [vmem:[#allocation2 + $0xe8] sm:$0xff] }
 0x10b   :  { %1084 = vst.msk [vmem:[%s1980_s3 + $0x198] sm:$0xff] %vm19_vm0, %v1020_v1  ;;  %1050 = vst.msk [vmem:[%s1980_s3 + $0x88] sm:$0xff] %vm19_vm0, %v986_v4  ;;  %v920_v20 = vld [vmem:[#allocation2 + $0xb0] sm:$0xff]  ;;  %v790_v22 = vadd.f32 %v607_v16, %v108_v8  ;;  %v822_v23 = vadd.f32 %v735_v17, %v140_v9  ;;  %v1229_v24 = vpop.f32.mrb[26].mxu0  ;;  %v1261_v25 = vpop.f32.mrb[26].mxu1  ;;  %v145_v59 = vld [vmem:[#allocation2 + $0x1e8] sm:$0xff] }
 0x10c   :  { %1082 = vst.msk [vmem:[%s1980_s3 + $0x188] sm:$0xff] %vm19_vm0, %v1018_v5  ;;  %v952_v21 = vld [vmem:[#allocation2 + $0x1b0] sm:$0xff]  ;;  %v991_v26 = vadd.f32 %v1599_v62, %v920_v20  ;;  %v918_v28 = vld [vmem:[#allocation2 + $0xa0] sm:$0xff]  ;;  %857 = vst.msk [vmem:[#allocation2 + $0xd0] sm:$0xff] %vm19_vm0, %v792_v14  ;;  %v793_v30 = vadd.f32 %v1229_v24, %v111_v12  ;;  %v825_v31 = vadd.f32 %v1261_v25, %v143_v13  ;;  %v610_v32 = vpop.f32.mrb[27].mxu0  ;;  %v738_v33 = vpop.f32.mrb[27].mxu1 }
 0x10d   :  { %v1023_v27 = vadd.f32 %v1599_v62, %v952_v21  ;;  %v950_v29 = vld [vmem:[#allocation2 + $0x1a0] sm:$0xff]  ;;  %889 = vst.msk [vmem:[#allocation2 + $0x1d0] sm:$0xff] %vm19_vm0, %v824_v15  ;;  %v989_v34 = vadd.f32 %v1599_v62, %v918_v28  ;;  %855 = vst.msk [vmem:[#allocation2 + $0xc0] sm:$0xff] %vm19_vm0, %v790_v22  ;;  %v791_v38 = vadd.f32 %v610_v32, %v109_v18 }
 0x10e   :  { %v1021_v35 = vadd.f32 %v1599_v62, %v950_v29  ;;  %v921_v36 = vld [vmem:[#allocation2 + $0xb8] sm:$0xff]  ;;  %887 = vst.msk [vmem:[#allocation2 + $0x1c0] sm:$0xff] %vm19_vm0, %v822_v23  ;;  %v823_v39 = vadd.f32 %v738_v33, %v141_v19  ;;  %1055 = vst.msk [vmem:[%s1980_s3 + $0xb0] sm:$0xff] %vm19_vm0, %v991_v26 }
 0x10f   :  { %v953_v37 = vld [vmem:[#allocation2 + $0x1b8] sm:$0xff]  ;;  %1087 = vst.msk [vmem:[%s1980_s3 + $0x1b0] sm:$0xff] %vm19_vm0, %v1023_v27  ;;  %v992_v40 = vadd.f32 %v1599_v62, %v921_v36  ;;  %858 = vst.msk [vmem:[#allocation2 + $0xd8] sm:$0xff] %vm19_vm0, %v793_v30 }
 0x110   :  { %v1024_v41 = vadd.f32 %v1599_v62, %v953_v37  ;;  %v919_v42 = vld [vmem:[#allocation2 + $0xa8] sm:$0xff]  ;;  %890 = vst.msk [vmem:[#allocation2 + $0x1d8] sm:$0xff] %vm19_vm0, %v825_v31  ;;  %1053 = vst.msk [vmem:[%s1980_s3 + $0xa0] sm:$0xff] %vm19_vm0, %v989_v34 }
 0x111   :  { %v951_v43 = vld [vmem:[#allocation2 + $0x1a8] sm:$0xff]  ;;  %1085 = vst.msk [vmem:[%s1980_s3 + $0x1a0] sm:$0xff] %vm19_vm0, %v1021_v35  ;;  %v990_v44 = vadd.f32 %v1599_v62, %v919_v42  ;;  %856 = vst.msk [vmem:[#allocation2 + $0xc8] sm:$0xff] %vm19_vm0, %v791_v38  ;;  %v1232_v50 = vpop.f32.mrb[28].mxu0  ;;  %v1264_v51 = vpop.f32.mrb[28].mxu1 }
 0x112   :  { %v1022_v45 = vadd.f32 %v1599_v62, %v951_v43  ;;  %888 = vst.msk [vmem:[#allocation2 + $0x1c8] sm:$0xff] %vm19_vm0, %v823_v39  ;;  %1056 = vst.msk [vmem:[%s1980_s3 + $0xb8] sm:$0xff] %vm19_vm0, %v992_v40  ;;  %v796_v54 = vadd.f32 %v1232_v50, %v114_v46  ;;  %v828_v55 = vadd.f32 %v1264_v51, %v146_v47  ;;  %v623_v56 = vpop.f32.mrb[29].mxu0  ;;  %v751_v57 = vpop.f32.mrb[29].mxu1 }
 0x113   :  { %1088 = vst.msk [vmem:[%s1980_s3 + $0x1b8] sm:$0xff] %vm19_vm0, %v1024_v41  ;;  %1054 = vst.msk [vmem:[%s1980_s3 + $0xa8] sm:$0xff] %vm19_vm0, %v990_v44  ;;  %v924_v60 = vld [vmem:[#allocation2 + $0xd0] sm:$0xff]  ;;  %v794_v63 = vadd.f32 %v623_v56, %v112_v48  ;;  %v826_v0 = vadd.f32 %v751_v57, %v144_v49  ;;  %v1233_v1 = vpop.f32.mrb[30].mxu0  ;;  %v1265_v2 = vpop.f32.mrb[30].mxu1 }
 0x114   :  { %1086 = vst.msk [vmem:[%s1980_s3 + $0x1a8] sm:$0xff] %vm19_vm0, %v1022_v45  ;;  %v956_v61 = vld [vmem:[#allocation2 + $0x1d0] sm:$0xff]  ;;  %v995_v3 = vadd.f32 %v1599_v62, %v924_v60  ;;  %v922_v5 = vld [vmem:[#allocation2 + $0xc0] sm:$0xff]  ;;  %861 = vst.msk [vmem:[#allocation2 + $0xf0] sm:$0xff] %vm19_vm0, %v796_v54  ;;  %v797_v7 = vadd.f32 %v1233_v1, %v115_v52  ;;  %v829_v8 = vadd.f32 %v1265_v2, %v147_v53  ;;  %v626_v9 = vpop.f32.mrb[31].mxu0  ;;  %v754_v10 = vpop.f32.mrb[31].mxu1 }
 0x115   :  { %v1027_v4 = vadd.f32 %v1599_v62, %v956_v61  ;;  %v954_v6 = vld [vmem:[#allocation2 + $0x1c0] sm:$0xff]  ;;  %893 = vst.msk [vmem:[#allocation2 + $0x1f0] sm:$0xff] %vm19_vm0, %v828_v55  ;;  %v993_v11 = vadd.f32 %v1599_v62, %v922_v5  ;;  %859 = vst.msk [vmem:[#allocation2 + $0xe0] sm:$0xff] %vm19_vm0, %v794_v63  ;;  %v795_v15 = vadd.f32 %v626_v9, %v113_v58 }
 0x116   :  { %v1025_v12 = vadd.f32 %v1599_v62, %v954_v6  ;;  %v925_v13 = vld [vmem:[#allocation2 + $0xd8] sm:$0xff]  ;;  %891 = vst.msk [vmem:[#allocation2 + $0x1e0] sm:$0xff] %vm19_vm0, %v826_v0  ;;  %v827_v16 = vadd.f32 %v754_v10, %v145_v59  ;;  %1059 = vst.msk [vmem:[%s1980_s3 + $0xd0] sm:$0xff] %vm19_vm0, %v995_v3 }
 0x117   :  { %v957_v14 = vld [vmem:[#allocation2 + $0x1d8] sm:$0xff]  ;;  %1091 = vst.msk [vmem:[%s1980_s3 + $0x1d0] sm:$0xff] %vm19_vm0, %v1027_v4  ;;  %v996_v17 = vadd.f32 %v1599_v62, %v925_v13  ;;  %862 = vst.msk [vmem:[#allocation2 + $0xf8] sm:$0xff] %vm19_vm0, %v797_v7 }
 0x118   :  { %v1028_v18 = vadd.f32 %v1599_v62, %v957_v14  ;;  %v923_v19 = vld [vmem:[#allocation2 + $0xc8] sm:$0xff]  ;;  %894 = vst.msk [vmem:[#allocation2 + $0x1f8] sm:$0xff] %vm19_vm0, %v829_v8  ;;  %1057 = vst.msk [vmem:[%s1980_s3 + $0xc0] sm:$0xff] %vm19_vm0, %v993_v11 }
 0x119   :  { %v955_v20 = vld [vmem:[#allocation2 + $0x1c8] sm:$0xff]  ;;  %1089 = vst.msk [vmem:[%s1980_s3 + $0x1c0] sm:$0xff] %vm19_vm0, %v1025_v12  ;;  %v994_v21 = vadd.f32 %v1599_v62, %v923_v19  ;;  %860 = vst.msk [vmem:[#allocation2 + $0xe8] sm:$0xff] %vm19_vm0, %v795_v15 }
 0x11a   :  { %v1026_v22 = vadd.f32 %v1599_v62, %v955_v20  ;;  %892 = vst.msk [vmem:[#allocation2 + $0x1e8] sm:$0xff] %vm19_vm0, %v827_v16  ;;  %1060 = vst.msk [vmem:[%s1980_s3 + $0xd8] sm:$0xff] %vm19_vm0, %v996_v17 }
 0x11b   :  { %1092 = vst.msk [vmem:[%s1980_s3 + $0x1d8] sm:$0xff] %vm19_vm0, %v1028_v18  ;;  %1058 = vst.msk [vmem:[%s1980_s3 + $0xc8] sm:$0xff] %vm19_vm0, %v994_v21  ;;  %v928_v23 = vld [vmem:[#allocation2 + $0xf0] sm:$0xff] }
 0x11c   :  { %1090 = vst.msk [vmem:[%s1980_s3 + $0x1c8] sm:$0xff] %vm19_vm0, %v1026_v22  ;;  %v960_v24 = vld [vmem:[#allocation2 + $0x1f0] sm:$0xff]  ;;  %v999_v25 = vadd.f32 %v1599_v62, %v928_v23  ;;  %v926_v27 = vld [vmem:[#allocation2 + $0xe0] sm:$0xff] }
 0x11d   :  { %v1031_v26 = vadd.f32 %v1599_v62, %v960_v24  ;;  %v958_v28 = vld [vmem:[#allocation2 + $0x1e0] sm:$0xff]  ;;  %v997_v29 = vadd.f32 %v1599_v62, %v926_v27 }
 0x11e   :  { %v1029_v30 = vadd.f32 %v1599_v62, %v958_v28  ;;  %v929_v31 = vld [vmem:[#allocation2 + $0xf8] sm:$0xff]  ;;  %1063 = vst.msk [vmem:[%s1980_s3 + $0xf0] sm:$0xff] %vm19_vm0, %v999_v25 }
 0x11f   :  { %v961_v32 = vld [vmem:[#allocation2 + $0x1f8] sm:$0xff]  ;;  %1095 = vst.msk [vmem:[%s1980_s3 + $0x1f0] sm:$0xff] %vm19_vm0, %v1031_v26  ;;  %v1000_v33 = vadd.f32 %v1599_v62, %v929_v31  ;;  %1061 = vst.msk [vmem:[%s1980_s3 + $0xe0] sm:$0xff] %vm19_vm0, %v997_v29 }
 0x120   :  { %v1032_v34 = vadd.f32 %v1599_v62, %v961_v32  ;;  %v927_v35 = vld [vmem:[#allocation2 + $0xe8] sm:$0xff]  ;;  %1093 = vst.msk [vmem:[%s1980_s3 + $0x1e0] sm:$0xff] %vm19_vm0, %v1029_v30 }
 0x121   :  { %v959_v36 = vld [vmem:[#allocation2 + $0x1e8] sm:$0xff]  ;;  %v998_v37 = vadd.f32 %v1599_v62, %v927_v35  ;;  %1064 = vst.msk [vmem:[%s1980_s3 + $0xf8] sm:$0xff] %vm19_vm0, %v1000_v33 }
 0x122   :  { %v1030_v38 = vadd.f32 %v1599_v62, %v959_v36  ;;  %1096 = vst.msk [vmem:[%s1980_s3 + $0x1f8] sm:$0xff] %vm19_vm0, %v1032_v34 }
 0x123   :  { %1062 = vst.msk [vmem:[%s1980_s3 + $0xe8] sm:$0xff] %vm19_vm0, %v998_v37 }
 0x124   :  { %1094 = vst.msk [vmem:[%s1980_s3 + $0x1e8] sm:$0xff] %vm19_vm0, %v1030_v38 }

// kernel: attention2d_forward.4
= control target key start
LH: loop header
LB: loop body
LE: loop exit
PB: predicated region body
PF: predicated region fallthrough
CT: control target
= control target key end

     0   :  { %10 = vsyncpa [#allocation3], 0  ;;  %s7113_s0 = inlined_call_operand.vmem [shape: bf16[2,256,16], index: 0, kind: input, shape index: {}]   ;;  %s7114_s1 = inlined_call_operand.vmem [shape: bf16[2,256,16], index: 1, kind: input, shape index: {}]   ;;  %s7115_s2 = inlined_call_operand.vmem [shape: bf16[2,256,16], index: 2, kind: input, shape index: {}]   ;;  %s7116_s3 = inlined_call_operand.vmem [shape: bf16[2,256,16], index: 3, kind: output, shape index: {0}]   ;;  %s7117_s4 = inlined_call_operand.hbm [shape: f32[2,2,256,256], index: 4, kind: output, shape index: {1}]  }
   0x1   :  { %12 = vsyncpa [#allocation3 + $0x1], 0  ;;  %s5131_s15 = smov 0   ;;  %s5133_s16 = smov 0  }
   0x2   :  { %s5135_s17 = smov 0   ;;  %s5137_s18 = smov 0  }
   0x3   :  { %s5139_s19 = smov 0   ;;  %s5141_s20 = smov 0  }
   0x4 LB: > { %s3786_s21 = sadd.s32 4294967295, %s5099_s20   ;;  %s3787_s22 = sadd.s32 4294967294, %s5099_s20   ;;  %s5099_s20 = sphi %s5141_s20, %s18_s20   ;;  %s5095_s19 = sphi %s5139_s19, %s7288_s19   ;;  %s5091_s18 = sphi %s5137_s18, %s7287_s18   ;;  %s5087_s17 = sphi %s5135_s17, %s7286_s17   ;;  %s5083_s16 = sphi %s5133_s16, %s7285_s16   ;;  %s5079_s15 = sphi %s5131_s15, %s7284_s15  }
   0x5   : > { %s37_s23 = sadd.s32 1, %s5095_s19  ;;  %s164_s24 = sadd.s32 1, %s5087_s17 }
   0x6   : > { %p39_p0 = scmp.ge.s32.totalorder %s37_s23, 2  ;;  %p174_p1 = scmp.ne.s32.totalorder %s5087_s17, %s5083_s16 }
   0x7   : > { %p175_p2 = scmp.eq.s32.totalorder %s3786_s21, 1  ;;  %p180_p3 = scmp.ne.s32.totalorder %s5083_s16, %s5079_s15 }
   0x8   : > { %s7290_s23 = smov (%p39_p0, %s37_s23), 0  ;;  %p181_p5 = scmp.eq.s32.totalorder %s3787_s22, 1 }
   0x9   : > { %p5171_p4 = por %p175_p2, %p174_p1  ;;  %s157_s26 = ssub.s32 %s5095_s19, %s7290_s23 }
   0xa   : > { %p3790_p6 = scmp.ge.s32.totalorder %s5099_s20, 1  ;;  %p162_p7 = scmp.eq.s32.totalorder %s157_s26, 0 }
   0xb   : > { %p5178_p8 = por %p181_p5, %p180_p3  ;;  %p237_p9 = scmp.lt.s32.totalorder %s5099_s20, 3 }
   0xc   : > { %s5184_s28 = scalar_select %p162_p7, %s5087_s17, %s164_s24  }
   0xd   : > { %p238_p10 = pnand %p3790_p6, %p237_p9 }
   0xf   : > { %241 = sbr.rel (%p238_p10) target bundleno = 1884 (0x75c), region = 32 }
  0x16   : > { %p299_p11 = scmp.lt.s32.totalorder %s5091_s18, 1  ;;  %vm599_vm0 = vcmask 64512   ;;  %s5101_s11 = smov 120   ;;  %vm1850_vm1 = vcmask 60416   ;;  %vm3550_vm2 = vcmask 126016  }
  0x17   : > { %s295_s21 = sand.u32 1, %s5083_s16   ;;  %s4129_s6 = sshll.u32 %s5091_s18, 14 }
  0x18   : > { %s300_s29 = scalar_select %p299_p11, %s5091_s18, 1 }
  0x19   : > { %s3791_s22 = sshll.u32 %s295_s21, 10  ;;  %s7002_s18 = scalar_lea.sflag [#allocation3], %s295_s21 }
  0x1a   : > { %s5188_s30 = sshll.u32 %s300_s29, 7  ;;  %s5788_s24 = scalar_lea.vmem [#allocation2], %s3791_s22 }
  0x1b   : > { %s5194_s7 = scalar_lea.vmem %s7114_s1, %s5188_s30  ;;  %s5211_s10 = scalar_lea.vmem %s7113_s0, %s5188_s30 }
  0x1c   : > { %v4541_v0 = vld [vmem:[%s5194_s7 + $0x40] sm:$0xff]   ;;  %v4543_v2 = vld [vmem:[%s5194_s7 + $0x48] sm:$0xff]   ;;  %v4545_v6 = vld [vmem:[%s5194_s7 + $0x50] sm:$0xff]   ;;  %s5302_s14 = scalar_lea.vmem %s7115_s2, %s5188_s30  ;;  %s6125_s5 = scalar_lea.vmem %s7116_s3, %s5188_s30 }
  0x1d   : > { %v4542_v1 = vld [vmem:[%s5194_s7] sm:$0xff]   ;;  %4466 = vmatprep.subr.msk.bf16.mxu0 %vm599_vm0, %v4541_v0  ;;  %v4544_v4 = vld [vmem:[%s5194_s7 + $0x8] sm:$0xff]   ;;  %v4546_v7 = vld [vmem:[%s5194_s7 + $0x10] sm:$0xff]   ;;  %s5102_s30 = smov 8   ;;  %s5103_s12 = smov [#allocation2]  }
  0x1e   : > { %v649_v3 = vsel %vm599_vm0, %v4542_v1, 0  ;;  %v652_v5 = vsel %vm599_vm0, %v4544_v4, 0  ;;  %v4557_v8 = vld [vmem:[%s5211_s10] sm:$0xff]   ;;  %v655_v9 = vsel %vm599_vm0, %v4546_v7, 0  ;;  %v4547_v10 = vld [vmem:[%s5194_s7 + $0x58] sm:$0xff]   ;;  %v4552_v16 = vld [vmem:[%s5194_s7 + $0x28] sm:$0xff]  }
  0x1f   : > { %4131 = vmatpush3.bf16.xpose.msra.mxu0 %v649_v3  ;;  %4146 = vmatprep.mubr.msk.bf16.mxu0 %vm599_vm0, %v4557_v8  ;;  %v4548_v11 = vld [vmem:[%s5194_s7 + $0x18] sm:$0xff]   ;;  %v4550_v12 = vld [vmem:[%s5194_s7 + $0x20] sm:$0xff]   ;;  %v4551_v17 = vld [vmem:[%s5194_s7 + $0x68] sm:$0xff]   ;;  %v664_v18 = vsel %vm599_vm0, %v4552_v16, 0  ;;  %s5025_s13 = sshll.u32 %s5103_s12, 4  ;;  %s5026_s13 = int_to_ptr.vmem [resolvable:$false] %s5025_s13 }
  0x20   : > { %4467 = vmatprep.subr.msk.bf16.mxu0 %vm599_vm0, %v4543_v2  ;;  %v658_v13 = vsel %vm599_vm0, %v4548_v11, 0  ;;  %v4549_v14 = vld [vmem:[%s5194_s7 + $0x60] sm:$0xff]   ;;  %v661_v15 = vsel %vm599_vm0, %v4550_v12, 0  ;;  %v4554_v19 = vld [vmem:[%s5194_s7 + $0x30] sm:$0xff]   ;;  %v4555_v22 = vld [vmem:[%s5194_s7 + $0x78] sm:$0xff]  }
  0x21   : > { %v4553_v20 = vld [vmem:[%s5194_s7 + $0x70] sm:$0xff]   ;;  %v667_v21 = vsel %vm599_vm0, %v4554_v19, 0  ;;  %v4556_v23 = vld [vmem:[%s5194_s7 + $0x38] sm:$0xff]   ;;  %v4573_v25 = vld [vmem:[%s5194_s7] sm:$0xff]  }
  0x22   : > { %v670_v24 = vsel %vm599_vm0, %v4556_v23, 0  ;;  %v4574_v26 = vld [vmem:[%s5194_s7 + $0x40] sm:$0xff]   ;;  %2171 = vrot.lane.b32.xlu0 %v4573_v25, %s5101_s11  ;;  %v4575_v27 = vld [vmem:[%s5194_s7 + $0x8] sm:$0xff]   ;;  %v4577_v30 = vld [vmem:[%s5194_s7 + $0x10] sm:$0xff]  }
  0x23   : > { %2187 = vrot.lane.b32.xlu1 %v4574_v26, %s5101_s11  ;;  %v4576_v28 = vld [vmem:[%s5194_s7 + $0x48] sm:$0xff]   ;;  %v4578_v31 = vld [vmem:[%s5194_s7 + $0x50] sm:$0xff]   ;;  %v4579_v32 = vld [vmem:[%s5194_s7 + $0x18] sm:$0xff]  }
  0x24   : > { %v4558_v29 = vld [vmem:[%s5211_s10 + $0x8] sm:$0xff]   ;;  %v4580_v33 = vld [vmem:[%s5194_s7 + $0x58] sm:$0xff]   ;;  %v4559_v34 = vld [vmem:[%s5211_s10 + $0x10] sm:$0xff]  }
  0x25   : > { %v4560_v35 = vld [vmem:[%s5211_s10 + $0x18] sm:$0xff]   ;;  %v4561_v36 = vld [vmem:[%s5211_s10 + $0x20] sm:$0xff]   ;;  %v4562_v37 = vld [vmem:[%s5211_s10 + $0x28] sm:$0xff]  }
  0x26   : > { %2173 = vrot.lane.b32.xlu0 %v4575_v27, %s5101_s11  ;;  %v4563_v38 = vld [vmem:[%s5211_s10 + $0x30] sm:$0xff]   ;;  %v4564_v39 = vld [vmem:[%s5211_s10 + $0x38] sm:$0xff]   ;;  %v4565_v40 = vld [vmem:[%s5211_s10 + $0x40] sm:$0xff]  }
  0x27   : > { %4133 = vmatpush3.bf16.xpose.msra.mxu0 %v652_v5  ;;  %2189 = vrot.lane.b32.xlu1 %v4576_v28, %s5101_s11  ;;  %v4566_v41 = vld [vmem:[%s5211_s10 + $0x48] sm:$0xff]   ;;  %v4567_v42 = vld [vmem:[%s5211_s10 + $0x50] sm:$0xff]   ;;  %v4568_v43 = vld [vmem:[%s5211_s10 + $0x58] sm:$0xff]  }
  0x28   : > { %4468 = vmatprep.subr.msk.bf16.mxu0 %vm599_vm0, %v4545_v6  ;;  %v4569_v44 = vld [vmem:[%s5211_s10 + $0x60] sm:$0xff]   ;;  %v4570_v45 = vld [vmem:[%s5211_s10 + $0x68] sm:$0xff]   ;;  %v4571_v46 = vld [vmem:[%s5211_s10 + $0x70] sm:$0xff]  }
  0x29   : > { %v4572_v47 = vld [vmem:[%s5211_s10 + $0x78] sm:$0xff]   ;;  %v4581_v48 = vld [vmem:[%s5302_s14 + $0x40] sm:$0xff]   ;;  %v4583_v50 = vld [vmem:[%s5302_s14 + $0x48] sm:$0xff]  }
  0x2a   : > { %2175 = vrot.lane.b32.xlu0 %v4577_v30, %s5101_s11  ;;  %v4582_v49 = vld [vmem:[%s5302_s14] sm:$0xff]   ;;  %4178 = vmatprep.subr.bf16.mxu1 %v4581_v48  ;;  %v4584_v51 = vld [vmem:[%s5302_s14 + $0x8] sm:$0xff]   ;;  %v4585_v52 = vld [vmem:[%s5302_s14 + $0x50] sm:$0xff]  }
  0x2b   : > { %2191 = vrot.lane.b32.xlu1 %v4578_v31, %s5101_s11  ;;  %4179 = vmatpush3.bf16.msra.mxu1 %v4582_v49  ;;  %v4586_v53 = vld [vmem:[%s5302_s14 + $0x10] sm:$0xff]   ;;  %v4587_v54 = vld [vmem:[%s5302_s14 + $0x58] sm:$0xff]   ;;  %v4589_v56 = vld [vmem:[%s5302_s14 + $0x60] sm:$0xff]  }
  0x2c   : > { %4180 = vmatprep.subr.bf16.mxu1 %v4583_v50  ;;  %v4588_v55 = vld [vmem:[%s5302_s14 + $0x18] sm:$0xff]   ;;  %v4590_v57 = vld [vmem:[%s5302_s14 + $0x20] sm:$0xff]   ;;  %v4591_v58 = vld [vmem:[%s5302_s14 + $0x68] sm:$0xff]  }
  0x2d   : > { %v4592_v59 = vld [vmem:[%s5302_s14 + $0x28] sm:$0xff]   ;;  %v4593_v60 = vld [vmem:[%s5302_s14 + $0x70] sm:$0xff]   ;;  %v4595_v62 = vld [vmem:[%s5302_s14 + $0x78] sm:$0xff]  }
  0x2e   : > { %2177 = vrot.lane.b32.xlu0 %v4579_v32, %s5101_s11  ;;  %v4594_v61 = vld [vmem:[%s5302_s14 + $0x30] sm:$0xff]   ;;  %v4596_v63 = vld [vmem:[%s5302_s14 + $0x38] sm:$0xff]  }
  0x2f   : > { %4135 = vmatpush3.bf16.xpose.msra.mxu0 %v655_v9  ;;  %2193 = vrot.lane.b32.xlu1 %v4580_v33, %s5101_s11 }
  0x30   : > { %4469 = vmatprep.subr.msk.bf16.mxu0 %vm599_vm0, %v4547_v10  ;;  %4181 = vmatpush3.bf16.msra.mxu1 %v4584_v51 }
  0x31   : > { %4182 = vmatprep.subr.bf16.mxu1 %v4585_v52 }
  0x34   : > { %4183 = vmatpush3.bf16.msra.mxu1 %v4586_v53 }
  0x35   : > { %4184 = vmatprep.subr.bf16.mxu1 %v4587_v54 }
  0x37   : > { %4137 = vmatpush3.bf16.xpose.msra.mxu0 %v658_v13 }
  0x38   : > { %4470 = vmatprep.subr.msk.bf16.mxu0 %vm599_vm0, %v4549_v14  ;;  %4185 = vmatpush3.bf16.msra.mxu1 %v4588_v55 }
  0x39   : > { %4186 = vmatprep.subr.bf16.mxu1 %v4589_v56 }
  0x3c   : > { %4187 = vmatpush3.bf16.msra.mxu1 %v4590_v57 }
  0x3d   : > { %4188 = vmatprep.subr.bf16.mxu1 %v4591_v58 }
  0x3f   : > { %4139 = vmatpush3.bf16.xpose.msra.mxu0 %v661_v15 }
  0x40   : > { %4471 = vmatprep.subr.msk.bf16.mxu0 %vm599_vm0, %v4551_v17  ;;  %4189 = vmatpush3.bf16.msra.mxu1 %v4592_v59 }
  0x41   : > { %4190 = vmatprep.subr.bf16.mxu1 %v4593_v60 }
  0x44   : > { %4191 = vmatpush3.bf16.msra.mxu1 %v4594_v61 }
  0x45   : > { %4192 = vmatprep.subr.bf16.mxu1 %v4595_v62 }
  0x47   : > { %4141 = vmatpush3.bf16.xpose.msra.mxu0 %v664_v18 }
  0x48   : > { %4472 = vmatprep.subr.msk.bf16.mxu0 %vm599_vm0, %v4553_v20  ;;  %4193 = vmatpush3.bf16.msra.mxu1 %v4596_v63 }
  0x4f   : > { %4143 = vmatpush3.bf16.xpose.msra.mxu0 %v667_v21 }
  0x50   : > { %4473 = vmatprep.subr.msk.bf16.mxu0 %vm599_vm0, %v4555_v22 }
  0x57   : > { %4145 = vmatpush3.bf16.xpose.msra.mxu0 %v670_v24 }
  0x5e   : > { %4147 = vmatmul.mubr.msk.bf16.vlgmr.msra.gmra.mrb[0].mxu0 %vm599_vm0, %v4557_v8 }
  0x5f   : > { %4148 = vmatprep.mubr.msk.bf16.mxu0 %vm599_vm0, %v4558_v29 }
  0x66   : > { %4149 = vmatmul.mubr.msk.bf16.gmra.mrb[4].mxu0 %vm599_vm0, %v4558_v29 }
  0x67   : > { %4150 = vmatprep.mubr.msk.bf16.mxu0 %vm599_vm0, %v4559_v34 }
  0x6e   : > { %4151 = vmatmul.mubr.msk.bf16.gmra.mrb[8].mxu0 %vm599_vm0, %v4559_v34 }
  0x6f   : > { %4152 = vmatprep.mubr.msk.bf16.mxu0 %vm599_vm0, %v4560_v35 }
  0x76   : > { %4153 = vmatmul.mubr.msk.bf16.gmra.mrb[12].mxu0 %vm599_vm0, %v4560_v35 }
  0x77   : > { %4154 = vmatprep.mubr.msk.bf16.mxu0 %vm599_vm0, %v4561_v36 }
  0x7e   : > { %4155 = vmatmul.mubr.msk.bf16.gmra.mrb[16].mxu0 %vm599_vm0, %v4561_v36 }
  0x7f   : > { %4156 = vmatprep.mubr.msk.bf16.mxu0 %vm599_vm0, %v4562_v37 }
  0x86   : > { %4157 = vmatmul.mubr.msk.bf16.gmra.mrb[20].mxu0 %vm599_vm0, %v4562_v37 }
  0x87   : > { %4158 = vmatprep.mubr.msk.bf16.mxu0 %vm599_vm0, %v4563_v38 }
  0x8e   : > { %4159 = vmatmul.mubr.msk.bf16.gmra.mrb[24].mxu0 %vm599_vm0, %v4563_v38 }
  0x8f   : > { %4160 = vmatprep.mubr.msk.bf16.mxu0 %vm599_vm0, %v4564_v39 }
  0x95   : > { %v2188_v0 = vpop.permute.xlu1 %2187 }
  0x96   : > { %4161 = vmatmul.mubr.msk.bf16.gmra.mrb[28].mxu0 %vm599_vm0, %v4564_v39  ;;  %4474 = vmatprep.subr.msk.bf16.mxu1 %vm599_vm0, %v2188_v0 }
  0x97   : > { %4162 = vmatprep.mubr.msk.bf16.mxu0 %vm599_vm0, %v4565_v40 }
  0x9e   : > { %4163 = vmatmul.mubr.msk.bf16.gmra.mrb[32].mxu0 %vm599_vm0, %v4565_v40 }
  0x9f   : > { %4164 = vmatprep.mubr.msk.bf16.mxu0 %vm599_vm0, %v4566_v41 }
  0xa6   : > { %4165 = vmatmul.mubr.msk.bf16.gmra.mrb[36].mxu0 %vm599_vm0, %v4566_v41 }
  0xa7   : > { %4166 = vmatprep.mubr.msk.bf16.mxu0 %vm599_vm0, %v4567_v42 }
  0xae   : > { %4167 = vmatmul.mubr.msk.bf16.gmra.mrb[40].mxu0 %vm599_vm0, %v4567_v42 }
  0xaf   : > { %4168 = vmatprep.mubr.msk.bf16.mxu0 %vm599_vm0, %v4568_v43 }
  0xb6   : > { %4169 = vmatmul.mubr.msk.bf16.gmra.mrb[44].mxu0 %vm599_vm0, %v4568_v43 }
  0xb7   : > { %4170 = vmatprep.mubr.msk.bf16.mxu0 %vm599_vm0, %v4569_v44 }
  0xbe   : > { %4171 = vmatmul.mubr.msk.bf16.gmra.mrb[48].mxu0 %vm599_vm0, %v4569_v44 }
  0xbf   : > { %4172 = vmatprep.mubr.msk.bf16.mxu0 %vm599_vm0, %v4570_v45 }
  0xc6   : > { %4173 = vmatmul.mubr.msk.bf16.gmra.mrb[52].mxu0 %vm599_vm0, %v4570_v45 }
  0xc7   : > { %4174 = vmatprep.mubr.msk.bf16.mxu0 %vm599_vm0, %v4571_v46 }
  0xce   : > { %4175 = vmatmul.mubr.msk.bf16.gmra.mrb[56].mxu0 %vm599_vm0, %v4571_v46 }
  0xcf   : > { %4176 = vmatprep.mubr.msk.bf16.mxu0 %vm599_vm0, %v4572_v47 }
  0xd6   : > { %4177 = vmatmul.mubr.msk.bf16.gmra.mrb[60].mxu0 %vm599_vm0, %v4572_v47 }
 0x131   : > { %v5321_v1 = vpop.f32.mrb[0].mxu0 }
 0x132   : > { %v5323_v2 = vpop.f32.mrb[1].mxu0 }
 0x133   : > { %v5325_v3 = vpop.f32.mrb[2].mxu0  ;;  %v889_v4 = vmax.f32 %v5321_v1, %v5323_v2 }
 0x134   : > { %v5329_v5 = vpop.f32.mrb[3].mxu0 }
 0x135   : > { %890 = vmax.xlane.f32.xlu0 %v889_v4  ;;  %v892_v6 = vmax.f32 %v5325_v3, %v5329_v5 }
 0x139   : > { %893 = vmax.xlane.f32.xlu0 %v892_v6  ;;  %v5333_v7 = vpop.f32.mrb[4].mxu0 }
 0x13a   : > { %v5335_v8 = vpop.f32.mrb[5].mxu0 }
 0x13b   : > { %v5337_v9 = vpop.f32.mrb[6].mxu0  ;;  %v895_v10 = vmax.f32 %v5333_v7, %v5335_v8 }
 0x13c   : > { %v5341_v11 = vpop.f32.mrb[7].mxu0 }
 0x13d   : > { %896 = vmax.xlane.f32.xlu1 %v895_v10  ;;  %v898_v12 = vmax.f32 %v5337_v9, %v5341_v11 }
 0x141   : > { %899 = vmax.xlane.f32.xlu1 %v898_v12  ;;  %v5345_v13 = vpop.f32.mrb[8].mxu0 }
 0x142   : > { %v5347_v14 = vpop.f32.mrb[9].mxu0 }
 0x143   : > { %v5349_v15 = vpop.f32.mrb[10].mxu0  ;;  %v901_v16 = vmax.f32 %v5345_v13, %v5347_v14 }
 0x144   : > { %v5353_v17 = vpop.f32.mrb[11].mxu0 }
 0x145   : > { %902 = vmax.xlane.f32.xlu0 %v901_v16  ;;  %v904_v18 = vmax.f32 %v5349_v15, %v5353_v17 }
 0x147   : > { %905 = vmax.xlane.f32.xlu1 %v904_v18 }
 0x149   : > { %v5357_v19 = vpop.f32.mrb[12].mxu0 }
 0x14a   : > { %v5359_v20 = vpop.f32.mrb[13].mxu0 }
 0x14b   : > { %v5361_v21 = vpop.f32.mrb[14].mxu0  ;;  %v907_v22 = vmax.f32 %v5357_v19, %v5359_v20 }
 0x14c   : > { %v5365_v23 = vpop.f32.mrb[15].mxu0 }
 0x14d   : > { %908 = vmax.xlane.f32.xlu0 %v907_v22  ;;  %v910_v24 = vmax.f32 %v5361_v21, %v5365_v23 }
 0x14f   : > { %911 = vmax.xlane.f32.xlu1 %v910_v24 }
 0x151   : > { %v5369_v25 = vpop.f32.mrb[16].mxu0 }
 0x152   : > { %v5371_v26 = vpop.f32.mrb[17].mxu0 }
 0x153   : > { %v5373_v27 = vpop.f32.mrb[18].mxu0  ;;  %v913_v28 = vmax.f32 %v5369_v25, %v5371_v26 }
 0x154   : > { %v5377_v29 = vpop.f32.mrb[19].mxu0 }
 0x155   : > { %914 = vmax.xlane.f32.xlu0 %v913_v28  ;;  %v916_v30 = vmax.f32 %v5373_v27, %v5377_v29 }
 0x157   : > { %917 = vmax.xlane.f32.xlu1 %v916_v30 }
 0x159   : > { %v5381_v31 = vpop.f32.mrb[20].mxu0 }
 0x15a   : > { %v5383_v32 = vpop.f32.mrb[21].mxu0 }
 0x15b   : > { %v5385_v33 = vpop.f32.mrb[22].mxu0  ;;  %v919_v34 = vmax.f32 %v5381_v31, %v5383_v32 }
 0x15c   : > { %v5389_v35 = vpop.f32.mrb[23].mxu0 }
 0x15d   : > { %920 = vmax.xlane.f32.xlu0 %v919_v34  ;;  %v922_v36 = vmax.f32 %v5385_v33, %v5389_v35 }
 0x15f   : > { %923 = vmax.xlane.f32.xlu1 %v922_v36 }
 0x161   : > { %v5393_v37 = vpop.f32.mrb[24].mxu0 }
 0x162   : > { %v5395_v38 = vpop.f32.mrb[25].mxu0 }
 0x163   : > { %v5397_v39 = vpop.f32.mrb[26].mxu0  ;;  %v925_v40 = vmax.f32 %v5393_v37, %v5395_v38 }
 0x164   : > { %v5401_v41 = vpop.f32.mrb[27].mxu0 }
 0x165   : > { %926 = vmax.xlane.f32.xlu0 %v925_v40  ;;  %v928_v42 = vmax.f32 %v5397_v39, %v5401_v41 }
 0x167   : > { %929 = vmax.xlane.f32.xlu1 %v928_v42 }
 0x169   : > { %v5405_v43 = vpop.f32.mrb[28].mxu0 }
 0x16a   : > { %v5407_v44 = vpop.f32.mrb[29].mxu0 }
 0x16b   : > { %v5409_v45 = vpop.f32.mrb[30].mxu0  ;;  %v931_v46 = vmax.f32 %v5405_v43, %v5407_v44 }
 0x16c   : > { %v5413_v47 = vpop.f32.mrb[31].mxu0 }
 0x16d   : > { %932 = vmax.xlane.f32.xlu0 %v931_v46  ;;  %v934_v48 = vmax.f32 %v5409_v45, %v5413_v47 }
 0x16f   : > { %935 = vmax.xlane.f32.xlu1 %v934_v48 }
 0x171   : > { %v5417_v49 = vpop.f32.mrb[32].mxu0 }
 0x172   : > { %v5419_v50 = vpop.f32.mrb[33].mxu0 }
 0x173   : > { %v5421_v51 = vpop.f32.mrb[34].mxu0  ;;  %v937_v52 = vmax.f32 %v5417_v49, %v5419_v50 }
 0x174   : > { %v5425_v53 = vpop.f32.mrb[35].mxu0 }
 0x175   : > { %938 = vmax.xlane.f32.xlu0 %v937_v52  ;;  %v940_v54 = vmax.f32 %v5421_v51, %v5425_v53 }
 0x177   : > { %941 = vmax.xlane.f32.xlu1 %v940_v54 }
 0x179   : > { %v5429_v55 = vpop.f32.mrb[36].mxu0 }
 0x17a   : > { %v5431_v56 = vpop.f32.mrb[37].mxu0 }
 0x17b   : > { %v5433_v57 = vpop.f32.mrb[38].mxu0  ;;  %v943_v58 = vmax.f32 %v5429_v55, %v5431_v56 }
 0x17c   : > { %v5437_v59 = vpop.f32.mrb[39].mxu0 }
 0x17d   : > { %944 = vmax.xlane.f32.xlu0 %v943_v58  ;;  %v946_v60 = vmax.f32 %v5433_v57, %v5437_v59 }
 0x17f   : > { %947 = vmax.xlane.f32.xlu1 %v946_v60 }
 0x181   : > { %v5441_v61 = vpop.f32.mrb[40].mxu0 }
 0x182   : > { %v5443_v62 = vpop.f32.mrb[41].mxu0 }
 0x183   : > { %v5445_v63 = vpop.f32.mrb[42].mxu0  ;;  %v949_v0 = vmax.f32 %v5441_v61, %v5443_v62 }
 0x184   : > { %v5449_v4 = vpop.f32.mrb[43].mxu0 }
 0x185   : > { %950 = vmax.xlane.f32.xlu0 %v949_v0  ;;  %v952_v6 = vmax.f32 %v5445_v63, %v5449_v4 }
 0x187   : > { %953 = vmax.xlane.f32.xlu1 %v952_v6 }
 0x189   : > { %v5453_v10 = vpop.f32.mrb[44].mxu0 }
 0x18a   : > { %v5455_v12 = vpop.f32.mrb[45].mxu0 }
 0x18b   : > { %v5457_v16 = vpop.f32.mrb[46].mxu0  ;;  %v955_v18 = vmax.f32 %v5453_v10, %v5455_v12 }
 0x18c   : > { %v5461_v22 = vpop.f32.mrb[47].mxu0 }
 0x18d   : > { %956 = vmax.xlane.f32.xlu0 %v955_v18  ;;  %v958_v24 = vmax.f32 %v5457_v16, %v5461_v22 }
 0x18f   : > { %959 = vmax.xlane.f32.xlu1 %v958_v24 }
 0x191   : > { %v5465_v28 = vpop.f32.mrb[48].mxu0 }
 0x192   : > { %7170 = vst [vmem:[#allocation5_spill] sm:$0xff] %v5465_v28  ;;  %v5467_v30 = vpop.f32.mrb[49].mxu0 }
 0x193   : > { %7171 = vst [vmem:[#allocation6_spill] sm:$0xff] %v5467_v30  ;;  %v5469_v34 = vpop.f32.mrb[50].mxu0  ;;  %v961_v36 = vmax.f32 %v5465_v28, %v5467_v30  ;;  %v5509_v30 = vpop.permute.xlu0 %2171 }
 0x194   : > { %v5473_v40 = vpop.f32.mrb[51].mxu0  ;;  %7182 = vst [vmem:[#allocation17_spill] sm:$0xff] %v5509_v30 }
 0x195   : > { %962 = vmax.xlane.f32.xlu0 %v961_v36  ;;  %v964_v42 = vmax.f32 %v5469_v34, %v5473_v40 }
 0x197   : > { %965 = vmax.xlane.f32.xlu1 %v964_v42 }
 0x199   : > { %v5477_v46 = vpop.f32.mrb[52].mxu0 }
 0x19a   : > { %7172 = vst [vmem:[#allocation7_spill] sm:$0xff] %v5477_v46  ;;  %v5479_v48 = vpop.f32.mrb[53].mxu0 }
 0x19b   : > { %7173 = vst [vmem:[#allocation8_spill] sm:$0xff] %v5479_v48  ;;  %v5481_v52 = vpop.f32.mrb[54].mxu0  ;;  %v967_v54 = vmax.f32 %v5477_v46, %v5479_v48 }
 0x19c   : > { %7174 = vst [vmem:[#allocation9_spill] sm:$0xff] %v5481_v52  ;;  %v5485_v58 = vpop.f32.mrb[55].mxu0 }
 0x19d   : > { %7175 = vst [vmem:[#allocation10_spill] sm:$0xff] %v5485_v58  ;;  %968 = vmax.xlane.f32.xlu0 %v967_v54  ;;  %v970_v60 = vmax.f32 %v5481_v52, %v5485_v58 }
 0x19f   : > { %971 = vmax.xlane.f32.xlu1 %v970_v60 }
 0x1a1   : > { %v5489_v0 = vpop.f32.mrb[56].mxu0 }
 0x1a2   : > { %7176 = vst [vmem:[#allocation11_spill] sm:$0xff] %v5489_v0  ;;  %v5491_v6 = vpop.f32.mrb[57].mxu0 }
 0x1a3   : > { %7177 = vst [vmem:[#allocation12_spill] sm:$0xff] %v5491_v6  ;;  %v5493_v18 = vpop.f32.mrb[58].mxu0  ;;  %v973_v24 = vmax.f32 %v5489_v0, %v5491_v6  ;;  %v5515_v6 = vpop.permute.xlu0 %2173 }
 0x1a4   : > { %7178 = vst [vmem:[#allocation13_spill] sm:$0xff] %v5493_v18  ;;  %v5497_v36 = vpop.f32.mrb[59].mxu0  ;;  %7184 = vst [vmem:[#allocation19_spill] sm:$0xff] %v5515_v6  ;;  %v5519_v0 = vpop.permute.xlu1 %2189 }
 0x1a5   : > { %7179 = vst [vmem:[#allocation14_spill] sm:$0xff] %v5497_v36  ;;  %974 = vmax.xlane.f32.xlu0 %v973_v24  ;;  %v976_v42 = vmax.f32 %v5493_v18, %v5497_v36  ;;  %7186 = vst [vmem:[#allocation21_spill] sm:$0xff] %v5519_v0 }
 0x1a7   : > { %977 = vmax.xlane.f32.xlu1 %v976_v42  ;;  %v5517_v42 = vpop.permute.xlu0 %2175 }
 0x1a8   : > { %7185 = vst [vmem:[#allocation20_spill] sm:$0xff] %v5517_v42  ;;  %v5523_v18 = vpop.permute.xlu1 %2191 }
 0x1a9   : > { %v5501_v54 = vpop.f32.mrb[60].mxu0  ;;  %7188 = vst [vmem:[#allocation23_spill] sm:$0xff] %v5523_v18 }
 0x1aa   : > { %7180 = vst [vmem:[#allocation15_spill] sm:$0xff] %v5501_v54  ;;  %v5503_v48 = vpop.f32.mrb[61].mxu0 }
 0x1ab   : > { %7181 = vst [vmem:[#allocation16_spill] sm:$0xff] %v5503_v48  ;;  %v5505_v60 = vpop.f32.mrb[62].mxu0  ;;  %v979_v46 = vmax.f32 %v5501_v54, %v5503_v48  ;;  %v5521_v36 = vpop.permute.xlu0 %2177 }
 0x1ac   : > { %v5511_v58 = vpop.f32.mrb[63].mxu0  ;;  %7187 = vst [vmem:[#allocation22_spill] sm:$0xff] %v5521_v36  ;;  %v5527_v28 = vpop.permute.xlu1 %2193 }
 0x1ad   : > { %7183 = vst [vmem:[#allocation18_spill] sm:$0xff] %v5511_v58  ;;  %980 = vmax.xlane.f32.xlu0 %v979_v46  ;;  %v982_v24 = vmax.f32 %v5505_v60, %v5511_v58  ;;  %7189 = vst [vmem:[#allocation24_spill] sm:$0xff] %v5527_v28 }
 0x1af   : > { %983 = vmax.xlane.f32.xlu1 %v982_v24 }
 0x1c2   : > { %v891_v48 = vpop.xlane.xlu0 %890 }
 0x1c3   : > { %v985_v30 = vsub.f32 %v5321_v1, %v891_v48  ;;  %v986_v54 = vsub.f32 %v5323_v2, %v891_v48 }
 0x1c5   : > { %v1049_v46 = vmul.f32 1.442695, %v985_v30  ;;  %v1051_v52 = vmul.f32 1.442695, %v986_v54 }
 0x1c6   : > { %v894_v24 = vpop.xlane.xlu0 %893 }
 0x1c7   : > { %4637 = vpow2.f32 %v1049_v46  ;;  %v987_v6 = vsub.f32 %v5325_v3, %v894_v24  ;;  %v988_v42 = vsub.f32 %v5329_v5, %v894_v24 }
 0x1c8   : > { %4639 = vpow2.f32 %v1051_v52 }
 0x1c9   : > { %v1053_v0 = vmul.f32 1.442695, %v987_v6  ;;  %v1055_v36 = vmul.f32 1.442695, %v988_v42 }
 0x1ca   : > { %v897_v58 = vpop.xlane.xlu1 %896 }
 0x1cb   : > { %4641 = vpow2.f32 %v1053_v0  ;;  %v989_v18 = vsub.f32 %v5333_v7, %v897_v58  ;;  %v990_v1 = vsub.f32 %v5335_v8, %v897_v58 }
 0x1cc   : > { %4643 = vpow2.f32 %v1055_v36 }
 0x1cd   : > { %v1057_v2 = vmul.f32 1.442695, %v989_v18  ;;  %v1059_v30 = vmul.f32 1.442695, %v990_v1 }
 0x1ce   : > { %v900_v48 = vpop.xlane.xlu1 %899 }
 0x1cf   : > { %4645 = vpow2.f32 %v1057_v2  ;;  %v991_v54 = vsub.f32 %v5337_v9, %v900_v48  ;;  %v992_v3 = vsub.f32 %v5341_v11, %v900_v48 }
 0x1d0   : > { %4647 = vpow2.f32 %v1059_v30 }
 0x1d1   : > { %v5535_v5 = vpop.eup %4637  ;;  %v1061_v52 = vmul.f32 1.442695, %v991_v54  ;;  %v1063_v6 = vmul.f32 1.442695, %v992_v3 }
 0x1d2   : > { %v5537_v42 = vpop.eup %4639  ;;  %v903_v0 = vpop.xlane.xlu0 %902 }
 0x1d3   : > { %4649 = vpow2.f32 %v1061_v52  ;;  %v993_v7 = vsub.f32 %v5345_v13, %v903_v0  ;;  %v994_v8 = vsub.f32 %v5347_v14, %v903_v0  ;;  %v1177_v58 = vadd.f32 %v5537_v42, %v5535_v5  ;;  %v4597_v52 = vld [vmem:[%s5194_s7 + $0x60] sm:$0xff]   ;;  %v4599_v0 = vld [vmem:[%s5194_s7 + $0x68] sm:$0xff]  }
 0x1d4   : > { %4651 = vpow2.f32 %v1063_v6  ;;  %v4598_v6 = vld [vmem:[%s5194_s7 + $0x28] sm:$0xff]  }
 0x1d5   : > { %v5543_v9 = vpop.eup %4641  ;;  %v1065_v11 = vmul.f32 1.442695, %v993_v7  ;;  %v1067_v18 = vmul.f32 1.442695, %v994_v8  ;;  %1178 = vadd.xlane.f32.xlu0 %v1177_v58  ;;  %v4600_v7 = vld [vmem:[%s5194_s7 + $0x20] sm:$0xff]   ;;  %v906_v8 = vpop.xlane.xlu1 %905 }
 0x1d6   : > { %v5545_v36 = vpop.eup %4643 }
 0x1d7   : > { %4653 = vpow2.f32 %v1065_v11  ;;  %v1180_v46 = vadd.f32 %v5545_v36, %v5543_v9 }
 0x1d8   : > { %4655 = vpow2.f32 %v1067_v18  ;;  %v995_v18 = vsub.f32 %v5349_v15, %v906_v8 }
 0x1d9   : > { %v5549_v13 = vpop.eup %4645  ;;  %1181 = vadd.xlane.f32.xlu1 %v1180_v46 }
 0x1da   : > { %v5551_v14 = vpop.eup %4647  ;;  %v909_v58 = vpop.xlane.xlu0 %908 }
 0x1db   : > { %v1183_v24 = vadd.f32 %v5551_v14, %v5549_v13  ;;  %v997_v46 = vsub.f32 %v5357_v19, %v909_v58 }
 0x1dc   : > { %v912_v11 = vpop.xlane.xlu1 %911 }
 0x1dd   : > { %v5555_v1 = vpop.eup %4649  ;;  %1184 = vadd.xlane.f32.xlu0 %v1183_v24  ;;  %v998_v24 = vsub.f32 %v5359_v20, %v909_v58  ;;  %v999_v28 = vsub.f32 %v5361_v21, %v912_v11  ;;  %v1000_v15 = vsub.f32 %v5365_v23, %v912_v11 }
 0x1de   : > { %7190 = vst [vmem:[#allocation25_spill] sm:$0xff] %v5555_v1  ;;  %v5557_v2 = vpop.eup %4651 }
 0x1df   : > { %7191 = vst [vmem:[#allocation26_spill] sm:$0xff] %v5557_v2  ;;  %v1186_v30 = vadd.f32 %v5557_v2, %v5555_v1  ;;  %v1077_v20 = vmul.f32 1.442695, %v999_v28 }
 0x1e1   : > { %v5561_v48 = vpop.eup %4653  ;;  %1187 = vadd.xlane.f32.xlu1 %v1186_v30 }
 0x1e2   : > { %7192 = vst [vmem:[#allocation27_spill] sm:$0xff] %v5561_v48  ;;  %v5563_v54 = vpop.eup %4655  ;;  %v915_v30 = vpop.xlane.xlu0 %914 }
 0x1e3   : > { %7193 = vst [vmem:[#allocation28_spill] sm:$0xff] %v5563_v54  ;;  %v1189_v3 = vadd.f32 %v5563_v54, %v5561_v48  ;;  %v1073_v48 = vmul.f32 1.442695, %v997_v46  ;;  %v1002_v54 = vsub.f32 %v5371_v26, %v915_v30  ;;  %v1079_v26 = vmul.f32 1.442695, %v1000_v15 }
 0x1e5   : > { %1190 = vadd.xlane.f32.xlu0 %v1189_v3  ;;  %v996_v3 = vsub.f32 %v5353_v17, %v906_v8  ;;  %v1083_v21 = vmul.f32 1.442695, %v1002_v54 }
 0x1e7   : > { %v1071_v2 = vmul.f32 1.442695, %v996_v3 }
 0x1ea   : > { %v921_v1 = vpop.xlane.xlu0 %920 }
 0x1eb   : > { %v1005_v8 = vsub.f32 %v5381_v31, %v921_v1 }
 0x1f2   : > { %2195 = vrot.lane.b32.xlu1 %v4597_v52, %s5101_s11  ;;  %v918_v52 = vpop.xlane.xlu1 %917 }
 0x1f3   : > { %v1003_v58 = vsub.f32 %v5373_v27, %v918_v52  ;;  %v1004_v46 = vsub.f32 %v5377_v29, %v918_v52  ;;  %v1089_v27 = vmul.f32 1.442695, %v1005_v8 }
 0x1f5   : > { %v1085_v23 = vmul.f32 1.442695, %v1003_v58 }
 0x1f6   : > { %2181 = vrot.lane.b32.xlu1 %v4598_v6, %s5101_s11  ;;  %v1069_v6 = vmul.f32 1.442695, %v995_v18  ;;  %v924_v19 = vpop.xlane.xlu1 %923  ;;  %v927_v18 = vpop.xlane.xlu0 %926 }
 0x1f7   : > { %v1007_v28 = vsub.f32 %v5385_v33, %v924_v19  ;;  %v1010_v54 = vsub.f32 %v5395_v38, %v927_v18 }
 0x1f8   : > { %4657 = vpow2.f32 %v1069_v6 }
 0x1f9   : > { %4659 = vpow2.f32 %v1073_v48  ;;  %v1009_v48 = vsub.f32 %v5393_v37, %v927_v18  ;;  %v1093_v29 = vmul.f32 1.442695, %v1007_v28  ;;  %v1099_v37 = vmul.f32 1.442695, %v1010_v54 }
 0x1fa   : > { %2197 = vrot.lane.b32.xlu1 %v4599_v0, %s5101_s11  ;;  %v1001_v0 = vsub.f32 %v5369_v25, %v915_v30  ;;  %v1006_v25 = vsub.f32 %v5383_v32, %v921_v1  ;;  %v933_v11 = vpop.xlane.xlu0 %932  ;;  %v1087_v32 = vmul.f32 1.442695, %v1004_v46  ;;  %v1008_v1 = vsub.f32 %v5389_v35, %v924_v19 }
 0x1fb   : > { %2179 = vrot.lane.b32.xlu0 %v4600_v7, %s5101_s11  ;;  %v1075_v7 = vmul.f32 1.442695, %v998_v24  ;;  %v930_v24 = vpop.xlane.xlu1 %929  ;;  %v1097_v33 = vmul.f32 1.442695, %v1009_v48  ;;  %v1013_v3 = vsub.f32 %v5405_v43, %v933_v11  ;;  %v1014_v38 = vsub.f32 %v5407_v44, %v933_v11 }
 0x1fc   : > { %v1081_v17 = vmul.f32 1.442695, %v1001_v0  ;;  %v1091_v31 = vmul.f32 1.442695, %v1006_v25  ;;  %v1011_v30 = vsub.f32 %v5397_v39, %v930_v24  ;;  %v1095_v35 = vmul.f32 1.442695, %v1008_v1 }
 0x1fd   : > { %4661 = vpow2.f32 %v1075_v7  ;;  %v1012_v7 = vsub.f32 %v5401_v41, %v930_v24  ;;  %v1105_v58 = vmul.f32 1.442695, %v1013_v3  ;;  %v1107_v8 = vmul.f32 1.442695, %v1014_v38 }
 0x1fe   : > { %4663 = vpow2.f32 %v1071_v2  ;;  %v1101_v39 = vmul.f32 1.442695, %v1011_v30 }
 0x1ff   : > { %4665 = vpow2.f32 %v1077_v20  ;;  %v936_v2 = vpop.xlane.xlu1 %935  ;;  %v1103_v18 = vmul.f32 1.442695, %v1012_v7 }
 0x200   : > { %4667 = vpow2.f32 %v1081_v17  ;;  %v1015_v43 = vsub.f32 %v5409_v45, %v936_v2 }
 0x201   : > { %4669 = vpow2.f32 %v1083_v21 }
 0x202   : > { %4671 = vpow2.f32 %v1079_v26  ;;  %v5593_v52 = vpop.eup %4657  ;;  %v939_v6 = vpop.xlane.xlu0 %938  ;;  %v1016_v26 = vsub.f32 %v5413_v47, %v936_v2 }
 0x203   : > { %4673 = vpow2.f32 %v1085_v23  ;;  %v5596_v0 = vpop.eup %4659  ;;  %v1017_v44 = vsub.f32 %v5417_v49, %v939_v6  ;;  %v1018_v21 = vsub.f32 %v5419_v50, %v939_v6  ;;  %v1109_v49 = vmul.f32 1.442695, %v1015_v43 }
 0x204   : > { %4675 = vpow2.f32 %v1089_v27  ;;  %v942_v15 = vpop.xlane.xlu1 %941 }
 0x205   : > { %4677 = vpow2.f32 %v1091_v31  ;;  %v1019_v23 = vsub.f32 %v5421_v51, %v942_v15  ;;  %v1113_v50 = vmul.f32 1.442695, %v1017_v44  ;;  %v1115_v47 = vmul.f32 1.442695, %v1018_v21 }
 0x206   : > { %4679 = vpow2.f32 %v1087_v32  ;;  %v1111_v51 = vmul.f32 1.442695, %v1016_v26  ;;  %v1020_v1 = vsub.f32 %v5425_v53, %v942_v15 }
 0x207   : > { %v5599_v19 = vpop.eup %4661  ;;  %4681 = vpow2.f32 %v1093_v29  ;;  %v1117_v30 = vmul.f32 1.442695, %v1019_v23 }
 0x208   : > { %v5602_v20 = vpop.eup %4663  ;;  %4683 = vpow2.f32 %v1097_v33  ;;  %v1195_v46 = vadd.f32 %v5599_v19, %v5596_v0 }
 0x209   : > { %v5605_v17 = vpop.eup %4665  ;;  %4685 = vpow2.f32 %v1099_v37  ;;  %v1192_v11 = vadd.f32 %v5602_v20, %v5593_v52 }
 0x20a   : > { %v945_v41 = vpop.xlane.xlu0 %944  ;;  %v5608_v25 = vpop.eup %4667  ;;  %4687 = vpow2.f32 %v1095_v35 }
 0x20b   : > { %v5613_v24 = vpop.eup %4669  ;;  %4689 = vpow2.f32 %v1101_v39  ;;  %v1021_v27 = vsub.f32 %v5429_v55, %v945_v41  ;;  %v1022_v31 = vsub.f32 %v5431_v56, %v945_v41 }
 0x20c   : > { %v948_v45 = vpop.xlane.xlu1 %947  ;;  %v5616_v28 = vpop.eup %4671  ;;  %4691 = vpow2.f32 %v1105_v58  ;;  %v1201_v55 = vadd.f32 %v5613_v24, %v5608_v25 }
 0x20d   : > { %v5619_v48 = vpop.eup %4673  ;;  %4693 = vpow2.f32 %v1107_v8  ;;  %v1023_v56 = vsub.f32 %v5433_v57, %v948_v45  ;;  %v1121_v3 = vmul.f32 1.442695, %v1021_v27  ;;  %v1123_v53 = vmul.f32 1.442695, %v1022_v31 }
 0x20e   : > { %v5624_v32 = vpop.eup %4675  ;;  %4695 = vpow2.f32 %v1103_v18  ;;  %v1198_v7 = vadd.f32 %v5616_v28, %v5605_v17  ;;  %v1119_v57 = vmul.f32 1.442695, %v1020_v1  ;;  %v1024_v39 = vsub.f32 %v5437_v59, %v948_v45 }
 0x20f   : > { %v5629_v29 = vpop.eup %4677  ;;  %4697 = vpow2.f32 %v1109_v49  ;;  %v1125_v44 = vmul.f32 1.442695, %v1023_v56 }
 0x210   : > { %v5632_v33 = vpop.eup %4679  ;;  %4699 = vpow2.f32 %v1113_v50 }
 0x211   : > { %v5635_v38 = vpop.eup %4681  ;;  %4701 = vpow2.f32 %v1115_v47  ;;  %v1204_v45 = vadd.f32 %v5632_v33, %v5619_v48 }
 0x212   : > { %v951_v54 = vpop.xlane.xlu0 %950  ;;  %v5640_v15 = vpop.eup %4683  ;;  %4703 = vpow2.f32 %v1111_v51 }
 0x213   : > { %v1025_v37 = vsub.f32 %v5441_v61, %v951_v54  ;;  %v1026_v6 = vsub.f32 %v5443_v62, %v951_v54  ;;  %v1207_v61 = vadd.f32 %v5629_v29, %v5624_v32  ;;  %v5645_v58 = vpop.eup %4685  ;;  %4705 = vpow2.f32 %v1117_v30 }
 0x214   : > { %v954_v2 = vpop.xlane.xlu1 %953  ;;  %v5648_v8 = vpop.eup %4687  ;;  %4707 = vpow2.f32 %v1121_v3 }
 0x215   : > { %v1027_v62 = vsub.f32 %v5445_v63, %v954_v2  ;;  %v1129_v21 = vmul.f32 1.442695, %v1025_v37  ;;  %v5651_v18 = vpop.eup %4689  ;;  %4709 = vpow2.f32 %v1123_v53  ;;  %v1131_v59 = vmul.f32 1.442695, %v1026_v6 }
 0x216   : > { %4711 = vpow2.f32 %v1119_v57  ;;  %v1127_v63 = vmul.f32 1.442695, %v1024_v39  ;;  %v1028_v49 = vsub.f32 %v5449_v4, %v954_v2  ;;  %v1210_v51 = vadd.f32 %v5648_v8, %v5635_v38 }
 0x217   : > { %4713 = vpow2.f32 %v1125_v44  ;;  %v1133_v27 = vmul.f32 1.442695, %v1027_v62 }
 0x218   : > { %4715 = vpow2.f32 %v1129_v21  ;;  %v1135_v2 = vmul.f32 1.442695, %v1028_v49  ;;  %v7195_v21 = vld [vmem:[#allocation9_spill] sm:$0xff] }
 0x219   : > { %4717 = vpow2.f32 %v1131_v59  ;;  %v7196_v59 = vld [vmem:[#allocation10_spill] sm:$0xff] }
 0x21a   : > { %1196 = vadd.xlane.f32.xlu0 %v1195_v46  ;;  %v957_v35 = vpop.xlane.xlu0 %956  ;;  %v5656_v46 = vpop.eup %4691  ;;  %4719 = vpow2.f32 %v1127_v63  ;;  %v7197_v63 = vld [vmem:[#allocation6_spill] sm:$0xff] }
 0x21b   : > { %v1029_v41 = vsub.f32 %v5453_v10, %v957_v35  ;;  %v1030_v26 = vsub.f32 %v5455_v12, %v957_v35  ;;  %v1213_v10 = vadd.f32 %v5645_v58, %v5640_v15  ;;  %v5661_v50 = vpop.eup %4693  ;;  %4721 = vpow2.f32 %v1133_v27 }
 0x21c   : > { %v960_v43 = vpop.xlane.xlu1 %959  ;;  %v5663_v47 = vpop.eup %4695 }
 0x21d   : > { %v1137_v12 = vmul.f32 1.442695, %v1029_v41  ;;  %v5666_v54 = vpop.eup %4697  ;;  %v1139_v4 = vmul.f32 1.442695, %v1030_v26  ;;  %v1032_v56 = vsub.f32 %v5461_v22, %v960_v43  ;;  %v1216_v22 = vadd.f32 %v5663_v47, %v5651_v18 }
 0x21e   : > { %1202 = vadd.xlane.f32.xlu0 %v1201_v55  ;;  %1193 = vadd.xlane.f32.xlu1 %v1192_v11  ;;  %v5671_v1 = vpop.eup %4699  ;;  %v1031_v55 = vsub.f32 %v5457_v16, %v960_v43 }
 0x21f   : > { %v5676_v30 = vpop.eup %4701  ;;  %4723 = vpow2.f32 %v1137_v12  ;;  %v1143_v43 = vmul.f32 1.442695, %v1032_v56 }
 0x220   : > { %v5679_v37 = vpop.eup %4703  ;;  %4725 = vpow2.f32 %v1139_v4  ;;  %v1141_v35 = vmul.f32 1.442695, %v1031_v55  ;;  %v1225_v57 = vadd.f32 %v5676_v30, %v5671_v1 }
 0x221   : > { %v5681_v53 = vpop.eup %4705  ;;  %4727 = vpow2.f32 %v1135_v2 }
 0x222   : > { %1208 = vadd.xlane.f32.xlu0 %v1207_v61  ;;  %1199 = vadd.xlane.f32.xlu1 %v1198_v7  ;;  %v963_v3 = vpop.xlane.xlu0 %962  ;;  %v5683_v16 = vpop.eup %4707  ;;  %v7194_v61 = vld [vmem:[#allocation5_spill] sm:$0xff] }
 0x223   : > { %v5689_v39 = vpop.eup %4709  ;;  %v1033_v44 = vsub.f32 %v7194_v61, %v963_v3  ;;  %v1034_v49 = vsub.f32 %v7197_v63, %v963_v3  ;;  %v7202_v63 = vld [vmem:[#allocation11_spill] sm:$0xff] }
 0x224   : > { %v966_v23 = vpop.xlane.xlu1 %965 }
 0x225   : > { %v1035_v31 = vsub.f32 %v5469_v34, %v966_v23  ;;  %v1036_v11 = vsub.f32 %v5473_v40, %v966_v23  ;;  %v1219_v34 = vadd.f32 %v5661_v50, %v5656_v46  ;;  %v1145_v55 = vmul.f32 1.442695, %v1033_v44 }
 0x226   : > { %1214 = vadd.xlane.f32.xlu0 %v1213_v10  ;;  %1205 = vadd.xlane.f32.xlu1 %v1204_v45  ;;  %v5694_v45 = vpop.eup %4711  ;;  %v1147_v56 = vmul.f32 1.442695, %v1034_v49 }
 0x227   : > { %v1149_v40 = vmul.f32 1.442695, %v1035_v31  ;;  %v1151_v6 = vmul.f32 1.442695, %v1036_v11  ;;  %v5697_v23 = vpop.eup %4713  ;;  %v7198_v31 = vld [vmem:[#allocation7_spill] sm:$0xff]  ;;  %v1231_v11 = vadd.f32 %v5689_v39, %v5683_v16  ;;  %v1228_v61 = vadd.f32 %v5694_v45, %v5681_v53 }
 0x228   : > { %v5699_v12 = vpop.eup %4715 }
 0x229   : > { %4729 = vpow2.f32 %v1149_v40  ;;  %v5706_v2 = vpop.eup %4717  ;;  %v7199_v40 = vld [vmem:[#allocation8_spill] sm:$0xff] }
 0x22a   : > { %1220 = vadd.xlane.f32.xlu0 %v1219_v34  ;;  %1211 = vadd.xlane.f32.xlu1 %v1210_v51  ;;  %v969_v62 = vpop.xlane.xlu0 %968  ;;  %4731 = vpow2.f32 %v1151_v6  ;;  %v1222_v51 = vadd.f32 %v5679_v37, %v5666_v54  ;;  %v5708_v34 = vpop.eup %4719 }
 0x22b   : > { %4733 = vpow2.f32 %v1141_v35  ;;  %v1037_v4 = vsub.f32 %v7198_v31, %v969_v62  ;;  %v5710_v3 = vpop.eup %4721  ;;  %v1038_v6 = vsub.f32 %v7199_v40, %v969_v62  ;;  %v1234_v40 = vadd.f32 %v5708_v34, %v5697_v23 }
 0x22c   : > { %v972_v7 = vpop.xlane.xlu1 %971  ;;  %4735 = vpow2.f32 %v1143_v43  ;;  %v1237_v43 = vadd.f32 %v5706_v2, %v5699_v12 }
 0x22d   : > { %v1039_v41 = vsub.f32 %v7195_v21, %v972_v7  ;;  %v1040_v26 = vsub.f32 %v7196_v59, %v972_v7  ;;  %v5713_v7 = vpop.eup %4723  ;;  %v7200_v21 = vld [vmem:[#allocation13_spill] sm:$0xff]  ;;  %v7201_v59 = vld [vmem:[#allocation14_spill] sm:$0xff] }
 0x22e   : > { %1226 = vadd.xlane.f32.xlu0 %v1225_v57  ;;  %1217 = vadd.xlane.f32.xlu1 %v1216_v22  ;;  %v1153_v57 = vmul.f32 1.442695, %v1037_v4  ;;  %v5719_v44 = vpop.eup %4725 }
 0x22f   : > { %v1157_v10 = vmul.f32 1.442695, %v1039_v41  ;;  %v1159_v27 = vmul.f32 1.442695, %v1040_v26  ;;  %v5723_v62 = vpop.eup %4727 }
 0x231   : > { %4737 = vpow2.f32 %v1157_v10  ;;  %v1155_v10 = vmul.f32 1.442695, %v1038_v6 }
 0x232   : > { %1232 = vadd.xlane.f32.xlu0 %v1231_v11  ;;  %1223 = vadd.xlane.f32.xlu1 %v1222_v51  ;;  %4739 = vpow2.f32 %v1159_v27  ;;  %v975_v35 = vpop.xlane.xlu0 %974  ;;  %v7203_v27 = vld [vmem:[#allocation12_spill] sm:$0xff] }
 0x233   : > { %4741 = vpow2.f32 %v1145_v55  ;;  %v1041_v49 = vsub.f32 %v7202_v63, %v975_v35  ;;  %v1042_v31 = vsub.f32 %v7203_v27, %v975_v35  ;;  %v5727_v51 = vpop.eup %4729  ;;  %v1243_v55 = vadd.f32 %v5719_v44, %v5713_v7 }
 0x234   : > { %v978_v22 = vpop.xlane.xlu1 %977  ;;  %4743 = vpow2.f32 %v1147_v56 }
 0x235   : > { %v1043_v41 = vsub.f32 %v7200_v21, %v978_v22  ;;  %v1044_v26 = vsub.f32 %v7201_v59, %v978_v22  ;;  %4745 = vpow2.f32 %v1153_v57  ;;  %v5733_v22 = vpop.eup %4731  ;;  %v1163_v35 = vmul.f32 1.442695, %v1042_v31 }
 0x236   : > { %1238 = vadd.xlane.f32.xlu0 %v1237_v43  ;;  %1229 = vadd.xlane.f32.xlu1 %v1228_v61  ;;  %v5735_v56 = vpop.eup %4733  ;;  %v1161_v43 = vmul.f32 1.442695, %v1041_v49  ;;  %v1252_v61 = vadd.f32 %v5733_v22, %v5727_v51  ;;  %v1240_v21 = vadd.f32 %v5723_v62, %v5710_v3 }
 0x237   : > { %v1165_v4 = vmul.f32 1.442695, %v1043_v41  ;;  %v1167_v11 = vmul.f32 1.442695, %v1044_v26  ;;  %v5737_v6 = vpop.eup %4735 }
 0x238   : > { %v1246_v49 = vadd.f32 %v5737_v6, %v5735_v56 }
 0x239   : > { %4747 = vpow2.f32 %v1165_v4 }
 0x23a   : > { %4749 = vpow2.f32 %v1167_v11  ;;  %1244 = vadd.xlane.f32.xlu0 %v1243_v55  ;;  %1235 = vadd.xlane.f32.xlu1 %v1234_v40 }
 0x23b   : > { %4751 = vpow2.f32 %v1155_v10  ;;  %v5739_v57 = vpop.eup %4737 }
 0x23c   : > { %v5745_v41 = vpop.eup %4739  ;;  %4753 = vpow2.f32 %v1161_v43 }
 0x23d   : > { %v5747_v59 = vpop.eup %4741  ;;  %4755 = vpow2.f32 %v1163_v35  ;;  %v1258_v63 = vadd.f32 %v5745_v41, %v5739_v57 }
 0x23e   : > { %1253 = vadd.xlane.f32.xlu0 %v1252_v61  ;;  %1241 = vadd.xlane.f32.xlu1 %v1240_v21  ;;  %7204 = vst [vmem:[#allocation5_spill] sm:$0xff] %v5747_v59  ;;  %v5749_v26 = vpop.eup %4743  ;;  %v4601_v21 = vld [vmem:[%s5194_s7 + $0x30] sm:$0xff]  }
 0x23f   : > { %7205 = vst [vmem:[#allocation9_spill] sm:$0xff] %v5749_v26  ;;  %v5755_v10 = vpop.eup %4745  ;;  %v1249_v4 = vadd.f32 %v5749_v26, %v5747_v59 }
 0x240   : > { %7206 = vst [vmem:[#allocation10_spill] sm:$0xff] %v5755_v10 }
 0x242   : > { %1259 = vadd.xlane.f32.xlu0 %v1258_v63  ;;  %1247 = vadd.xlane.f32.xlu1 %v1246_v49  ;;  %v4602_v63 = vld [vmem:[%s5194_s7 + $0x70] sm:$0xff]   ;;  %v981_v49 = vpop.xlane.xlu0 %980 }
 0x243   : > { %v5757_v27 = vpop.eup %4747 }
 0x244   : > { %7207 = vst [vmem:[#allocation6_spill] sm:$0xff] %v5757_v27  ;;  %v5759_v31 = vpop.eup %4749 }
 0x245   : > { %7208 = vst [vmem:[#allocation7_spill] sm:$0xff] %v5759_v31  ;;  %v5763_v11 = vpop.eup %4751  ;;  %v1264_v55 = vadd.f32 %v5759_v31, %v5757_v27 }
 0x246   : > { %7209 = vst [vmem:[#allocation8_spill] sm:$0xff] %v5763_v11  ;;  %1250 = vadd.xlane.f32.xlu1 %v1249_v4  ;;  %v5767_v40 = vpop.eup %4753  ;;  %v1255_v43 = vadd.f32 %v5763_v11, %v5755_v10  ;;  %v984_v4 = vpop.xlane.xlu1 %983  ;;  %v7212_v11 = vld [vmem:[#allocation18_spill] sm:$0xff] }
 0x247   : > { %1265 = vadd.xlane.f32.xlu0 %v1264_v55  ;;  %7210 = vst [vmem:[#allocation13_spill] sm:$0xff] %v5767_v40  ;;  %v5771_v35 = vpop.eup %4755  ;;  %v1047_v10 = vsub.f32 %v5505_v60, %v984_v4  ;;  %v1048_v27 = vsub.f32 %v7212_v11, %v984_v4 }
 0x248   : > { %7211 = vst [vmem:[#allocation14_spill] sm:$0xff] %v5771_v35  ;;  %v1261_v61 = vadd.f32 %v5771_v35, %v5767_v40  ;;  %v7213_v35 = vld [vmem:[#allocation15_spill] sm:$0xff] }
 0x249   : > { %v1173_v40 = vmul.f32 1.442695, %v1047_v10  ;;  %v1045_v31 = vsub.f32 %v7213_v35, %v981_v49 }
 0x24a   : > { %1256 = vadd.xlane.f32.xlu1 %v1255_v43 }
 0x24e   : > { %1262 = vadd.xlane.f32.xlu1 %v1261_v61  ;;  %v1175_v61 = vmul.f32 1.442695, %v1048_v27 }
 0x25d   : > { %2183 = vrot.lane.b32.xlu0 %v4601_v21, %s5101_s11  ;;  %v7214_v21 = vld [vmem:[#allocation16_spill] sm:$0xff] }
 0x25f   : > { %2199 = vrot.lane.b32.xlu1 %v4602_v63, %s5101_s11  ;;  %v1046_v63 = vsub.f32 %v7214_v21, %v981_v49 }
 0x261   : > { %v1171_v10 = vmul.f32 1.442695, %v1046_v63  ;;  %v7216_v63 = vld [vmem:[#allocation21_spill] sm:$0xff] }
 0x262   : > { %v1179_v55 = vpop.xlane.xlu0 %1178 }
 0x263   : > { %4757 = vrcp.f32 %v1179_v55  ;;  %v1169_v55 = vmul.f32 1.442695, %v1045_v31 }
 0x266   : > { %v1182_v43 = vpop.xlane.xlu1 %1181 }
 0x267   : > { %4759 = vrcp.f32 %v1182_v43 }
 0x26a   : > { %v1185_v59 = vpop.xlane.xlu0 %1184 }
 0x26b   : > { %4761 = vrcp.f32 %v1185_v59 }
 0x26c   : > { %4763 = vpow2.f32 %v1173_v40 }
 0x26d   : > { %v4758_v26 = vpop.eup %4757  ;;  %4765 = vpow2.f32 %v1175_v61 }
 0x26e   : > { %v1188_v60 = vpop.xlane.xlu1 %1187  ;;  %v1306_v11 = vmul.f32 %v4758_v26, %v5537_v42  ;;  %v1305_v4 = vmul.f32 %v4758_v26, %v5535_v5 }
 0x26f   : > { %4767 = vrcp.f32 %v1188_v60 }
 0x270   : > { %1370 = vst [vmem:[%s5788_s24 + $0x8] sm:$0xff] %v1306_v11  ;;  %1369 = vst [vmem:[%s5788_s24] sm:$0xff] %v1305_v4  ;;  %4769 = vpow2.f32 %v1169_v55 }
 0x271   : > { %v4760_v59 = vpop.eup %4759 }
 0x272   : > { %v1191_v27 = vpop.xlane.xlu0 %1190  ;;  %v1308_v31 = vmul.f32 %v4760_v59, %v5545_v36  ;;  %v1307_v40 = vmul.f32 %v4760_v59, %v5543_v9  ;;  %v7215_v9 = vld [vmem:[#allocation17_spill] sm:$0xff] }
 0x273   : > { %4771 = vrcp.f32 %v1191_v27  ;;  %v2252_v61 = vsel %vm599_vm0, %v7215_v9, 0  ;;  %v7221_v9 = vld [vmem:[#allocation19_spill] sm:$0xff] }
 0x274   : > { %4773 = vpow2.f32 %v1171_v10  ;;  %1372 = vst [vmem:[%s5788_s24 + $0x18] sm:$0xff] %v1308_v31  ;;  %v1434_v5 = vpack.c.bf16 %v1308_v31, %v1306_v11  ;;  %1371 = vst [vmem:[%s5788_s24 + $0x10] sm:$0xff] %v1307_v40  ;;  %v1433_v42 = vpack.c.bf16 %v1307_v40, %v1305_v4  ;;  %v7219_v40 = vld [vmem:[#allocation28_spill] sm:$0xff] }
 0x275   : > { %v4762_v26 = vpop.eup %4761 }
 0x276   : > { %v5796_v35 = vpop.eup %4763  ;;  %1593 = vmatprep.mubr.bf16.mxu1 %v1434_v5  ;;  %v1310_v49 = vmul.f32 %v4762_v26, %v5551_v14  ;;  %v1309_v43 = vmul.f32 %v4762_v26, %v5549_v13  ;;  %v7217_v14 = vld [vmem:[#allocation26_spill] sm:$0xff]  ;;  %v7218_v13 = vld [vmem:[#allocation25_spill] sm:$0xff] }
 0x277   : > { %v5800_v36 = vpop.eup %4765  ;;  %1594 = vmatmul.mubr.bf16.vlgmr.msra.gmra.mrb[0].mxu1 %v1433_v42  ;;  %v7220_v42 = vld [vmem:[#allocation27_spill] sm:$0xff] }
 0x278   : > { %4291 = vmatpush3.bf16.xpose.msra.mxu1 %v2252_v61  ;;  %1374 = vst [vmem:[%s5788_s24 + $0x28] sm:$0xff] %v1310_v49  ;;  %1373 = vst [vmem:[%s5788_s24 + $0x20] sm:$0xff] %v1309_v43  ;;  %v1270_v55 = vadd.f32 %v5800_v36, %v5796_v35  ;;  %v2255_v61 = vsel %vm599_vm0, %v7221_v9, 0  ;;  %v4607_v9 = vld [vmem:[%s5211_s10 + $0x10] sm:$0xff]  }
 0x279   : > { %v4768_v21 = vpop.eup %4767  ;;  %4475 = vmatprep.subr.msk.bf16.mxu1 %vm599_vm0, %v7216_v63 }
 0x27a   : > { %v1312_v60 = vmul.f32 %v4768_v21, %v7217_v14  ;;  %v1311_v11 = vmul.f32 %v4768_v21, %v7218_v13  ;;  %v5812_v4 = vpop.eup %4769  ;;  %v7223_v21 = vld [vmem:[#allocation20_spill] sm:$0xff]  ;;  %v2196_v14 = vpop.permute.xlu1 %2195  ;;  %v7225_v13 = vld [vmem:[#allocation22_spill] sm:$0xff] }
 0x27b   : > { %v2258_v63 = vsel %vm599_vm0, %v7223_v21, 0  ;;  %v4609_v21 = vld [vmem:[%s5211_s10 + $0x20] sm:$0xff]  }
 0x27c   : > { %1271 = vadd.xlane.f32.xlu0 %v1270_v55  ;;  %1376 = vst [vmem:[%s5788_s24 + $0x38] sm:$0xff] %v1312_v60  ;;  %v1436_v10 = vpack.c.bf16 %v1312_v60, %v1310_v49  ;;  %1375 = vst [vmem:[%s5788_s24 + $0x30] sm:$0xff] %v1311_v11  ;;  %v1435_v59 = vpack.c.bf16 %v1311_v11, %v1309_v43  ;;  %v7222_v49 = vld [vmem:[#allocation23_spill] sm:$0xff]  ;;  %v7224_v55 = vld [vmem:[#allocation24_spill] sm:$0xff]  ;;  %v2261_v11 = vsel %vm599_vm0, %v7225_v13, 0 }
 0x27d   : > { %v4772_v27 = vpop.eup %4771  ;;  %v4604_v60 = vld [vmem:[%s5194_s7 + $0x38] sm:$0xff]   ;;  %v4613_v13 = vld [vmem:[%s5211_s10 + $0x40] sm:$0xff]  }
 0x27e   : > { %v5816_v31 = vpop.eup %4773  ;;  %1601 = vmatprep.mubr.bf16.mxu1 %v1436_v10  ;;  %v5819_v5 = vmul.f32 %v4772_v27, %v7219_v40  ;;  %v5822_v26 = vmul.f32 %v4772_v27, %v7220_v42  ;;  %v4603_v10 = vld [vmem:[%s5194_s7 + $0x78] sm:$0xff]   ;;  %v4605_v27 = vld [vmem:[%s5211_s10] sm:$0xff]   ;;  %v2180_v40 = vpop.permute.xlu0 %2179  ;;  %v4606_v42 = vld [vmem:[%s5211_s10 + $0x8] sm:$0xff]   ;;  %s3619_s7 = sshll.u32 %s5788_s24, 4  ;;  %s6995_s7 = int_to_ptr.vmem [resolvable:$true] %s3619_s7 }
 0x27f   : > { %1602 = vmatmul.mubr.bf16.gmra.mrb[4].mxu1 %v1435_v59  ;;  %v1267_v43 = vadd.f32 %v5816_v31, %v5812_v4  ;;  %v2182_v59 = vpop.permute.xlu1 %2181  ;;  %p5028_p1 = scmp.lt.s32.totalorder %s6995_s7, %s5026_s13 }
 0x280   : > { %4293 = vmatpush3.bf16.xpose.msra.mxu1 %v2255_v61  ;;  %1378 = vst [vmem:[%s5788_s24 + $0x48] sm:$0xff] %v5819_v5  ;;  %1377 = vst [vmem:[%s5788_s24 + $0x40] sm:$0xff] %v5822_v26  ;;  %v2264_v61 = vsel %vm599_vm0, %v2180_v40, 0  ;;  %v4617_v40 = vld [vmem:[%s5211_s10 + $0x60] sm:$0xff]  }
 0x281   : > { %4476 = vmatprep.subr.msk.bf16.mxu1 %vm599_vm0, %v7222_v49 }
 0x283   : > { %1268 = vadd.xlane.f32.xlu1 %v1267_v43  ;;  %v2198_v49 = vpop.permute.xlu1 %2197  ;;  %v4608_v43 = vld [vmem:[%s5211_s10 + $0x18] sm:$0xff]  }
 0x288   : > { %4295 = vmatpush3.bf16.xpose.msra.mxu1 %v2258_v63  ;;  %v4610_v63 = vld [vmem:[%s5211_s10 + $0x28] sm:$0xff]  }
 0x289   : > { %4477 = vmatprep.subr.msk.bf16.mxu1 %vm599_vm0, %v7224_v55  ;;  %v4611_v55 = vld [vmem:[%s5211_s10 + $0x30] sm:$0xff]  }
 0x290   : > { %4297 = vmatpush3.bf16.xpose.msra.mxu1 %v2261_v11  ;;  %v4614_v11 = vld [vmem:[%s5211_s10 + $0x48] sm:$0xff]  }
 0x291   : > { %4478 = vmatprep.subr.msk.bf16.mxu1 %vm599_vm0, %v2196_v14  ;;  %v2267_v14 = vsel %vm599_vm0, %v2182_v59, 0  ;;  %v4616_v59 = vld [vmem:[%s5211_s10 + $0x58] sm:$0xff]  }
 0x292   : > { %2185 = vrot.lane.b32.xlu0 %v4604_v60, %s5101_s11  ;;  %v4612_v60 = vld [vmem:[%s5211_s10 + $0x38] sm:$0xff]  }
 0x294   : > { %2201 = vrot.lane.b32.xlu1 %v4603_v10, %s5101_s11  ;;  %v4615_v10 = vld [vmem:[%s5211_s10 + $0x50] sm:$0xff]  }
 0x296   : > { %2059 = vrot.lane.b32.xlu0 %v4605_v27, %s5101_s11 }
 0x298   : > { %4299 = vmatpush3.bf16.xpose.msra.mxu1 %v2264_v61  ;;  %2061 = vrot.lane.b32.xlu1 %v4606_v42, %s5101_s11  ;;  %v4618_v61 = vld [vmem:[%s5211_s10 + $0x68] sm:$0xff]  }
 0x299   : > { %4479 = vmatprep.subr.msk.bf16.mxu1 %vm599_vm0, %v2198_v49  ;;  %v4619_v49 = vld [vmem:[%s5211_s10 + $0x70] sm:$0xff]  }
 0x29a   : > { %2063 = vrot.lane.b32.xlu0 %v4607_v9, %s5101_s11 }
 0x29c   : > { %2065 = vrot.lane.b32.xlu1 %v4608_v43, %s5101_s11 }
 0x29e   : > { %2067 = vrot.lane.b32.xlu0 %v4609_v21, %s5101_s11 }
 0x2a0   : > { %4301 = vmatpush3.bf16.xpose.msra.mxu1 %v2267_v14  ;;  %2069 = vrot.lane.b32.xlu1 %v4610_v63, %s5101_s11  ;;  %v4620_v63 = vld [vmem:[%s5211_s10 + $0x78] sm:$0xff]   ;;  %s6991_s10 = scalar_lea.hbm %s7117_s4, %s4129_s6 }
 0x2a2   : > { %2071 = vrot.lane.b32.xlu0 %v4611_v55, %s5101_s11 }
 0x2a4   : > { %2073 = vrot.lane.b32.xlu1 %v4612_v60, %s5101_s11 }
 0x2a6   : > { %2075 = vrot.lane.b32.xlu0 %v4613_v13, %s5101_s11 }
 0x2a7   : > { %v1197_v27 = vpop.xlane.xlu0 %1196 }
 0x2a8   : > { %4775 = vrcp.f32 %v1197_v27  ;;  %2077 = vrot.lane.b32.xlu1 %v4614_v11, %s5101_s11 }
 0x2aa   : > { %2079 = vrot.lane.b32.xlu0 %v4615_v10, %s5101_s11 }
 0x2ab   : > { %v1203_v42 = vpop.xlane.xlu0 %1202  ;;  %v1194_v9 = vpop.xlane.xlu1 %1193 }
 0x2ac   : > { %4777 = vrcp.f32 %v1203_v42  ;;  %2081 = vrot.lane.b32.xlu1 %v4616_v59, %s5101_s11 }
 0x2ad   : > { %4779 = vrcp.f32 %v1194_v9 }
 0x2ae   : > { %2083 = vrot.lane.b32.xlu0 %v4617_v40, %s5101_s11 }
 0x2af   : > { %v1209_v43 = vpop.xlane.xlu0 %1208  ;;  %v1200_v21 = vpop.xlane.xlu1 %1199 }
 0x2b0   : > { %4781 = vrcp.f32 %v1209_v43  ;;  %2085 = vrot.lane.b32.xlu1 %v4618_v61, %s5101_s11 }
 0x2b1   : > { %4783 = vrcp.f32 %v1200_v21 }
 0x2b2   : > { %v4776_v55 = vpop.eup %4775  ;;  %2087 = vrot.lane.b32.xlu0 %v4619_v49, %s5101_s11 }
 0x2b3   : > { %v1215_v14 = vpop.xlane.xlu0 %1214  ;;  %v1206_v60 = vpop.xlane.xlu1 %1205  ;;  %v1318_v13 = vmul.f32 %v4776_v55, %v5599_v19  ;;  %v5881_v11 = vmul.f32 %v4776_v55, %v5596_v0 }
 0x2b4   : > { %4785 = vrcp.f32 %v1215_v14  ;;  %2089 = vrot.lane.b32.xlu1 %v4620_v63, %s5101_s11 }
 0x2b5   : > { %4787 = vrcp.f32 %v1206_v60  ;;  %1382 = vst [vmem:[%s5788_s24 + $0x68] sm:$0xff] %v1318_v13  ;;  %1381 = vst [vmem:[%s5788_s24 + $0x60] sm:$0xff] %v5881_v11 }
 0x2b6   : > { %v4778_v10 = vpop.eup %4777 }
 0x2b7   : > { %v4780_v27 = vpop.eup %4779  ;;  %v1221_v59 = vpop.xlane.xlu0 %1220  ;;  %v1322_v19 = vmul.f32 %v4778_v10, %v5613_v24  ;;  %v5889_v0 = vmul.f32 %v4778_v10, %v5608_v25 }
 0x2b8   : > { %v1212_v40 = vpop.xlane.xlu1 %1211  ;;  %4789 = vrcp.f32 %v1221_v59  ;;  %v1316_v42 = vmul.f32 %v4780_v27, %v5602_v20  ;;  %v1315_v9 = vmul.f32 %v4780_v27, %v5593_v52 }
 0x2b9   : > { %4791 = vrcp.f32 %v1212_v40  ;;  %1386 = vst [vmem:[%s5788_s24 + $0x88] sm:$0xff] %v1322_v19  ;;  %1385 = vst [vmem:[%s5788_s24 + $0x80] sm:$0xff] %v5889_v0 }
 0x2ba   : > { %v4782_v61 = vpop.eup %4781  ;;  %1380 = vst [vmem:[%s5788_s24 + $0x58] sm:$0xff] %v1316_v42  ;;  %v1438_v49 = vpack.c.bf16 %v1316_v42, %v5819_v5  ;;  %1379 = vst [vmem:[%s5788_s24 + $0x50] sm:$0xff] %v1315_v9  ;;  %v1437_v25 = vpack.c.bf16 %v1315_v9, %v5822_v26 }
 0x2bb   : > { %v4784_v24 = vpop.eup %4783  ;;  %v1227_v43 = vpop.xlane.xlu0 %1226  ;;  %v5901_v52 = vmul.f32 %v4782_v61, %v5629_v29  ;;  %v5904_v21 = vmul.f32 %v4782_v61, %v5624_v32 }
 0x2bc   : > { %v1218_v20 = vpop.xlane.xlu1 %1217  ;;  %4793 = vrcp.f32 %v1227_v43  ;;  %1609 = vmatprep.mubr.bf16.mxu1 %v1438_v49  ;;  %v1320_v63 = vmul.f32 %v4784_v24, %v5616_v28  ;;  %v1319_v5 = vmul.f32 %v4784_v24, %v5605_v17 }
 0x2bd   : > { %4795 = vrcp.f32 %v1218_v20  ;;  %1610 = vmatmul.mubr.bf16.gmra.mrb[8].mxu1 %v1437_v25  ;;  %1390 = vst [vmem:[%s5788_s24 + $0xa8] sm:$0xff] %v5901_v52  ;;  %1389 = vst [vmem:[%s5788_s24 + $0xa0] sm:$0xff] %v5904_v21 }
 0x2be   : > { %v4786_v26 = vpop.eup %4785  ;;  %1384 = vst [vmem:[%s5788_s24 + $0x78] sm:$0xff] %v1320_v63  ;;  %v1440_v29 = vpack.c.bf16 %v1320_v63, %v1318_v13  ;;  %1383 = vst [vmem:[%s5788_s24 + $0x70] sm:$0xff] %v1319_v5  ;;  %v1439_v59 = vpack.c.bf16 %v1319_v5, %v5881_v11 }
 0x2bf   : > { %v4788_v32 = vpop.eup %4787  ;;  %v1233_v55 = vpop.xlane.xlu0 %1232  ;;  %v5915_v28 = vmul.f32 %v4786_v26, %v5645_v58  ;;  %v5918_v17 = vmul.f32 %v4786_v26, %v5640_v15 }
 0x2c0   : > { %v1224_v14 = vpop.xlane.xlu1 %1223  ;;  %4797 = vrcp.f32 %v1233_v55  ;;  %1617 = vmatprep.mubr.bf16.mxu1 %v1440_v29  ;;  %v1324_v60 = vmul.f32 %v4788_v32, %v5632_v33  ;;  %v1323_v10 = vmul.f32 %v4788_v32, %v5619_v48 }
 0x2c1   : > { %4799 = vrcp.f32 %v1224_v14  ;;  %1394 = vst [vmem:[%s5788_s24 + $0xc8] sm:$0xff] %v5915_v28  ;;  %1393 = vst [vmem:[%s5788_s24 + $0xc0] sm:$0xff] %v5918_v17 }
 0x2c2   : > { %v4790_v13 = vpop.eup %4789  ;;  %1388 = vst [vmem:[%s5788_s24 + $0x98] sm:$0xff] %v1324_v60  ;;  %1387 = vst [vmem:[%s5788_s24 + $0x90] sm:$0xff] %v1323_v10  ;;  %v1442_v40 = vpack.c.bf16 %v1324_v60, %v1322_v19 }
 0x2c3   : > { %v4792_v58 = vpop.eup %4791  ;;  %v1239_v15 = vpop.xlane.xlu0 %1238  ;;  %v5930_v33 = vmul.f32 %v4790_v13, %v5661_v50  ;;  %v5933_v48 = vmul.f32 %v4790_v13, %v5656_v46 }
 0x2c4   : > { %v1230_v27 = vpop.xlane.xlu1 %1229  ;;  %4801 = vrcp.f32 %v1239_v15  ;;  %v1328_v42 = vmul.f32 %v4792_v58, %v5648_v8  ;;  %v5937_v9 = vmul.f32 %v4792_v58, %v5635_v38 }
 0x2c5   : > { %4803 = vrcp.f32 %v1230_v27  ;;  %1618 = vmatmul.mubr.bf16.gmra.mrb[12].mxu1 %v1439_v59  ;;  %1398 = vst [vmem:[%s5788_s24 + $0xe8] sm:$0xff] %v5930_v33  ;;  %1397 = vst [vmem:[%s5788_s24 + $0xe0] sm:$0xff] %v5933_v48 }
 0x2c6   : > { %v4794_v50 = vpop.eup %4793  ;;  %1625 = vmatprep.mubr.bf16.mxu1 %v1442_v40  ;;  %1392 = vst [vmem:[%s5788_s24 + $0xb8] sm:$0xff] %v1328_v42  ;;  %1391 = vst [vmem:[%s5788_s24 + $0xb0] sm:$0xff] %v5937_v9  ;;  %v1444_v20 = vpack.c.bf16 %v1328_v42, %v5901_v52 }
 0x2c7   : > { %v4796_v46 = vpop.eup %4795  ;;  %v1245_v8 = vpop.xlane.xlu0 %1244  ;;  %v5947_v38 = vmul.f32 %v4794_v50, %v5676_v30  ;;  %v5950_v19 = vmul.f32 %v4794_v50, %v5671_v1 }
 0x2c8   : > { %v1236_v11 = vpop.xlane.xlu1 %1235  ;;  %4805 = vrcp.f32 %v1245_v8  ;;  %v1332_v61 = vmul.f32 %v4796_v46, %v5663_v47  ;;  %v5954_v49 = vmul.f32 %v4796_v46, %v5651_v18  ;;  %v1441_v47 = vpack.c.bf16 %v1323_v10, %v5889_v0  ;;  %v7228_v8 = vld [vmem:[#allocation7_spill] sm:$0xff] }
 0x2c9   : > { %4807 = vrcp.f32 %v1236_v11  ;;  %1402 = vst [vmem:[%s5788_s24 + $0x108] sm:$0xff] %v5947_v38  ;;  %1401 = vst [vmem:[%s5788_s24 + $0x100] sm:$0xff] %v5950_v19 }
 0x2ca   : > { %v4798_v25 = vpop.eup %4797  ;;  %1396 = vst [vmem:[%s5788_s24 + $0xd8] sm:$0xff] %v1332_v61  ;;  %1395 = vst [vmem:[%s5788_s24 + $0xd0] sm:$0xff] %v5954_v49  ;;  %v1446_v60 = vpack.c.bf16 %v1332_v61, %v5915_v28  ;;  %v7229_v61 = vld [vmem:[#allocation6_spill] sm:$0xff] }
 0x2cb   : > { %v4800_v30 = vpop.eup %4799  ;;  %v1254_v1 = vpop.xlane.xlu0 %1253  ;;  %v5965_v18 = vmul.f32 %v4798_v25, %v5689_v39  ;;  %v5968_v43 = vmul.f32 %v4798_v25, %v5683_v16 }
 0x2cc   : > { %v1242_v24 = vpop.xlane.xlu1 %1241  ;;  %4809 = vrcp.f32 %v1254_v1  ;;  %v5972_v63 = vmul.f32 %v4800_v30, %v5679_v37  ;;  %v5975_v5 = vmul.f32 %v4800_v30, %v5666_v54  ;;  %v7230_v1 = vld [vmem:[#allocation8_spill] sm:$0xff] }
 0x2cd   : > { %4811 = vrcp.f32 %v1242_v24  ;;  %1626 = vmatmul.mubr.bf16.gmra.mrb[16].mxu1 %v1441_v47  ;;  %1406 = vst [vmem:[%s5788_s24 + $0x128] sm:$0xff] %v5965_v18  ;;  %1405 = vst [vmem:[%s5788_s24 + $0x120] sm:$0xff] %v5968_v43  ;;  %v7231_v47 = vld [vmem:[#allocation10_spill] sm:$0xff] }
 0x2ce   : > { %v4802_v39 = vpop.eup %4801  ;;  %1633 = vmatprep.mubr.bf16.mxu1 %v1444_v20  ;;  %1400 = vst [vmem:[%s5788_s24 + $0xf8] sm:$0xff] %v5972_v63  ;;  %1399 = vst [vmem:[%s5788_s24 + $0xf0] sm:$0xff] %v5975_v5  ;;  %v1448_v59 = vpack.c.bf16 %v5972_v63, %v5930_v33  ;;  %v7226_v33 = vld [vmem:[#allocation9_spill] sm:$0xff]  ;;  %v1447_v30 = vpack.c.bf16 %v5975_v5, %v5933_v48 }
 0x2cf   : > { %v4804_v37 = vpop.eup %4803  ;;  %v1260_v16 = vpop.xlane.xlu0 %1259  ;;  %v5986_v0 = vmul.f32 %v4802_v39, %v5706_v2  ;;  %v5989_v52 = vmul.f32 %v4802_v39, %v5699_v12 }
 0x2d0   : > { %v1248_v54 = vpop.xlane.xlu1 %1247  ;;  %4813 = vrcp.f32 %v1260_v16  ;;  %v5992_v26 = vmul.f32 %v4804_v37, %v5694_v45  ;;  %v5995_v29 = vmul.f32 %v4804_v37, %v5681_v53  ;;  %v1443_v53 = vpack.c.bf16 %v5937_v9, %v5904_v21  ;;  %v7232_v37 = vld [vmem:[#allocation14_spill] sm:$0xff] }
 0x2d1   : > { %4815 = vrcp.f32 %v1248_v54  ;;  %1410 = vst [vmem:[%s5788_s24 + $0x148] sm:$0xff] %v5986_v0  ;;  %1409 = vst [vmem:[%s5788_s24 + $0x140] sm:$0xff] %v5989_v52  ;;  %v7233_v54 = vld [vmem:[#allocation13_spill] sm:$0xff] }
 0x2d2   : > { %v4806_v32 = vpop.eup %4805  ;;  %1404 = vst [vmem:[%s5788_s24 + $0x118] sm:$0xff] %v5992_v26  ;;  %1403 = vst [vmem:[%s5788_s24 + $0x110] sm:$0xff] %v5995_v29  ;;  %v1450_v63 = vpack.c.bf16 %v5992_v26, %v5947_v38  ;;  %v1449_v48 = vpack.c.bf16 %v5995_v29, %v5950_v19 }
 0x2d3   : > { %v4808_v12 = vpop.eup %4807  ;;  %v6008_v45 = vmul.f32 %v4806_v32, %v5719_v44  ;;  %v6011_v55 = vmul.f32 %v4806_v32, %v5713_v7 }
 0x2d4   : > { %v1251_v2 = vpop.xlane.xlu1 %1250  ;;  %v1266_v14 = vpop.xlane.xlu0 %1265  ;;  %v6015_v10 = vmul.f32 %v4808_v12, %v5708_v34  ;;  %v6018_v13 = vmul.f32 %v4808_v12, %v5697_v23 }
 0x2d5   : > { %4817 = vrcp.f32 %v1251_v2  ;;  %1634 = vmatmul.mubr.bf16.gmra.mrb[20].mxu1 %v1443_v53  ;;  %1414 = vst [vmem:[%s5788_s24 + $0x168] sm:$0xff] %v6008_v45  ;;  %1413 = vst [vmem:[%s5788_s24 + $0x160] sm:$0xff] %v6011_v55 }
 0x2d6   : > { %4819 = vrcp.f32 %v1266_v14  ;;  %v4810_v7 = vpop.eup %4809  ;;  %1641 = vmatprep.mubr.bf16.mxu1 %v1446_v60  ;;  %1408 = vst [vmem:[%s5788_s24 + $0x138] sm:$0xff] %v6015_v10  ;;  %1407 = vst [vmem:[%s5788_s24 + $0x130] sm:$0xff] %v6018_v13  ;;  %v1452_v5 = vpack.c.bf16 %v6015_v10, %v5965_v18  ;;  %v1451_v38 = vpack.c.bf16 %v6018_v13, %v5968_v43 }
 0x2d7   : > { %v4812_v34 = vpop.eup %4811  ;;  %v6029_v23 = vmul.f32 %v4810_v7, %v5733_v22  ;;  %v6032_v21 = vmul.f32 %v4810_v7, %v5727_v51  ;;  %v1445_v51 = vpack.c.bf16 %v5954_v49, %v5918_v17 }
 0x2d8   : > { %v1257_v44 = vpop.xlane.xlu1 %1256  ;;  %v1348_v28 = vmul.f32 %v4812_v34, %v5723_v62  ;;  %v1347_v58 = vmul.f32 %v4812_v34, %v5710_v3  ;;  %v2184_v9 = vpop.permute.xlu0 %2183 }
 0x2d9   : > { %4821 = vrcp.f32 %v1257_v44  ;;  %1420 = vst [vmem:[%s5788_s24 + $0x198] sm:$0xff] %v6029_v23  ;;  %1419 = vst [vmem:[%s5788_s24 + $0x190] sm:$0xff] %v6032_v21 }
 0x2da   : > { %v4814_v15 = vpop.eup %4813  ;;  %1412 = vst [vmem:[%s5788_s24 + $0x158] sm:$0xff] %v1348_v28  ;;  %1411 = vst [vmem:[%s5788_s24 + $0x150] sm:$0xff] %v1347_v58  ;;  %v1454_v26 = vpack.c.bf16 %v1348_v28, %v5986_v0  ;;  %v1453_v12 = vpack.c.bf16 %v1347_v58, %v5989_v52 }
 0x2db   : > { %v4816_v22 = vpop.eup %4815  ;;  %v1360_v62 = vmul.f32 %v4814_v15, %v5745_v41  ;;  %v6046_v3 = vmul.f32 %v4814_v15, %v5739_v57 }
 0x2dc   : > { %v1263_v27 = vpop.xlane.xlu1 %1262  ;;  %v1352_v40 = vmul.f32 %v4816_v22, %v5737_v6  ;;  %v1351_v42 = vmul.f32 %v4816_v22, %v5735_v56  ;;  %v7227_v6 = vld [vmem:[#allocation5_spill] sm:$0xff]  ;;  %v2270_v56 = vsel %vm599_vm0, %v2184_v9, 0 }
 0x2dd   : > { %4823 = vrcp.f32 %v1263_v27  ;;  %1642 = vmatmul.mubr.bf16.gmra.mrb[24].mxu1 %v1445_v51  ;;  %1424 = vst [vmem:[%s5788_s24 + $0x1b8] sm:$0xff] %v1360_v62  ;;  %1423 = vst [vmem:[%s5788_s24 + $0x1b0] sm:$0xff] %v6046_v3  ;;  %v4621_v22 = vld [vmem:[%s5302_s14 + $0x40] sm:$0xff]   ;;  %v4623_v51 = vld [vmem:[%s5302_s14 + $0x48] sm:$0xff]  }
 0x2de   : > { %1649 = vmatprep.mubr.bf16.mxu1 %v1448_v59  ;;  %1416 = vst [vmem:[%s5788_s24 + $0x178] sm:$0xff] %v1352_v40  ;;  %1415 = vst [vmem:[%s5788_s24 + $0x170] sm:$0xff] %v1351_v42  ;;  %v1456_v2 = vpack.c.bf16 %v1352_v40, %v6008_v45  ;;  %v1455_v19 = vpack.c.bf16 %v1351_v42, %v6011_v55  ;;  %v4622_v27 = vld [vmem:[%s5302_s14] sm:$0xff]   ;;  %3165 = vrot.lane.b32.xlu0 %v4621_v22, %s5101_s11 }
 0x2df   : > { %v4818_v17 = vpop.eup %4817  ;;  %3149 = vrot.lane.b32.xlu1 %v4622_v27, %s5101_s11  ;;  %v4625_v42 = vld [vmem:[%s5302_s14 + $0x50] sm:$0xff]  }
 0x2e0   : > { %v4820_v57 = vpop.eup %4819  ;;  %v2200_v41 = vpop.permute.xlu1 %2199  ;;  %v1354_v50 = vmul.f32 %v4818_v17, %v7226_v33  ;;  %v1353_v46 = vmul.f32 %v4818_v17, %v7227_v6  ;;  %v4627_v6 = vld [vmem:[%s5302_s14 + $0x58] sm:$0xff]  }
 0x2e1   : > { %4480 = vmatprep.subr.msk.bf16.mxu1 %vm599_vm0, %v2200_v41  ;;  %v1364_v11 = vmul.f32 %v4820_v57, %v7228_v8  ;;  %v1363_v49 = vmul.f32 %v4820_v57, %v7229_v61  ;;  %v4626_v57 = vld [vmem:[%s5302_s14 + $0x10] sm:$0xff]  }
 0x2e2   : > { %4303 = vmatpush3.bf16.xpose.msra.mxu1 %v2270_v56  ;;  %1418 = vst [vmem:[%s5788_s24 + $0x188] sm:$0xff] %v1354_v50  ;;  %1417 = vst [vmem:[%s5788_s24 + $0x180] sm:$0xff] %v1353_v46  ;;  %v1458_v29 = vpack.c.bf16 %v6029_v23, %v1354_v50  ;;  %v1457_v43 = vpack.c.bf16 %v6032_v21, %v1353_v46  ;;  %3167 = vrot.lane.b32.xlu0 %v4623_v51, %s5101_s11  ;;  %v4628_v56 = vld [vmem:[%s5302_s14 + $0x18] sm:$0xff]  }
 0x2e3   : > { %v4822_v25 = vpop.eup %4821  ;;  %1428 = vst [vmem:[%s5788_s24 + $0x1d8] sm:$0xff] %v1364_v11  ;;  %1427 = vst [vmem:[%s5788_s24 + $0x1d0] sm:$0xff] %v1363_v49 }
 0x2e4   : > { %v1358_v24 = vmul.f32 %v4822_v25, %v7230_v1  ;;  %v1357_v20 = vmul.f32 %v4822_v25, %v7231_v47 }
 0x2e5   : > { %1650 = vmatmul.mubr.bf16.gmra.mrb[28].mxu1 %v1447_v30  ;;  %v4629_v30 = vld [vmem:[%s5302_s14 + $0x60] sm:$0xff]  }
 0x2e6   : > { %1422 = vst [vmem:[%s5788_s24 + $0x1a8] sm:$0xff] %v1358_v24  ;;  %1421 = vst [vmem:[%s5788_s24 + $0x1a0] sm:$0xff] %v1357_v20  ;;  %1657 = vmatprep.mubr.bf16.mxu1 %v1450_v63  ;;  %v1460_v53 = vpack.c.bf16 %v1360_v62, %v1358_v24  ;;  %v1459_v45 = vpack.c.bf16 %v6046_v3, %v1357_v20  ;;  %v4624_v62 = vld [vmem:[%s5302_s14 + $0x8] sm:$0xff]   ;;  %3169 = vrot.lane.b32.xlu0 %v4625_v42, %s5101_s11 }
 0x2e7   : > { %v4824_v39 = vpop.eup %4823  ;;  %3151 = vrot.lane.b32.xlu1 %v4624_v62, %s5101_s11  ;;  %v4630_v63 = vld [vmem:[%s5302_s14 + $0x20] sm:$0xff]  }
 0x2e8   : > { %v1362_v16 = vmul.f32 %v4824_v39, %v7232_v37  ;;  %v1361_v32 = vmul.f32 %v4824_v39, %v7233_v54  ;;  %v4631_v37 = vld [vmem:[%s5302_s14 + $0x68] sm:$0xff]   ;;  %v4633_v54 = vld [vmem:[%s5302_s14 + $0x70] sm:$0xff]  }
 0x2ea   : > { %1426 = vst [vmem:[%s5788_s24 + $0x1c8] sm:$0xff] %v1362_v16  ;;  %1425 = vst [vmem:[%s5788_s24 + $0x1c0] sm:$0xff] %v1361_v32  ;;  %v1462_v60 = vpack.c.bf16 %v1364_v11, %v1362_v16  ;;  %v1461_v44 = vpack.c.bf16 %v1363_v49, %v1361_v32  ;;  %3171 = vrot.lane.b32.xlu0 %v4627_v6, %s5101_s11  ;;  %v4632_v16 = vld [vmem:[%s5302_s14 + $0x28] sm:$0xff]  }
 0x2eb   : > { %3153 = vrot.lane.b32.xlu1 %v4626_v57, %s5101_s11 }
 0x2ed   : > { %1658 = vmatmul.mubr.bf16.gmra.mrb[32].mxu1 %v1449_v48 }
 0x2ee   : > { %1665 = vmatprep.mubr.bf16.mxu1 %v1452_v5  ;;  %3175 = vrot.lane.b32.xlu0 %v4631_v37, %s5101_s11 }
 0x2ef   : > { %3155 = vrot.lane.b32.xlu1 %v4628_v56, %s5101_s11 }
 0x2f3   : > { %3173 = vrot.lane.b32.xlu1 %v4629_v30, %s5101_s11 }
 0x2f5   : > { %1666 = vmatmul.mubr.bf16.gmra.mrb[36].mxu1 %v1451_v38 }
 0x2f6   : > { %1673 = vmatprep.mubr.bf16.mxu1 %v1454_v26 }
 0x2f7   : > { %3157 = vrot.lane.b32.xlu1 %v4630_v63, %s5101_s11 }
 0x2fb   : > { %3159 = vrot.lane.b32.xlu1 %v4632_v16, %s5101_s11 }
 0x2fd   : > { %1674 = vmatmul.mubr.bf16.gmra.mrb[40].mxu1 %v1453_v12 }
 0x2fe   : > { %1681 = vmatprep.mubr.bf16.mxu1 %v1456_v2 }
 0x2ff   : > { %3177 = vrot.lane.b32.xlu1 %v4633_v54, %s5101_s11 }
 0x305   : > { %1682 = vmatmul.mubr.bf16.gmra.mrb[44].mxu1 %v1455_v19 }
 0x306   : > { %1689 = vmatprep.mubr.bf16.mxu1 %v1458_v29 }
 0x309   : > { %v1272_v18 = vpop.xlane.xlu0 %1271 }
 0x30a   : > { %4825 = vrcp.f32 %v1272_v18 }
 0x30d   : > { %1690 = vmatmul.mubr.bf16.gmra.mrb[48].mxu1 %v1457_v43  ;;  %v2186_v52 = vpop.permute.xlu0 %2185 }
 0x30e   : > { %1697 = vmatprep.mubr.bf16.mxu1 %v1460_v53  ;;  %v2273_v55 = vsel %vm599_vm0, %v2186_v52, 0 }
 0x310   : > { %v1269_v0 = vpop.xlane.xlu1 %1268 }
 0x311   : > { %4827 = vrcp.f32 %v1269_v0  ;;  %v2060_v58 = vpop.permute.xlu0 %2059 }
 0x314   : > { %v4826_v14 = vpop.eup %4825  ;;  %v2202_v10 = vpop.permute.xlu1 %2201 }
 0x315   : > { %1698 = vmatmul.mubr.bf16.gmra.mrb[52].mxu1 %v1459_v45  ;;  %4481 = vmatprep.subr.msk.bf16.mxu1 %vm599_vm0, %v2202_v10  ;;  %v1368_v13 = vmul.f32 %v4826_v14, %v5800_v36  ;;  %v1367_v7 = vmul.f32 %v4826_v14, %v5796_v35 }
 0x316   : > { %1705 = vmatprep.mubr.bf16.mxu1 %v1462_v60  ;;  %4305 = vmatpush3.bf16.xpose.msra.mxu1 %v2273_v55 }
 0x317   : > { %1432 = vst [vmem:[%s5788_s24 + $0x1f8] sm:$0xff] %v1368_v13  ;;  %1431 = vst [vmem:[%s5788_s24 + $0x1f0] sm:$0xff] %v1367_v7 }
 0x318   : > { %v2062_v35 = vpop.permute.xlu1 %2061 }
 0x31b   : > { %v4828_v34 = vpop.eup %4827 }
 0x31c   : > { %v1366_v23 = vmul.f32 %v4828_v34, %v5816_v31  ;;  %v1365_v21 = vmul.f32 %v4828_v34, %v5812_v4  ;;  %v2064_v4 = vpop.permute.xlu0 %2063  ;;  %v2066_v31 = vpop.permute.xlu1 %2065 }
 0x31d   : > { %1706 = vmatmul.mubr.bf16.gmra.mrb[56].mxu1 %v1461_v44 }
 0x31e   : > { %1430 = vst [vmem:[%s5788_s24 + $0x1e8] sm:$0xff] %v1366_v23  ;;  %v1464_v28 = vpack.c.bf16 %v1368_v13, %v1366_v23  ;;  %1429 = vst [vmem:[%s5788_s24 + $0x1e0] sm:$0xff] %v1365_v21  ;;  %v1463_v36 = vpack.c.bf16 %v1367_v7, %v1365_v21 }
 0x320   : > { %1713 = vmatprep.mubr.bf16.mxu1 %v1464_v28  ;;  %v2068_v15 = vpop.permute.xlu0 %2067  ;;  %v2070_v40 = vpop.permute.xlu1 %2069 }
 0x324   : > { %v2072_v61 = vpop.permute.xlu0 %2071  ;;  %v2074_v39 = vpop.permute.xlu1 %2073 }
 0x325   : > { %1714 = vmatmul.mubr.bf16.gmra.mrb[60].mxu1 %v1463_v36 }
 0x326   : > { %4306 = vmatprep.mubr.msk.bf16.mxu1 %vm599_vm0, %v2060_v58 }
 0x328   : > { %v2076_v32 = vpop.permute.xlu0 %2075  ;;  %v2078_v48 = vpop.permute.xlu1 %2077 }
 0x32c   : > { %v2080_v5 = vpop.permute.xlu0 %2079  ;;  %v2082_v38 = vpop.permute.xlu1 %2081 }
 0x32d   : > { %4307 = vmatmul.mubr.msk.bf16.vlgmr.msra.gmra.mrb[64].mxu1 %vm599_vm0, %v2060_v58 }
 0x32e   : > { %4308 = vmatprep.mubr.msk.bf16.mxu1 %vm599_vm0, %v2062_v35 }
 0x330   : > { %v2084_v26 = vpop.permute.xlu0 %2083  ;;  %v2086_v12 = vpop.permute.xlu1 %2085 }
 0x334   : > { %v2088_v53 = vpop.permute.xlu0 %2087  ;;  %v2090_v7 = vpop.permute.xlu1 %2089 }
 0x335   : > { %4309 = vmatmul.mubr.msk.bf16.gmra.mrb[68].mxu1 %vm599_vm0, %v2062_v35 }
 0x336   : > { %4310 = vmatprep.mubr.msk.bf16.mxu1 %vm599_vm0, %v2064_v4 }
 0x33d   : > { %4311 = vmatmul.mubr.msk.bf16.gmra.mrb[72].mxu1 %vm599_vm0, %v2064_v4 }
 0x33e   : > { %4312 = vmatprep.mubr.msk.bf16.mxu1 %vm599_vm0, %v2066_v31 }
 0x345   : > { %4313 = vmatmul.mubr.msk.bf16.gmra.mrb[76].mxu1 %vm599_vm0, %v2066_v31 }
 0x346   : > { %4314 = vmatprep.mubr.msk.bf16.mxu1 %vm599_vm0, %v2068_v15 }
 0x34a   : > { %v4194_v3 = vpop.f32.mrb[0].mxu1 }
 0x34b   : > { %v4195_v59 = vpop.f32.mrb[1].mxu1 }
 0x34c   : > { %v4196_v9 = vadd.f32 %v4195_v59, %v4194_v3  ;;  %v4197_v17 = vpop.f32.mrb[2].mxu1 }
 0x34d   : > { %4315 = vmatmul.mubr.msk.bf16.gmra.mrb[80].mxu1 %vm599_vm0, %v2068_v15  ;;  %v4198_v41 = vpop.f32.mrb[3].mxu1 }
 0x34e   : > { %v4065_v33 = vpack.c.bf16 %v4196_v9, %v4196_v9  ;;  %v4199_v50 = vadd.f32 %v4198_v41, %v4197_v17  ;;  %4316 = vmatprep.mubr.msk.bf16.mxu1 %vm599_vm0, %v2070_v40 }
 0x350   : > { %1851 = vst.msk [vmem:[%s6125_s5] sm:$0xf] %vm1850_vm1, %v4065_v33  ;;  %v4066_v46 = vpack.c.bf16 %v4199_v50, %v4199_v50  ;;  %v3166_v56 = vpop.permute.xlu0 %3165 }
 0x351   : > { %4338 = vmatprep.subr.bf16.mxu0 %v3166_v56  ;;  %4450 = vmatprep.subr.bf16.mxu1 %v3166_v56 }
 0x352   : > { %1852 = vst.msk [vmem:[%s6125_s5 + $0x4] sm:$0xf] %vm1850_vm1, %v4066_v46  ;;  %v4200_v8 = vpop.f32.mrb[4].mxu1 }
 0x353   : > { %v4201_v11 = vpop.f32.mrb[5].mxu1 }
 0x354   : > { %v4202_v49 = vadd.f32 %v4201_v11, %v4200_v8  ;;  %v4203_v25 = vpop.f32.mrb[6].mxu1  ;;  %v3150_v11 = vpop.permute.xlu1 %3149 }
 0x355   : > { %4317 = vmatmul.mubr.msk.bf16.gmra.mrb[84].mxu1 %vm599_vm0, %v2070_v40  ;;  %v4204_v1 = vpop.f32.mrb[7].mxu1  ;;  %4339 = vmatpush3.bf16.msra.mxu0 %v3150_v11 }
 0x356   : > { %v4067_v24 = vpack.c.bf16 %v4202_v49, %v4202_v49  ;;  %v4205_v47 = vadd.f32 %v4204_v1, %v4203_v25  ;;  %4318 = vmatprep.mubr.msk.bf16.mxu1 %vm599_vm0, %v2072_v61  ;;  %4458 = vmatpush3.bf16.msra.mxu1 %v3150_v11  ;;  %v3168_v1 = vpop.permute.xlu0 %3167 }
 0x357   : > { %4340 = vmatprep.subr.bf16.mxu0 %v3168_v1  ;;  %4451 = vmatprep.subr.bf16.mxu1 %v3168_v1 }
 0x358   : > { %1853 = vst.msk [vmem:[%s6125_s5 + $0x8] sm:$0xf] %vm1850_vm1, %v4067_v24  ;;  %v4068_v20 = vpack.c.bf16 %v4205_v47, %v4205_v47 }
 0x35a   : > { %1854 = vst.msk [vmem:[%s6125_s5 + $0xc] sm:$0xf] %vm1850_vm1, %v4068_v20  ;;  %v3152_v20 = vpop.permute.xlu1 %3151 }
 0x35b   : > { %4341 = vmatpush3.bf16.msra.mxu0 %v3152_v20  ;;  %4459 = vmatpush3.bf16.msra.mxu1 %v3152_v20 }
 0x35d   : > { %4319 = vmatmul.mubr.msk.bf16.gmra.mrb[88].mxu1 %vm599_vm0, %v2072_v61 }
 0x35e   : > { %4320 = vmatprep.mubr.msk.bf16.mxu1 %vm599_vm0, %v2074_v39  ;;  %v3154_v16 = vpop.permute.xlu1 %3153 }
 0x365   : > { %4321 = vmatmul.mubr.msk.bf16.gmra.mrb[92].mxu1 %vm599_vm0, %v2074_v39  ;;  %v3170_v39 = vpop.permute.xlu0 %3169 }
 0x366   : > { %4322 = vmatprep.mubr.msk.bf16.mxu1 %vm599_vm0, %v2076_v32  ;;  %4342 = vmatprep.subr.bf16.mxu0 %v3170_v39 }
 0x367   : > { %4452 = vmatprep.subr.bf16.mxu1 %v3170_v39  ;;  %4343 = vmatpush3.bf16.msra.mxu0 %v3154_v16 }
 0x368   : > { %4460 = vmatpush3.bf16.msra.mxu1 %v3154_v16 }
 0x36d   : > { %4323 = vmatmul.mubr.msk.bf16.gmra.mrb[96].mxu1 %vm599_vm0, %v2076_v32 }
 0x36e   : > { %4324 = vmatprep.mubr.msk.bf16.mxu1 %vm599_vm0, %v2078_v48 }
 0x375   : > { %4325 = vmatmul.mubr.msk.bf16.gmra.mrb[100].mxu1 %vm599_vm0, %v2078_v48 }
 0x376   : > { %4326 = vmatprep.mubr.msk.bf16.mxu1 %vm599_vm0, %v2080_v5 }
 0x37d   : > { %4327 = vmatmul.mubr.msk.bf16.gmra.mrb[104].mxu1 %vm599_vm0, %v2080_v5 }
 0x37e   : > { %4328 = vmatprep.mubr.msk.bf16.mxu1 %vm599_vm0, %v2082_v38 }
 0x385   : > { %4329 = vmatmul.mubr.msk.bf16.gmra.mrb[108].mxu1 %vm599_vm0, %v2082_v38  ;;  %v3172_v38 = vpop.permute.xlu0 %3171 }
 0x386   : > { %4330 = vmatprep.mubr.msk.bf16.mxu1 %vm599_vm0, %v2084_v26  ;;  %4344 = vmatprep.subr.bf16.mxu0 %v3172_v38 }
 0x387   : > { %4453 = vmatprep.subr.bf16.mxu1 %v3172_v38 }
 0x38d   : > { %4331 = vmatmul.mubr.msk.bf16.gmra.mrb[112].mxu1 %vm599_vm0, %v2084_v26 }
 0x38e   : > { %4332 = vmatprep.mubr.msk.bf16.mxu1 %vm599_vm0, %v2086_v12 }
 0x390   : > { %v4206_v2 = vpop.f32.mrb[8].mxu1 }
 0x391   : > { %v4207_v19 = vpop.f32.mrb[9].mxu1 }
 0x392   : > { %v4208_v29 = vadd.f32 %v4207_v19, %v4206_v2  ;;  %v4209_v18 = vpop.f32.mrb[10].mxu1  ;;  %v3156_v2 = vpop.permute.xlu1 %3155 }
 0x393   : > { %v4210_v43 = vpop.f32.mrb[11].mxu1  ;;  %4345 = vmatpush3.bf16.msra.mxu0 %v3156_v2  ;;  %4461 = vmatpush3.bf16.msra.mxu1 %v3156_v2 }
 0x394   : > { %v4069_v0 = vpack.c.bf16 %v4208_v29, %v4208_v29  ;;  %v4211_v52 = vadd.f32 %v4210_v43, %v4209_v18 }
 0x395   : > { %4333 = vmatmul.mubr.msk.bf16.gmra.mrb[116].mxu1 %vm599_vm0, %v2086_v12 }
 0x396   : > { %1855 = vst.msk [vmem:[%s6125_s5 + $0x10] sm:$0xf] %vm1850_vm1, %v4069_v0  ;;  %v4070_v45 = vpack.c.bf16 %v4211_v52, %v4211_v52  ;;  %4334 = vmatprep.mubr.msk.bf16.mxu1 %vm599_vm0, %v2088_v53  ;;  %v3174_v18 = vpop.permute.xlu1 %3173 }
 0x397   : > { %4346 = vmatprep.subr.bf16.mxu0 %v3174_v18  ;;  %4454 = vmatprep.subr.bf16.mxu1 %v3174_v18 }
 0x398   : > { %1856 = vst.msk [vmem:[%s6125_s5 + $0x14] sm:$0xf] %vm1850_vm1, %v4070_v45  ;;  %v4212_v55 = vpop.f32.mrb[12].mxu1 }
 0x399   : > { %v4213_v14 = vpop.f32.mrb[13].mxu1 }
 0x39a   : > { %v4214_v60 = vadd.f32 %v4213_v14, %v4212_v55  ;;  %v4215_v10 = vpop.f32.mrb[14].mxu1  ;;  %v3158_v14 = vpop.permute.xlu1 %3157 }
 0x39b   : > { %v4216_v13 = vpop.f32.mrb[15].mxu1  ;;  %4347 = vmatpush3.bf16.msra.mxu0 %v3158_v14  ;;  %4462 = vmatpush3.bf16.msra.mxu1 %v3158_v14 }
 0x39c   : > { %v4071_v34 = vpack.c.bf16 %v4214_v60, %v4214_v60  ;;  %v4217_v44 = vadd.f32 %v4216_v13, %v4215_v10  ;;  %v3176_v10 = vpop.permute.xlu0 %3175 }
 0x39d   : > { %4335 = vmatmul.mubr.msk.bf16.gmra.mrb[120].mxu1 %vm599_vm0, %v2088_v53  ;;  %4348 = vmatprep.subr.bf16.mxu0 %v3176_v10 }
 0x39e   : > { %1857 = vst.msk [vmem:[%s6125_s5 + $0x18] sm:$0xf] %vm1850_vm1, %v4071_v34  ;;  %v4072_v23 = vpack.c.bf16 %v4217_v44, %v4217_v44  ;;  %4336 = vmatprep.mubr.msk.bf16.mxu1 %vm599_vm0, %v2090_v7  ;;  %4455 = vmatprep.subr.bf16.mxu1 %v3176_v10 }
 0x3a0   : > { %1858 = vst.msk [vmem:[%s6125_s5 + $0x1c] sm:$0xf] %vm1850_vm1, %v4072_v23  ;;  %v4218_v21 = vpop.f32.mrb[16].mxu1 }
 0x3a1   : > { %v4219_v28 = vpop.f32.mrb[17].mxu1 }
 0x3a2   : > { %v4220_v36 = vadd.f32 %v4219_v28, %v4218_v21  ;;  %v4221_v58 = vpop.f32.mrb[18].mxu1 }
 0x3a3   : > { %v4222_v35 = vpop.f32.mrb[19].mxu1 }
 0x3a4   : > { %v4073_v4 = vpack.c.bf16 %v4220_v36, %v4220_v36  ;;  %v4223_v31 = vadd.f32 %v4222_v35, %v4221_v58 }
 0x3a5   : > { %4337 = vmatmul.mubr.msk.bf16.gmra.mrb[124].mxu1 %vm599_vm0, %v2090_v7  ;;  %v3160_v7 = vpop.permute.xlu1 %3159 }
 0x3a6   : > { %1859 = vst.msk [vmem:[%s6125_s5 + $0x20] sm:$0xf] %vm1850_vm1, %v4073_v4  ;;  %v4074_v15 = vpack.c.bf16 %v4223_v31, %v4223_v31  ;;  %4349 = vmatpush3.bf16.msra.mxu0 %v3160_v7  ;;  %4463 = vmatpush3.bf16.msra.mxu1 %v3160_v7 }
 0x3a8   : > { %1860 = vst.msk [vmem:[%s6125_s5 + $0x24] sm:$0xf] %vm1850_vm1, %v4074_v15  ;;  %v4224_v22 = vpop.f32.mrb[20].mxu1 }
 0x3a9   : > { %v4225_v27 = vpop.f32.mrb[21].mxu1  ;;  %v3178_v58 = vpop.permute.xlu1 %3177 }
 0x3aa   : > { %v4226_v51 = vadd.f32 %v4225_v27, %v4224_v22  ;;  %v4227_v62 = vpop.f32.mrb[22].mxu1  ;;  %4350 = vmatprep.subr.bf16.mxu0 %v3178_v58  ;;  %4456 = vmatprep.subr.bf16.mxu1 %v3178_v58 }
 0x3ab   : > { %v4228_v3 = vpop.f32.mrb[23].mxu1 }
 0x3ac   : > { %v4075_v59 = vpack.c.bf16 %v4226_v51, %v4226_v51  ;;  %v4229_v40 = vadd.f32 %v4228_v3, %v4227_v62 }
 0x3ae   : > { %1861 = vst.msk [vmem:[%s6125_s5 + $0x28] sm:$0xf] %vm1850_vm1, %v4075_v59  ;;  %v4076_v42 = vpack.c.bf16 %v4229_v40, %v4229_v40 }
 0x3b0   : > { %1862 = vst.msk [vmem:[%s6125_s5 + $0x2c] sm:$0xf] %vm1850_vm1, %v4076_v42  ;;  %v4230_v9 = vpop.f32.mrb[24].mxu1 }
 0x3b1   : > { %v4231_v17 = vpop.f32.mrb[25].mxu1 }
 0x3b2   : > { %v4232_v57 = vadd.f32 %v4231_v17, %v4230_v9  ;;  %v4233_v41 = vpop.f32.mrb[26].mxu1 }
 0x3b3   : > { %v4234_v33 = vpop.f32.mrb[27].mxu1 }
 0x3b4   : > { %v4077_v50 = vpack.c.bf16 %v4232_v57, %v4232_v57  ;;  %v4235_v6 = vadd.f32 %v4234_v33, %v4233_v41 }
 0x3b6   : > { %1863 = vst.msk [vmem:[%s6125_s5 + $0x30] sm:$0xf] %vm1850_vm1, %v4077_v50  ;;  %v4078_v46 = vpack.c.bf16 %v4235_v6, %v4235_v6 }
 0x3b8   : > { %1864 = vst.msk [vmem:[%s6125_s5 + $0x34] sm:$0xf] %vm1850_vm1, %v4078_v46  ;;  %v4236_v8 = vpop.f32.mrb[28].mxu1 }
 0x3b9   : > { %v4237_v61 = vpop.f32.mrb[29].mxu1 }
 0x3ba   : > { %v4238_v49 = vadd.f32 %v4237_v61, %v4236_v8  ;;  %v4239_v25 = vpop.f32.mrb[30].mxu1 }
 0x3bb   : > { %v4240_v30 = vpop.f32.mrb[31].mxu1 }
 0x3bc   : > { %v4079_v24 = vpack.c.bf16 %v4238_v49, %v4238_v49  ;;  %v4241_v47 = vadd.f32 %v4240_v30, %v4239_v25 }
 0x3be   : > { %1865 = vst.msk [vmem:[%s6125_s5 + $0x38] sm:$0xf] %vm1850_vm1, %v4079_v24  ;;  %v4080_v63 = vpack.c.bf16 %v4241_v47, %v4241_v47 }
 0x3c0   : > { %1866 = vst.msk [vmem:[%s6125_s5 + $0x3c] sm:$0xf] %vm1850_vm1, %v4080_v63  ;;  %v4242_v37 = vpop.f32.mrb[32].mxu1 }
 0x3c1   : > { %v4243_v54 = vpop.f32.mrb[33].mxu1 }
 0x3c2   : > { %v4244_v32 = vadd.f32 %v4243_v54, %v4242_v37  ;;  %v4245_v48 = vpop.f32.mrb[34].mxu1 }
 0x3c3   : > { %v4246_v5 = vpop.f32.mrb[35].mxu1 }
 0x3c4   : > { %v4081_v26 = vpack.c.bf16 %v4244_v32, %v4244_v32  ;;  %v4247_v12 = vadd.f32 %v4246_v5, %v4245_v48 }
 0x3c6   : > { %1867 = vst.msk [vmem:[%s6125_s5 + $0x40] sm:$0xf] %vm1850_vm1, %v4081_v26  ;;  %v4082_v19 = vpack.c.bf16 %v4247_v12, %v4247_v12 }
 0x3c8   : > { %1868 = vst.msk [vmem:[%s6125_s5 + $0x44] sm:$0xf] %vm1850_vm1, %v4082_v19  ;;  %v4248_v29 = vpop.f32.mrb[36].mxu1 }
 0x3c9   : > { %v4249_v43 = vpop.f32.mrb[37].mxu1 }
 0x3ca   : > { %v4250_v53 = vadd.f32 %v4249_v43, %v4248_v29  ;;  %v4251_v0 = vpop.f32.mrb[38].mxu1 }
 0x3cb   : > { %v4252_v52 = vpop.f32.mrb[39].mxu1 }
 0x3cc   : > { %v4083_v45 = vpack.c.bf16 %v4250_v53, %v4250_v53  ;;  %v4253_v55 = vadd.f32 %v4252_v52, %v4251_v0 }
 0x3ce   : > { %1869 = vst.msk [vmem:[%s6125_s5 + $0x48] sm:$0xf] %vm1850_vm1, %v4083_v45  ;;  %v4084_v60 = vpack.c.bf16 %v4253_v55, %v4253_v55 }
 0x3d0   : > { %1870 = vst.msk [vmem:[%s6125_s5 + $0x4c] sm:$0xf] %vm1850_vm1, %v4084_v60  ;;  %v4254_v13 = vpop.f32.mrb[40].mxu1 }
 0x3d1   : > { %v4255_v34 = vpop.f32.mrb[41].mxu1 }
 0x3d2   : > { %v4256_v44 = vadd.f32 %v4255_v34, %v4254_v13  ;;  %v4257_v23 = vpop.f32.mrb[42].mxu1  ;;  %v4634_v34 = vld [vmem:[%s5302_s14 + $0x30] sm:$0xff]  }
 0x3d3   : > { %v4258_v21 = vpop.f32.mrb[43].mxu1 }
 0x3d4   : > { %v4085_v28 = vpack.c.bf16 %v4256_v44, %v4256_v44  ;;  %v4259_v36 = vadd.f32 %v4258_v21, %v4257_v23 }
 0x3d6   : > { %1871 = vst.msk [vmem:[%s6125_s5 + $0x50] sm:$0xf] %vm1850_vm1, %v4085_v28  ;;  %v4086_v35 = vpack.c.bf16 %v4259_v36, %v4259_v36 }
 0x3d8   : > { %1872 = vst.msk [vmem:[%s6125_s5 + $0x54] sm:$0xf] %vm1850_vm1, %v4086_v35  ;;  %v4260_v4 = vpop.f32.mrb[44].mxu1 }
 0x3d9   : > { %v4261_v31 = vpop.f32.mrb[45].mxu1 }
 0x3da   : > { %v4262_v15 = vadd.f32 %v4261_v31, %v4260_v4  ;;  %v4263_v22 = vpop.f32.mrb[46].mxu1 }
 0x3db   : > { %v4264_v27 = vpop.f32.mrb[47].mxu1 }
 0x3dc   : > { %v4087_v51 = vpack.c.bf16 %v4262_v15, %v4262_v15  ;;  %v4265_v62 = vadd.f32 %v4264_v27, %v4263_v22 }
 0x3de   : > { %1873 = vst.msk [vmem:[%s6125_s5 + $0x58] sm:$0xf] %vm1850_vm1, %v4087_v51  ;;  %v4088_v3 = vpack.c.bf16 %v4265_v62, %v4265_v62 }
 0x3e0   : > { %1874 = vst.msk [vmem:[%s6125_s5 + $0x5c] sm:$0xf] %vm1850_vm1, %v4088_v3  ;;  %v4266_v59 = vpop.f32.mrb[48].mxu1 }
 0x3e1   : > { %v4267_v40 = vpop.f32.mrb[49].mxu1 }
 0x3e2   : > { %v4268_v42 = vadd.f32 %v4267_v40, %v4266_v59  ;;  %v4269_v9 = vpop.f32.mrb[50].mxu1 }
 0x3e3   : > { %v4270_v17 = vpop.f32.mrb[51].mxu1 }
 0x3e4   : > { %v4089_v57 = vpack.c.bf16 %v4268_v42, %v4268_v42  ;;  %v4271_v41 = vadd.f32 %v4270_v17, %v4269_v9 }
 0x3e6   : > { %1875 = vst.msk [vmem:[%s6125_s5 + $0x60] sm:$0xf] %vm1850_vm1, %v4089_v57  ;;  %v4090_v33 = vpack.c.bf16 %v4271_v41, %v4271_v41 }
 0x3e8   : > { %1876 = vst.msk [vmem:[%s6125_s5 + $0x64] sm:$0xf] %vm1850_vm1, %v4090_v33  ;;  %v4272_v50 = vpop.f32.mrb[52].mxu1 }
 0x3e9   : > { %v4273_v6 = vpop.f32.mrb[53].mxu1 }
 0x3ea   : > { %v4274_v46 = vadd.f32 %v4273_v6, %v4272_v50  ;;  %v4275_v56 = vpop.f32.mrb[54].mxu1 }
 0x3eb   : > { %v4276_v8 = vpop.f32.mrb[55].mxu1 }
 0x3ec   : > { %v4091_v11 = vpack.c.bf16 %v4274_v46, %v4274_v46  ;;  %v4277_v61 = vadd.f32 %v4276_v8, %v4275_v56 }
 0x3ee   : > { %1877 = vst.msk [vmem:[%s6125_s5 + $0x68] sm:$0xf] %vm1850_vm1, %v4091_v11  ;;  %v4092_v49 = vpack.c.bf16 %v4277_v61, %v4277_v61 }
 0x3f0   : > { %1878 = vst.msk [vmem:[%s6125_s5 + $0x6c] sm:$0xf] %vm1850_vm1, %v4092_v49  ;;  %v4278_v25 = vpop.f32.mrb[56].mxu1 }
 0x3f1   : > { %v4279_v30 = vpop.f32.mrb[57].mxu1 }
 0x3f2   : > { %v4280_v1 = vadd.f32 %v4279_v30, %v4278_v25  ;;  %v4281_v24 = vpop.f32.mrb[58].mxu1 }
 0x3f3   : > { %v4282_v47 = vpop.f32.mrb[59].mxu1 }
 0x3f4   : > { %v4093_v20 = vpack.c.bf16 %v4280_v1, %v4280_v1  ;;  %v4283_v63 = vadd.f32 %v4282_v47, %v4281_v24 }
 0x3f6   : > { %1879 = vst.msk [vmem:[%s6125_s5 + $0x70] sm:$0xf] %vm1850_vm1, %v4093_v20  ;;  %v4094_v39 = vpack.c.bf16 %v4283_v63, %v4283_v63 }
 0x3f8   : > { %1880 = vst.msk [vmem:[%s6125_s5 + $0x74] sm:$0xf] %vm1850_vm1, %v4094_v39  ;;  %v4284_v37 = vpop.f32.mrb[60].mxu1 }
 0x3f9   : > { %v4285_v16 = vpop.f32.mrb[61].mxu1 }
 0x3fa   : > { %v4286_v54 = vadd.f32 %v4285_v16, %v4284_v37  ;;  %v4287_v32 = vpop.f32.mrb[62].mxu1 }
 0x3fb   : > { %v4288_v48 = vpop.f32.mrb[63].mxu1 }
 0x3fc   : > { %v4095_v5 = vpack.c.bf16 %v4286_v54, %v4286_v54  ;;  %v4289_v38 = vadd.f32 %v4288_v48, %v4287_v32 }
 0x3fe   : > { %1881 = vst.msk [vmem:[%s6125_s5 + $0x78] sm:$0xf] %vm1850_vm1, %v4095_v5  ;;  %v4096_v26 = vpack.c.bf16 %v4289_v38, %v4289_v38 }
 0x400   : > { %1882 = vst.msk [vmem:[%s6125_s5 + $0x7c] sm:$0xf] %vm1850_vm1, %v4096_v26  ;;  %v6230_v12 = vpop.f32.mrb[64].mxu1 }
 0x401   : > { %v6232_v2 = vpop.f32.mrb[65].mxu1 }
 0x402   : > { %v2492_v19 = vmax.f32 %v6230_v12, %v6232_v2  ;;  %v6236_v29 = vpop.f32.mrb[66].mxu1 }
 0x403   : > { %v6238_v18 = vpop.f32.mrb[67].mxu1 }
 0x404   : > { %v2495_v43 = vmax.f32 %v6236_v29, %v6238_v18  ;;  %2493 = vmax.xlane.f32.xlu0 %v2492_v19 }
 0x406   : > { %2496 = vmax.xlane.f32.xlu1 %v2495_v43 }
 0x408   : > { %v6242_v53 = vpop.f32.mrb[68].mxu1 }
 0x409   : > { %v6244_v0 = vpop.f32.mrb[69].mxu1 }
 0x40a   : > { %v2498_v52 = vmax.f32 %v6242_v53, %v6244_v0  ;;  %v6248_v45 = vpop.f32.mrb[70].mxu1 }
 0x40b   : > { %v6250_v55 = vpop.f32.mrb[71].mxu1 }
 0x40c   : > { %2499 = vmax.xlane.f32.xlu0 %v2498_v52  ;;  %v2501_v14 = vmax.f32 %v6248_v45, %v6250_v55 }
 0x410   : > { %2502 = vmax.xlane.f32.xlu0 %v2501_v14  ;;  %v6254_v60 = vpop.f32.mrb[72].mxu1 }
 0x411   : > { %v6256_v10 = vpop.f32.mrb[73].mxu1 }
 0x412   : > { %v2504_v13 = vmax.f32 %v6254_v60, %v6256_v10  ;;  %v6260_v7 = vpop.f32.mrb[74].mxu1 }
 0x413   : > { %v6263_v44 = vpop.f32.mrb[75].mxu1 }
 0x414   : > { %2505 = vmax.xlane.f32.xlu0 %v2504_v13  ;;  %v2507_v23 = vmax.f32 %v6260_v7, %v6263_v44 }
 0x417   : > { %3161 = vrot.lane.b32.xlu1 %v4634_v34, %s5101_s11 }
 0x418   : > { %v6268_v21 = vpop.f32.mrb[76].mxu1 }
 0x419   : > { %v6270_v28 = vpop.f32.mrb[77].mxu1 }
 0x41a   : > { %v2510_v36 = vmax.f32 %v6268_v21, %v6270_v28  ;;  %v6274_v58 = vpop.f32.mrb[78].mxu1 }
 0x41b   : > { %v6276_v35 = vpop.f32.mrb[79].mxu1 }
 0x41c   : > { %2511 = vmax.xlane.f32.xlu0 %v2510_v36  ;;  %v2513_v4 = vmax.f32 %v6274_v58, %v6276_v35 }
 0x420   : > { %v6280_v31 = vpop.f32.mrb[80].mxu1 }
 0x421   : > { %v6282_v15 = vpop.f32.mrb[81].mxu1 }
 0x422   : > { %v2516_v22 = vmax.f32 %v6280_v31, %v6282_v15  ;;  %v6286_v27 = vpop.f32.mrb[82].mxu1 }
 0x423   : > { %v6288_v51 = vpop.f32.mrb[83].mxu1 }
 0x424   : > { %2517 = vmax.xlane.f32.xlu0 %v2516_v22  ;;  %v2519_v62 = vmax.f32 %v6286_v27, %v6288_v51 }
 0x428   : > { %v6292_v3 = vpop.f32.mrb[84].mxu1 }
 0x429   : > { %v6294_v59 = vpop.f32.mrb[85].mxu1 }
 0x42a   : > { %v2522_v40 = vmax.f32 %v6292_v3, %v6294_v59  ;;  %v6298_v42 = vpop.f32.mrb[86].mxu1 }
 0x42b   : > { %v6300_v9 = vpop.f32.mrb[87].mxu1 }
 0x42c   : > { %2523 = vmax.xlane.f32.xlu0 %v2522_v40  ;;  %v2525_v17 = vmax.f32 %v6298_v42, %v6300_v9 }
 0x430   : > { %v6304_v57 = vpop.f32.mrb[88].mxu1 }
 0x431   : > { %v6306_v41 = vpop.f32.mrb[89].mxu1 }
 0x432   : > { %v2528_v33 = vmax.f32 %v6304_v57, %v6306_v41  ;;  %v6310_v50 = vpop.f32.mrb[90].mxu1 }
 0x433   : > { %v6312_v6 = vpop.f32.mrb[91].mxu1 }
 0x434   : > { %2529 = vmax.xlane.f32.xlu0 %v2528_v33  ;;  %v2531_v46 = vmax.f32 %v6310_v50, %v6312_v6 }
 0x438   : > { %v6316_v56 = vpop.f32.mrb[92].mxu1 }
 0x439   : > { %v6318_v8 = vpop.f32.mrb[93].mxu1 }
 0x43a   : > { %v2534_v11 = vmax.f32 %v6316_v56, %v6318_v8  ;;  %v6322_v61 = vpop.f32.mrb[94].mxu1 }
 0x43b   : > { %2508 = vmax.xlane.f32.xlu1 %v2507_v23  ;;  %v6324_v49 = vpop.f32.mrb[95].mxu1 }
 0x43c   : > { %2535 = vmax.xlane.f32.xlu0 %v2534_v11  ;;  %v2537_v25 = vmax.f32 %v6322_v61, %v6324_v49 }
 0x43f   : > { %2514 = vmax.xlane.f32.xlu1 %v2513_v4 }
 0x440   : > { %v6328_v30 = vpop.f32.mrb[96].mxu1 }
 0x441   : > { %v6330_v1 = vpop.f32.mrb[97].mxu1 }
 0x442   : > { %v2540_v24 = vmax.f32 %v6328_v30, %v6330_v1  ;;  %v6334_v47 = vpop.f32.mrb[98].mxu1 }
 0x443   : > { %2520 = vmax.xlane.f32.xlu1 %v2519_v62  ;;  %v6336_v20 = vpop.f32.mrb[99].mxu1 }
 0x444   : > { %2541 = vmax.xlane.f32.xlu0 %v2540_v24  ;;  %v2543_v63 = vmax.f32 %v6334_v47, %v6336_v20 }
 0x447   : > { %2526 = vmax.xlane.f32.xlu1 %v2525_v17 }
 0x448   : > { %v6340_v39 = vpop.f32.mrb[100].mxu1 }
 0x449   : > { %v6342_v37 = vpop.f32.mrb[101].mxu1 }
 0x44a   : > { %7234 = vst [vmem:[#allocation11_spill] sm:$0xff] %v6342_v37  ;;  %v2546_v16 = vmax.f32 %v6340_v39, %v6342_v37  ;;  %v6346_v54 = vpop.f32.mrb[102].mxu1 }
 0x44b   : > { %2532 = vmax.xlane.f32.xlu1 %v2531_v46  ;;  %v6348_v32 = vpop.f32.mrb[103].mxu1 }
 0x44c   : > { %2547 = vmax.xlane.f32.xlu0 %v2546_v16  ;;  %v2549_v48 = vmax.f32 %v6346_v54, %v6348_v32 }
 0x44f   : > { %2538 = vmax.xlane.f32.xlu1 %v2537_v25 }
 0x450   : > { %v6352_v5 = vpop.f32.mrb[104].mxu1 }
 0x451   : > { %7235 = vst [vmem:[#allocation12_spill] sm:$0xff] %v6352_v5  ;;  %v6354_v38 = vpop.f32.mrb[105].mxu1 }
 0x452   : > { %7236 = vst [vmem:[#allocation18_spill] sm:$0xff] %v6354_v38  ;;  %v2552_v26 = vmax.f32 %v6352_v5, %v6354_v38  ;;  %v6358_v19 = vpop.f32.mrb[106].mxu1 }
 0x453   : > { %2544 = vmax.xlane.f32.xlu1 %v2543_v63  ;;  %v6360_v43 = vpop.f32.mrb[107].mxu1 }
 0x454   : > { %2553 = vmax.xlane.f32.xlu0 %v2552_v26  ;;  %v2555_v52 = vmax.f32 %v6358_v19, %v6360_v43 }
 0x457   : > { %2550 = vmax.xlane.f32.xlu1 %v2549_v48 }
 0x458   : > { %v6364_v14 = vpop.f32.mrb[108].mxu1 }
 0x459   : > { %7237 = vst [vmem:[#allocation15_spill] sm:$0xff] %v6364_v14  ;;  %v6366_v13 = vpop.f32.mrb[109].mxu1 }
 0x45a   : > { %7238 = vst [vmem:[#allocation16_spill] sm:$0xff] %v6366_v13  ;;  %v2558_v34 = vmax.f32 %v6364_v14, %v6366_v13  ;;  %v6370_v23 = vpop.f32.mrb[110].mxu1 }
 0x45b   : > { %2556 = vmax.xlane.f32.xlu1 %v2555_v52  ;;  %v6372_v36 = vpop.f32.mrb[111].mxu1 }
 0x45c   : > { %v2561_v4 = vmax.f32 %v6370_v23, %v6372_v36 }
 0x45f   : > { %2559 = vmax.xlane.f32.xlu1 %v2558_v34 }
 0x460   : > { %v6376_v22 = vpop.f32.mrb[112].mxu1 }
 0x461   : > { %7239 = vst [vmem:[#allocation17_spill] sm:$0xff] %v6376_v22  ;;  %v6378_v62 = vpop.f32.mrb[113].mxu1 }
 0x462   : > { %7240 = vst [vmem:[#allocation21_spill] sm:$0xff] %v6378_v62  ;;  %v2564_v40 = vmax.f32 %v6376_v22, %v6378_v62  ;;  %v6382_v17 = vpop.f32.mrb[114].mxu1 }
 0x463   : > { %2562 = vmax.xlane.f32.xlu1 %v2561_v4  ;;  %v6384_v33 = vpop.f32.mrb[115].mxu1 }
 0x464   : > { %v2567_v46 = vmax.f32 %v6382_v17, %v6384_v33 }
 0x466   : > { %2568 = vmax.xlane.f32.xlu0 %v2567_v46 }
 0x467   : > { %2565 = vmax.xlane.f32.xlu1 %v2564_v40 }
 0x468   : > { %v6388_v11 = vpop.f32.mrb[116].mxu1 }
 0x469   : > { %7241 = vst [vmem:[#allocation26_spill] sm:$0xff] %v6388_v11  ;;  %v6390_v25 = vpop.f32.mrb[117].mxu1 }
 0x46a   : > { %7242 = vst [vmem:[#allocation25_spill] sm:$0xff] %v6390_v25  ;;  %v2570_v24 = vmax.f32 %v6388_v11, %v6390_v25  ;;  %v6394_v63 = vpop.f32.mrb[118].mxu1 }
 0x46b   : > { %v6396_v16 = vpop.f32.mrb[119].mxu1 }
 0x46c   : > { %v2573_v48 = vmax.f32 %v6394_v63, %v6396_v16  ;;  %2571 = vmax.xlane.f32.xlu1 %v2570_v24 }
 0x46e   : > { %2574 = vmax.xlane.f32.xlu0 %v2573_v48 }
 0x470   : > { %v6400_v26 = vpop.f32.mrb[120].mxu1 }
 0x471   : > { %7243 = vst [vmem:[#allocation28_spill] sm:$0xff] %v6400_v26  ;;  %v6402_v52 = vpop.f32.mrb[121].mxu1 }
 0x472   : > { %7244 = vst [vmem:[#allocation27_spill] sm:$0xff] %v6402_v52  ;;  %v2576_v34 = vmax.f32 %v6400_v26, %v6402_v52  ;;  %v6406_v4 = vpop.f32.mrb[122].mxu1 }
 0x473   : > { %v6408_v40 = vpop.f32.mrb[123].mxu1 }
 0x474   : > { %2577 = vmax.xlane.f32.xlu0 %v2576_v34  ;;  %v2579_v46 = vmax.f32 %v6406_v4, %v6408_v40 }
 0x478   : > { %2580 = vmax.xlane.f32.xlu0 %v2579_v46  ;;  %v6412_v25 = vpop.f32.mrb[124].mxu1 }
 0x479   : > { %7245 = vst [vmem:[#allocation19_spill] sm:$0xff] %v6412_v25  ;;  %v6414_v24 = vpop.f32.mrb[125].mxu1 }
 0x47a   : > { %7246 = vst [vmem:[#allocation23_spill] sm:$0xff] %v6414_v24  ;;  %v2582_v48 = vmax.f32 %v6412_v25, %v6414_v24  ;;  %v6418_v11 = vpop.f32.mrb[126].mxu1 }
 0x47b   : > { %v6420_v62 = vpop.f32.mrb[127].mxu1 }
 0x47c   : > { %v2585_v52 = vmax.f32 %v6418_v11, %v6420_v62  ;;  %2583 = vmax.xlane.f32.xlu1 %v2582_v48 }
 0x47e   : > { %2586 = vmax.xlane.f32.xlu0 %v2585_v52 }
 0x491   : > { %v2494_v34 = vpop.xlane.xlu0 %2493 }
 0x492   : > { %v2588_v26 = vsub.f32 %v6230_v12, %v2494_v34  ;;  %v2589_v46 = vsub.f32 %v6232_v2, %v2494_v34 }
 0x493   : > { %v2497_v22 = vpop.xlane.xlu1 %2496 }
 0x494   : > { %v2652_v13 = vmul.f32 1.442695, %v2588_v26  ;;  %v2654_v14 = vmul.f32 1.442695, %v2589_v46  ;;  %v2590_v38 = vsub.f32 %v6236_v29, %v2497_v22  ;;  %v2591_v24 = vsub.f32 %v6238_v18, %v2497_v22 }
 0x496   : > { %4829 = vpow2.f32 %v2652_v13  ;;  %v2656_v25 = vmul.f32 1.442695, %v2590_v38  ;;  %v2658_v5 = vmul.f32 1.442695, %v2591_v24 }
 0x497   : > { %4831 = vpow2.f32 %v2654_v14  ;;  %v3162_v37 = vpop.permute.xlu1 %3161 }
 0x498   : > { %4833 = vpow2.f32 %v2656_v25  ;;  %4351 = vmatpush3.bf16.msra.mxu0 %v3162_v37  ;;  %4464 = vmatpush3.bf16.msra.mxu1 %v3162_v37 }
 0x499   : > { %4835 = vpow2.f32 %v2658_v5  ;;  %v2500_v52 = vpop.xlane.xlu0 %2499 }
 0x49a   : > { %v2592_v12 = vsub.f32 %v6242_v53, %v2500_v52  ;;  %v2593_v2 = vsub.f32 %v6244_v0, %v2500_v52 }
 0x49c   : > { %v2660_v26 = vmul.f32 1.442695, %v2592_v12  ;;  %v2662_v48 = vmul.f32 1.442695, %v2593_v2 }
 0x49d   : > { %v2503_v34 = vpop.xlane.xlu0 %2502 }
 0x49e   : > { %4837 = vpow2.f32 %v2660_v26  ;;  %v2594_v29 = vsub.f32 %v6248_v45, %v2503_v34  ;;  %v2595_v18 = vsub.f32 %v6250_v55, %v2503_v34 }
 0x49f   : > { %4839 = vpow2.f32 %v2662_v48 }
 0x4a0   : > { %v6432_v38 = vpop.eup %4829  ;;  %v2664_v14 = vmul.f32 1.442695, %v2594_v29  ;;  %v2666_v13 = vmul.f32 1.442695, %v2595_v18 }
 0x4a1   : > { %v6434_v37 = vpop.eup %4831  ;;  %v2506_v5 = vpop.xlane.xlu0 %2505 }
 0x4a2   : > { %v6436_v22 = vpop.eup %4833  ;;  %4841 = vpow2.f32 %v2664_v14  ;;  %v2596_v53 = vsub.f32 %v6254_v60, %v2506_v5  ;;  %v2597_v0 = vsub.f32 %v6256_v10, %v2506_v5  ;;  %v2780_v45 = vadd.f32 %v6434_v37, %v6432_v38 }
 0x4a3   : > { %v6442_v25 = vpop.eup %4835  ;;  %4843 = vpow2.f32 %v2666_v13 }
 0x4a4   : > { %v2668_v55 = vmul.f32 1.442695, %v2596_v53  ;;  %v2670_v24 = vmul.f32 1.442695, %v2597_v0  ;;  %2781 = vadd.xlane.f32.xlu0 %v2780_v45  ;;  %v2783_v46 = vadd.f32 %v6442_v25, %v6436_v22 }
 0x4a6   : > { %4845 = vpow2.f32 %v2668_v55  ;;  %2784 = vadd.xlane.f32.xlu1 %v2783_v46  ;;  %v4635_v46 = vld [vmem:[%s5302_s14 + $0x38] sm:$0xff]  }
 0x4a7   : > { %4847 = vpow2.f32 %v2670_v24 }
 0x4a8   : > { %v6446_v52 = vpop.eup %4837 }
 0x4a9   : > { %v6448_v60 = vpop.eup %4839  ;;  %v2512_v10 = vpop.xlane.xlu0 %2511 }
 0x4aa   : > { %v2600_v12 = vsub.f32 %v6268_v21, %v2512_v10  ;;  %v2601_v2 = vsub.f32 %v6270_v28, %v2512_v10  ;;  %v2786_v26 = vadd.f32 %v6448_v60, %v6446_v52 }
 0x4ac   : > { %v6454_v48 = vpop.eup %4841  ;;  %v2676_v34 = vmul.f32 1.442695, %v2600_v12  ;;  %v2678_v29 = vmul.f32 1.442695, %v2601_v2  ;;  %2787 = vadd.xlane.f32.xlu0 %v2786_v26 }
 0x4ad   : > { %v6456_v18 = vpop.eup %4843 }
 0x4ae   : > { %4849 = vpow2.f32 %v2676_v34  ;;  %v2789_v14 = vadd.f32 %v6456_v18, %v6454_v48 }
 0x4af   : > { %4851 = vpow2.f32 %v2678_v29 }
 0x4b0   : > { %v6460_v13 = vpop.eup %4845  ;;  %2790 = vadd.xlane.f32.xlu0 %v2789_v14 }
 0x4b1   : > { %v6462_v21 = vpop.eup %4847 }
 0x4b2   : > { %v2792_v28 = vadd.f32 %v6462_v21, %v6460_v13 }
 0x4b4   : > { %2793 = vadd.xlane.f32.xlu0 %v2792_v28 }
 0x4b8   : > { %v6466_v5 = vpop.eup %4849 }
 0x4b9   : > { %v6468_v53 = vpop.eup %4851 }
 0x4ba   : > { %v2798_v0 = vadd.f32 %v6468_v53, %v6466_v5 }
 0x4bc   : > { %2799 = vadd.xlane.f32.xlu1 %v2798_v0 }
 0x4c8   : > { %v2509_v45 = vpop.xlane.xlu1 %2508 }
 0x4c9   : > { %v2598_v55 = vsub.f32 %v6260_v7, %v2509_v45  ;;  %v2599_v24 = vsub.f32 %v6263_v44, %v2509_v45  ;;  %v2518_v44 = vpop.xlane.xlu0 %2517 }
 0x4cb   : > { %v2672_v10 = vmul.f32 1.442695, %v2598_v55  ;;  %v2674_v12 = vmul.f32 1.442695, %v2599_v24  ;;  %v2604_v24 = vsub.f32 %v6280_v31, %v2518_v44 }
 0x4cc   : > { %v2515_v2 = vpop.xlane.xlu1 %2514 }
 0x4cd   : > { %4853 = vpow2.f32 %v2672_v10  ;;  %3163 = vrot.lane.b32.xlu1 %v4635_v46, %s5101_s11  ;;  %v2602_v26 = vsub.f32 %v6274_v58, %v2515_v2  ;;  %v2603_v34 = vsub.f32 %v6276_v35, %v2515_v2  ;;  %v2605_v35 = vsub.f32 %v6282_v15, %v2518_v44 }
 0x4ce   : > { %4855 = vpow2.f32 %v2674_v12  ;;  %v2684_v2 = vmul.f32 1.442695, %v2604_v24 }
 0x4cf   : > { %v2680_v29 = vmul.f32 1.442695, %v2602_v26  ;;  %v2682_v14 = vmul.f32 1.442695, %v2603_v34 }
 0x4d0   : > { %v6478_v28 = vpop.xlane.xlu1 %2520 }
 0x4d1   : > { %4857 = vpow2.f32 %v2680_v29  ;;  %v2686_v29 = vmul.f32 1.442695, %v2605_v35 }
 0x4d2   : > { %4859 = vpow2.f32 %v2682_v14  ;;  %v6495_v14 = vpop.xlane.xlu0 %2523 }
 0x4d3   : > { %4861 = vpow2.f32 %v2684_v2 }
 0x4d4   : > { %v2527_v7 = vpop.xlane.xlu1 %2526  ;;  %4863 = vpow2.f32 %v2686_v29 }
 0x4d5   : > { %v2610_v26 = vsub.f32 %v6298_v42, %v2527_v7  ;;  %v2611_v31 = vsub.f32 %v6300_v9, %v2527_v7 }
 0x4d7   : > { %v6480_v0 = vpop.eup %4853  ;;  %v2696_v15 = vmul.f32 1.442695, %v2610_v26  ;;  %v2698_v24 = vmul.f32 1.442695, %v2611_v31 }
 0x4d8   : > { %7247 = vst [vmem:[#allocation20_spill] sm:$0xff] %v6480_v0  ;;  %v6482_v45 = vpop.eup %4855  ;;  %v2533_v55 = vpop.xlane.xlu1 %2532 }
 0x4d9   : > { %7248 = vst [vmem:[#allocation24_spill] sm:$0xff] %v6482_v45  ;;  %v2795_v58 = vadd.f32 %v6482_v45, %v6480_v0  ;;  %v2614_v44 = vsub.f32 %v6310_v50, %v2533_v55  ;;  %v2615_v42 = vsub.f32 %v6312_v6, %v2533_v55  ;;  %4865 = vpow2.f32 %v2696_v15 }
 0x4da   : > { %4867 = vpow2.f32 %v2698_v24 }
 0x4db   : > { %v6488_v46 = vpop.eup %4857  ;;  %2796 = vadd.xlane.f32.xlu0 %v2795_v58  ;;  %v6499_v58 = vpop.xlane.xlu0 %2529  ;;  %v2706_v9 = vmul.f32 1.442695, %v2615_v42 }
 0x4dc   : > { %7249 = vst [vmem:[#allocation22_spill] sm:$0xff] %v6488_v46  ;;  %v6490_v10 = vpop.eup %4859  ;;  %v2539_v12 = vpop.xlane.xlu1 %2538 }
 0x4dd   : > { %7250 = vst [vmem:[#allocation9_spill] sm:$0xff] %v6490_v10  ;;  %v2801_v34 = vadd.f32 %v6490_v10, %v6488_v46  ;;  %v2704_v46 = vmul.f32 1.442695, %v2614_v44  ;;  %v2618_v35 = vsub.f32 %v6322_v61, %v2539_v12  ;;  %v2619_v7 = vsub.f32 %v6324_v49, %v2539_v12  ;;  %v6510_v29 = vpop.eup %4861 }
 0x4de   : > { %v6512_v61 = vpop.eup %4863 }
 0x4df   : > { %2802 = vadd.xlane.f32.xlu0 %v2801_v34  ;;  %v6503_v10 = vpop.xlane.xlu0 %2535  ;;  %4869 = vpow2.f32 %v2704_v46  ;;  %v2712_v50 = vmul.f32 1.442695, %v2618_v35  ;;  %v2714_v6 = vmul.f32 1.442695, %v2619_v7  ;;  %v4636_v35 = vld [vmem:[%s5302_s14 + $0x78] sm:$0xff]   ;;  %s5027_s14 = scalar_lea.vmem %s5026_s13, 32768 }
 0x4e0   : > { %v2545_v0 = vpop.xlane.xlu1 %2544  ;;  %4871 = vpow2.f32 %v2706_v9 }
 0x4e1   : > { %v2622_v26 = vsub.f32 %v6334_v47, %v2545_v0  ;;  %v2623_v55 = vsub.f32 %v6336_v20, %v2545_v0  ;;  %4873 = vpow2.f32 %v2712_v50  ;;  %v2804_v20 = vadd.f32 %v6512_v61, %v6510_v29 }
 0x4e2   : > { %4875 = vpow2.f32 %v2714_v6 }
 0x4e3   : > { %v6507_v34 = vpop.xlane.xlu0 %2541  ;;  %v2720_v49 = vmul.f32 1.442695, %v2622_v26  ;;  %v2722_v47 = vmul.f32 1.442695, %v2623_v55  ;;  %v6520_v44 = vpop.eup %4865 }
 0x4e4   : > { %v2551_v45 = vpop.xlane.xlu1 %2550  ;;  %v6524_v0 = vpop.eup %4867 }
 0x4e5   : > { %v2626_v46 = vsub.f32 %v6346_v54, %v2551_v45  ;;  %v2627_v15 = vsub.f32 %v6348_v32, %v2551_v45  ;;  %4877 = vpow2.f32 %v2720_v49  ;;  %v2813_v50 = vadd.f32 %v6524_v0, %v6520_v44 }
 0x4e6   : > { %4879 = vpow2.f32 %v2722_v47 }
 0x4e7   : > { %v6517_v12 = vpop.xlane.xlu0 %2547  ;;  %v2728_v24 = vmul.f32 1.442695, %v2626_v46  ;;  %v2730_v9 = vmul.f32 1.442695, %v2627_v15 }
 0x4e8   : > { %v2557_v2 = vpop.xlane.xlu1 %2556 }
 0x4e9   : > { %v2630_v42 = vsub.f32 %v6358_v19, %v2557_v2  ;;  %v2631_v7 = vsub.f32 %v6360_v43, %v2557_v2  ;;  %v6531_v45 = vpop.eup %4869  ;;  %4881 = vpow2.f32 %v2728_v24 }
 0x4ea   : > { %v6535_v26 = vpop.eup %4871  ;;  %4883 = vpow2.f32 %v2730_v9  ;;  %v2606_v9 = vsub.f32 %v6286_v27, %v6478_v28 }
 0x4eb   : > { %v6528_v54 = vpop.xlane.xlu0 %2553  ;;  %v2736_v6 = vmul.f32 1.442695, %v2630_v42  ;;  %v2738_v55 = vmul.f32 1.442695, %v2631_v7  ;;  %v6540_v2 = vpop.eup %4873  ;;  %v2819_v46 = vadd.f32 %v6535_v26, %v6531_v45  ;;  %v2607_v7 = vsub.f32 %v6288_v51, %v6478_v28 }
 0x4ec   : > { %v6514_v31 = vpop.xlane.xlu1 %2559  ;;  %v6544_v47 = vpop.eup %4875  ;;  %v2612_v51 = vsub.f32 %v6304_v57, %v6499_v58  ;;  %v2688_v28 = vmul.f32 1.442695, %v2606_v9 }
 0x4ed   : > { %4885 = vpow2.f32 %v2736_v6 }
 0x4ee   : > { %4887 = vpow2.f32 %v2738_v55  ;;  %v2700_v57 = vmul.f32 1.442695, %v2612_v51 }
 0x4ef   : > { %v6548_v42 = vpop.eup %4877 }
 0x4f0   : > { %v2563_v32 = vpop.xlane.xlu1 %2562 }
 0x4f1   : > { %2805 = vadd.xlane.f32.xlu1 %v2804_v20  ;;  %v2634_v19 = vsub.f32 %v6370_v23, %v2563_v32  ;;  %v2635_v49 = vsub.f32 %v6372_v36, %v2563_v32  ;;  %v2825_v36 = vadd.f32 %v6544_v47, %v6540_v2 }
 0x4f3   : > { %v2569_v43 = vpop.xlane.xlu0 %2568  ;;  %v2744_v15 = vmul.f32 1.442695, %v2634_v19  ;;  %v2746_v23 = vmul.f32 1.442695, %v2635_v49  ;;  %v2609_v19 = vsub.f32 %v6294_v59, %v6495_v14  ;;  %v2613_v49 = vsub.f32 %v6306_v41, %v6499_v58 }
 0x4f4   : > { %v2638_v20 = vsub.f32 %v6382_v17, %v2569_v43  ;;  %v2639_v24 = vsub.f32 %v6384_v33, %v2569_v43  ;;  %v2608_v33 = vsub.f32 %v6292_v3, %v6495_v14  ;;  %v2690_v3 = vmul.f32 1.442695, %v2607_v7 }
 0x4f5   : > { %3179 = vrot.lane.b32.xlu0 %v4636_v35, %s5101_s11  ;;  %2814 = vadd.xlane.f32.xlu1 %v2813_v50  ;;  %v6552_v35 = vpop.eup %4879  ;;  %4889 = vpow2.f32 %v2744_v15  ;;  %v2694_v14 = vmul.f32 1.442695, %v2609_v19  ;;  %v2702_v41 = vmul.f32 1.442695, %v2613_v49  ;;  %s5021_s11 = scalar_lea.vmem %s6995_s7, 16384 }
 0x4f6   : > { %v2752_v17 = vmul.f32 1.442695, %v2638_v20  ;;  %4891 = vpow2.f32 %v2746_v23  ;;  %v2754_v50 = vmul.f32 1.442695, %v2639_v24  ;;  %v6560_v6 = vpop.eup %4881  ;;  %v2831_v27 = vadd.f32 %v6552_v35, %v6548_v42  ;;  %p5022_p12 = scmp.ne.s32.totalorder %s6995_s7, %s5021_s11  ;;  %p5029_p2 = scmp.lt.s32.totalorder %s5027_s14, %s5021_s11 }
 0x4f7   : > { %v6566_v55 = vpop.eup %4883 }
 0x4f8   : > { %4893 = vpow2.f32 %v2752_v17  ;;  %v6574_v59 = vpop.eup %4885  ;;  %v2837_v15 = vadd.f32 %v6566_v55, %v6560_v6  ;;  %p5023_p13 = pnand %p5022_p12, %p5171_p4  ;;  %p5030_p3 = por %p5029_p2, %p5028_p1 }
 0x4f9   : > { %2820 = vadd.xlane.f32.xlu1 %v2819_v46  ;;  %v2692_v46 = vmul.f32 1.442695, %v2608_v33  ;;  %4895 = vpow2.f32 %v2754_v50  ;;  %v6578_v20 = vpop.eup %4887 }
 0x4fa   : > { %4897 = vpow2.f32 %v2688_v28  ;;  %v2843_v33 = vadd.f32 %v6578_v20, %v6574_v59  ;;  %v2620_v28 = vsub.f32 %v6328_v30, %v6507_v34  ;;  %p5024_p0 = pneg %p5023_p13 }
 0x4fb   : > { %v2575_v32 = vpop.xlane.xlu0 %2574  ;;  %4899 = vpow2.f32 %v2690_v3 }
 0x4fc   : > { %v2642_v23 = vsub.f32 %v6394_v63, %v2575_v32  ;;  %v2643_v58 = vsub.f32 %v6396_v16, %v2575_v32  ;;  %4901 = vpow2.f32 %v2692_v46  ;;  %v2617_v63 = vsub.f32 %v6318_v8, %v6503_v10  ;;  %p5031_p5 = pnand %p5030_p3, %p5024_p0 }
 0x4fd   : > { %2826 = vadd.xlane.f32.xlu1 %v2825_v36  ;;  %v2616_v36 = vsub.f32 %v6316_v56, %v6503_v10  ;;  %4903 = vpow2.f32 %v2694_v14  ;;  %v2621_v46 = vsub.f32 %v6330_v1, %v6507_v34 }
 0x4fe   : > { %4905 = vpow2.f32 %v2700_v57  ;;  %v2760_v32 = vmul.f32 1.442695, %v2642_v23  ;;  %v2762_v56 = vmul.f32 1.442695, %v2643_v58  ;;  %v7251_v58 = vld [vmem:[#allocation11_spill] sm:$0xff] }
 0x4ff   : > { %v6586_v17 = vpop.eup %4889  ;;  %4907 = vpow2.f32 %v2702_v41  ;;  %v2718_v34 = vmul.f32 1.442695, %v2621_v46 }
 0x500   : > { %v6592_v16 = vpop.eup %4891 }
 0x501   : > { %2832 = vadd.xlane.f32.xlu1 %v2831_v27  ;;  %v6572_v43 = vpop.xlane.xlu0 %2577  ;;  %v2710_v27 = vmul.f32 1.442695, %v2617_v63  ;;  %v2849_v8 = vadd.f32 %v6592_v16, %v6586_v17 }
 0x505   : > { %2838 = vadd.xlane.f32.xlu1 %v2837_v15  ;;  %v2581_v24 = vpop.xlane.xlu0 %2580 }
 0x506   : > { %v2646_v9 = vsub.f32 %v6406_v4, %v2581_v24  ;;  %v2647_v7 = vsub.f32 %v6408_v40, %v2581_v24  ;;  %v2708_v4 = vmul.f32 1.442695, %v2616_v36  ;;  %v6594_v40 = vpop.eup %4893  ;;  %v2625_v24 = vsub.f32 %v7251_v58, %v6517_v12 }
 0x507   : > { %v6598_v10 = vpop.eup %4895 }
 0x508   : > { %v2768_v50 = vmul.f32 1.442695, %v2646_v9  ;;  %v2770_v19 = vmul.f32 1.442695, %v2647_v7  ;;  %v6606_v14 = vpop.eup %4897  ;;  %v2855_v30 = vadd.f32 %v6598_v10, %v6594_v40 }
 0x509   : > { %2844 = vadd.xlane.f32.xlu1 %v2843_v33  ;;  %v6608_v23 = vpop.eup %4899  ;;  %v7252_v33 = vld [vmem:[#allocation12_spill] sm:$0xff] }
 0x50a   : > { %4909 = vpow2.f32 %v2768_v50  ;;  %v6612_v41 = vpop.eup %4901  ;;  %v2807_v9 = vadd.f32 %v6608_v23, %v6606_v14 }
 0x50b   : > { %4911 = vpow2.f32 %v2770_v19  ;;  %v2587_v51 = vpop.xlane.xlu0 %2586  ;;  %v6616_v1 = vpop.eup %4903  ;;  %v7253_v19 = vld [vmem:[#allocation18_spill] sm:$0xff] }
 0x50c   : > { %4913 = vpow2.f32 %v2760_v32  ;;  %v2650_v49 = vsub.f32 %v6418_v11, %v2587_v51  ;;  %v2651_v3 = vsub.f32 %v6420_v62, %v2587_v51  ;;  %v2716_v11 = vmul.f32 1.442695, %v2620_v28  ;;  %v6620_v36 = vpop.eup %4905 }
 0x50d   : > { %4915 = vpow2.f32 %v2762_v56  ;;  %2850 = vadd.xlane.f32.xlu1 %v2849_v8  ;;  %v2624_v62 = vsub.f32 %v6340_v39, %v6517_v12  ;;  %v6624_v7 = vpop.eup %4907  ;;  %v2628_v32 = vsub.f32 %v7252_v33, %v6528_v54  ;;  %v2726_v12 = vmul.f32 1.442695, %v2625_v24 }
 0x50e   : > { %4917 = vpow2.f32 %v2708_v4  ;;  %v2776_v15 = vmul.f32 1.442695, %v2650_v49  ;;  %v2778_v57 = vmul.f32 1.442695, %v2651_v3  ;;  %v2629_v56 = vsub.f32 %v7253_v19, %v6528_v54  ;;  %v7254_v3 = vld [vmem:[#allocation15_spill] sm:$0xff] }
 0x50f   : > { %4919 = vpow2.f32 %v2710_v27  ;;  %v2724_v39 = vmul.f32 1.442695, %v2624_v62  ;;  %v2810_v27 = vadd.f32 %v6616_v1, %v6612_v41  ;;  %v2732_v49 = vmul.f32 1.442695, %v2628_v32 }
 0x510   : > { %4921 = vpow2.f32 %v2776_v15  ;;  %v2632_v46 = vsub.f32 %v7254_v3, %v6514_v31  ;;  %v2734_v15 = vmul.f32 1.442695, %v2629_v56  ;;  %v7260_v3 = vld [vmem:[#allocation28_spill] sm:$0xff] }
 0x511   : > { %4923 = vpow2.f32 %v2778_v57  ;;  %2856 = vadd.xlane.f32.xlu1 %v2855_v30  ;;  %v7255_v57 = vld [vmem:[#allocation16_spill] sm:$0xff] }
 0x512   : > { %4925 = vpow2.f32 %v2716_v11  ;;  %v2633_v30 = vsub.f32 %v7255_v57, %v6514_v31  ;;  %v2566_v11 = vpop.xlane.xlu1 %2565  ;;  %v7257_v31 = vld [vmem:[#allocation21_spill] sm:$0xff] }
 0x513   : > { %4927 = vpow2.f32 %v2718_v34  ;;  %v2816_v34 = vadd.f32 %v6624_v7, %v6620_v36 }
 0x514   : > { %v6626_v63 = vpop.eup %4909  ;;  %2808 = vadd.xlane.f32.xlu0 %v2807_v9  ;;  %4929 = vpow2.f32 %v2724_v39  ;;  %v2740_v9 = vmul.f32 1.442695, %v2632_v46  ;;  %v7256_v39 = vld [vmem:[#allocation17_spill] sm:$0xff]  ;;  %v2742_v32 = vmul.f32 1.442695, %v2633_v30  ;;  %v2644_v46 = vsub.f32 %v7260_v3, %v6572_v43  ;;  %v7261_v30 = vld [vmem:[#allocation27_spill] sm:$0xff] }
 0x515   : > { %v6630_v50 = vpop.eup %4911  ;;  %4931 = vpow2.f32 %v2726_v12  ;;  %v2636_v33 = vsub.f32 %v7256_v39, %v2566_v11  ;;  %v2637_v12 = vsub.f32 %v7257_v31, %v2566_v11  ;;  %v2645_v11 = vsub.f32 %v7261_v30, %v6572_v43 }
 0x516   : > { %v6634_v4 = vpop.eup %4913  ;;  %v2867_v51 = vadd.f32 %v6630_v50, %v6626_v63  ;;  %4933 = vpow2.f32 %v2732_v49  ;;  %v2572_v57 = vpop.xlane.xlu1 %2571  ;;  %v2764_v31 = vmul.f32 1.442695, %v2644_v46  ;;  %v7265_v46 = vld [vmem:[#allocation23_spill] sm:$0xff] }
 0x517   : > { %v6640_v8 = vpop.eup %4915  ;;  %4935 = vpow2.f32 %v2734_v15  ;;  %v2748_v49 = vmul.f32 1.442695, %v2636_v33  ;;  %v2750_v15 = vmul.f32 1.442695, %v2637_v12  ;;  %v2766_v12 = vmul.f32 1.442695, %v2645_v11 }
 0x518   : > { %v6642_v28 = vpop.eup %4917  ;;  %2811 = vadd.xlane.f32.xlu0 %v2810_v27  ;;  %2868 = vadd.xlane.f32.xlu1 %v2867_v51  ;;  %v2861_v58 = vadd.f32 %v6640_v8, %v6634_v4  ;;  %4937 = vpow2.f32 %v2740_v9  ;;  %v7262_v9 = vld [vmem:[#allocation26_spill] sm:$0xff] }
 0x519   : > { %v6646_v54 = vpop.eup %4919  ;;  %4939 = vpow2.f32 %v2742_v32  ;;  %v2640_v33 = vsub.f32 %v7262_v9, %v2572_v57 }
 0x51a   : > { %v6650_v62 = vpop.eup %4921  ;;  %v2822_v56 = vadd.f32 %v6646_v54, %v6642_v28  ;;  %4941 = vpow2.f32 %v2748_v49 }
 0x51b   : > { %v6656_v24 = vpop.eup %4923  ;;  %4943 = vpow2.f32 %v2750_v15 }
 0x51c   : > { %2817 = vadd.xlane.f32.xlu0 %v2816_v34  ;;  %2862 = vadd.xlane.f32.xlu1 %v2861_v58  ;;  %v6660_v19 = vpop.eup %4925  ;;  %v2873_v27 = vadd.f32 %v6656_v24, %v6650_v62  ;;  %4945 = vpow2.f32 %v2764_v31 }
 0x51d   : > { %7258 = vst [vmem:[#allocation5_spill] sm:$0xff] %v6660_v19  ;;  %v6666_v51 = vpop.eup %4927  ;;  %4947 = vpow2.f32 %v2766_v12 }
 0x51e   : > { %7259 = vst [vmem:[#allocation7_spill] sm:$0xff] %v6666_v51  ;;  %v6672_v34 = vpop.eup %4929  ;;  %v2828_v58 = vadd.f32 %v6666_v51, %v6660_v19  ;;  %v2756_v19 = vmul.f32 1.442695, %v2640_v33  ;;  %v7264_v51 = vld [vmem:[#allocation19_spill] sm:$0xff] }
 0x51f   : > { %v6676_v39 = vpop.eup %4931 }
 0x520   : > { %2823 = vadd.xlane.f32.xlu0 %v2822_v56  ;;  %2874 = vadd.xlane.f32.xlu1 %v2873_v27  ;;  %v7263_v56 = vld [vmem:[#allocation25_spill] sm:$0xff]  ;;  %v2584_v27 = vpop.xlane.xlu1 %2583  ;;  %v6680_v3 = vpop.eup %4933  ;;  %v2834_v43 = vadd.f32 %v6676_v39, %v6672_v34  ;;  %4949 = vpow2.f32 %v2756_v19 }
 0x521   : > { %v2641_v32 = vsub.f32 %v7263_v56, %v2572_v57  ;;  %v6684_v30 = vpop.eup %4935  ;;  %v2648_v49 = vsub.f32 %v7264_v51, %v2584_v27  ;;  %v2649_v15 = vsub.f32 %v7265_v46, %v2584_v27 }
 0x522   : > { %v2840_v57 = vadd.f32 %v6684_v30, %v6680_v3 }
 0x523   : > { %v2758_v9 = vmul.f32 1.442695, %v2641_v32  ;;  %v2772_v56 = vmul.f32 1.442695, %v2648_v49  ;;  %v2774_v33 = vmul.f32 1.442695, %v2649_v15 }
 0x524   : > { %2829 = vadd.xlane.f32.xlu0 %v2828_v58  ;;  %v6688_v58 = vpop.eup %4937 }
 0x525   : > { %v6692_v11 = vpop.eup %4939  ;;  %4951 = vpow2.f32 %v2758_v9 }
 0x526   : > { %v6694_v31 = vpop.eup %4941  ;;  %v2846_v51 = vadd.f32 %v6692_v11, %v6688_v58  ;;  %4953 = vpow2.f32 %v2772_v56 }
 0x527   : > { %v6698_v32 = vpop.eup %4943  ;;  %4955 = vpow2.f32 %v2774_v33 }
 0x528   : > { %2835 = vadd.xlane.f32.xlu0 %v2834_v43  ;;  %v6700_v27 = vpop.eup %4945  ;;  %v2852_v19 = vadd.f32 %v6698_v32, %v6694_v31 }
 0x529   : > { %7266 = vst [vmem:[#allocation6_spill] sm:$0xff] %v6700_v27  ;;  %v6704_v43 = vpop.eup %4947 }
 0x52a   : > { %7267 = vst [vmem:[#allocation8_spill] sm:$0xff] %v6704_v43  ;;  %v6706_v9 = vpop.eup %4949  ;;  %v2864_v46 = vadd.f32 %v6704_v43, %v6700_v27 }
 0x52b   : > { %7268 = vst [vmem:[#allocation10_spill] sm:$0xff] %v6706_v9 }
 0x52c   : > { %2841 = vadd.xlane.f32.xlu0 %v2840_v57 }
 0x52f   : > { %v6710_v15 = vpop.eup %4951 }
 0x530   : > { %2847 = vadd.xlane.f32.xlu0 %v2846_v51  ;;  %7269 = vst [vmem:[#allocation14_spill] sm:$0xff] %v6710_v15  ;;  %v6712_v56 = vpop.eup %4953  ;;  %v2858_v33 = vadd.f32 %v6710_v15, %v6706_v9 }
 0x531   : > { %v2782_v12 = vpop.xlane.xlu0 %2781  ;;  %7270 = vst [vmem:[#allocation13_spill] sm:$0xff] %v6712_v56  ;;  %v6716_v51 = vpop.eup %4955 }
 0x532   : > { %4957 = vrcp.f32 %v2782_v12  ;;  %7271 = vst [vmem:[#allocation11_spill] sm:$0xff] %v6716_v51 }
 0x533   : > { %v2785_v49 = vpop.xlane.xlu1 %2784 }
 0x534   : > { %4959 = vrcp.f32 %v2785_v49  ;;  %2853 = vadd.xlane.f32.xlu0 %v2852_v19 }
 0x538   : > { %2865 = vadd.xlane.f32.xlu0 %v2864_v46 }
 0x539   : > { %v2788_v57 = vpop.xlane.xlu0 %2787 }
 0x53a   : > { %4961 = vrcp.f32 %v2788_v57  ;;  %v2870_v57 = vadd.f32 %v6716_v51, %v6712_v56  ;;  %v7275_v51 = vld [vmem:[#allocation22_spill] sm:$0xff] }
 0x53c   : > { %v4958_v12 = vpop.eup %4957  ;;  %2859 = vadd.xlane.f32.xlu0 %v2858_v33 }
 0x53d   : > { %v2908_v19 = vmul.f32 %v4958_v12, %v6432_v38  ;;  %v2791_v49 = vpop.xlane.xlu0 %2790  ;;  %v2909_v43 = vmul.f32 %v4958_v12, %v6434_v37 }
 0x53e   : > { %v4960_v46 = vpop.eup %4959  ;;  %4963 = vrcp.f32 %v2791_v49 }
 0x53f   : > { %3944 = vst [vmem:[%s5788_s24 + $0x200] sm:$0xff] %v2908_v19  ;;  %v2910_v9 = vmul.f32 %v4960_v46, %v6436_v22  ;;  %v2911_v15 = vmul.f32 %v4960_v46, %v6442_v25  ;;  %3945 = vst [vmem:[%s5788_s24 + $0x208] sm:$0xff] %v2909_v43 }
 0x540   : > { %2871 = vadd.xlane.f32.xlu0 %v2870_v57 }
 0x541   : > { %3946 = vst [vmem:[%s5788_s24 + $0x210] sm:$0xff] %v2910_v9  ;;  %v2794_v38 = vpop.xlane.xlu0 %2793  ;;  %3947 = vst [vmem:[%s5788_s24 + $0x218] sm:$0xff] %v2911_v15  ;;  %v3038_v37 = vpack.c.bf16 %v2911_v15, %v2909_v43 }
 0x542   : > { %4965 = vrcp.f32 %v2794_v38 }
 0x543   : > { %3229 = vmatprep.mubr.bf16.mxu0 %v3038_v37 }
 0x544   : > { %v4962_v33 = vpop.eup %4961 }
 0x545   : > { %v2913_v12 = vmul.f32 %v4962_v33, %v6448_v60  ;;  %v2912_v49 = vmul.f32 %v4962_v33, %v6446_v52 }
 0x547   : > { %3949 = vst [vmem:[%s5788_s24 + $0x228] sm:$0xff] %v2913_v12  ;;  %3948 = vst [vmem:[%s5788_s24 + $0x220] sm:$0xff] %v2912_v49 }
 0x548   : > { %v4964_v22 = vpop.eup %4963 }
 0x549   : > { %v2800_v25 = vpop.xlane.xlu1 %2799  ;;  %v2915_v46 = vmul.f32 %v4964_v22, %v6456_v18  ;;  %v2914_v57 = vmul.f32 %v4964_v22, %v6454_v48 }
 0x54a   : > { %4967 = vrcp.f32 %v2800_v25 }
 0x54b   : > { %3951 = vst [vmem:[%s5788_s24 + $0x238] sm:$0xff] %v2915_v46  ;;  %3950 = vst [vmem:[%s5788_s24 + $0x230] sm:$0xff] %v2914_v57 }
 0x54c   : > { %v4966_v43 = vpop.eup %4965 }
 0x54d   : > { %v2917_v15 = vmul.f32 %v4966_v43, %v6462_v21  ;;  %v2916_v60 = vmul.f32 %v4966_v43, %v6460_v13  ;;  %v3164_v22 = vpop.permute.xlu1 %3163  ;;  %v3037_v21 = vpack.c.bf16 %v2910_v9, %v2908_v19  ;;  %v7273_v43 = vld [vmem:[#allocation20_spill] sm:$0xff] }
 0x54f   : > { %3953 = vst [vmem:[%s5788_s24 + $0x248] sm:$0xff] %v2917_v15  ;;  %3952 = vst [vmem:[%s5788_s24 + $0x240] sm:$0xff] %v2916_v60 }
 0x554   : > { %v4968_v52 = vpop.eup %4967 }
 0x555   : > { %v2921_v38 = vmul.f32 %v4968_v52, %v6468_v53  ;;  %v2920_v37 = vmul.f32 %v4968_v52, %v6466_v5  ;;  %v3040_v53 = vpack.c.bf16 %v2915_v46, %v2913_v12  ;;  %v7272_v5 = vld [vmem:[#allocation24_spill] sm:$0xff] }
 0x557   : > { %3957 = vst [vmem:[%s5788_s24 + $0x268] sm:$0xff] %v2921_v38  ;;  %3956 = vst [vmem:[%s5788_s24 + $0x260] sm:$0xff] %v2920_v37 }
 0x568   : > { %v2797_v18 = vpop.xlane.xlu0 %2796 }
 0x569   : > { %4969 = vrcp.f32 %v2797_v18 }
 0x56c   : > { %v2803_v48 = vpop.xlane.xlu0 %2802 }
 0x56d   : > { %4971 = vrcp.f32 %v2803_v48  ;;  %v7274_v48 = vld [vmem:[#allocation9_spill] sm:$0xff] }
 0x570   : > { %v3180_v33 = vpop.permute.xlu0 %3179 }
 0x571   : > { %4352 = vmatprep.subr.bf16.mxu0 %v3180_v33  ;;  %4457 = vmatprep.subr.bf16.mxu1 %v3180_v33  ;;  %v3039_v33 = vpack.c.bf16 %v2914_v57, %v2912_v49 }
 0x572   : > { %4353 = vmatpush3.bf16.msra.mxu0 %v3164_v22  ;;  %4465 = vmatpush3.bf16.msra.mxu1 %v3164_v22 }
 0x573   : > { %v4970_v13 = vpop.eup %4969 }
 0x574   : > { %v2919_v25 = vmul.f32 %v4970_v13, %v7272_v5  ;;  %v2918_v52 = vmul.f32 %v4970_v13, %v7273_v43 }
 0x575   : > { %3230 = vmatmul.mubr.bf16.vlgmr.msra.gmra.mrb[64].mxu0 %v3037_v21 }
 0x576   : > { %3237 = vmatprep.mubr.bf16.mxu0 %v3040_v53  ;;  %3955 = vst [vmem:[%s5788_s24 + $0x258] sm:$0xff] %v2919_v25  ;;  %3954 = vst [vmem:[%s5788_s24 + $0x250] sm:$0xff] %v2918_v52  ;;  %v3042_v22 = vpack.c.bf16 %v2919_v25, %v2917_v15  ;;  %v3041_v12 = vpack.c.bf16 %v2918_v52, %v2916_v60 }
 0x577   : > { %v4972_v18 = vpop.eup %4971 }
 0x578   : > { %v2923_v56 = vmul.f32 %v4972_v18, %v7274_v48  ;;  %v2922_v27 = vmul.f32 %v4972_v18, %v7275_v51 }
 0x57a   : > { %3959 = vst [vmem:[%s5788_s24 + $0x278] sm:$0xff] %v2923_v56  ;;  %3958 = vst [vmem:[%s5788_s24 + $0x270] sm:$0xff] %v2922_v27  ;;  %v3044_v46 = vpack.c.bf16 %v2923_v56, %v2921_v38  ;;  %v3043_v15 = vpack.c.bf16 %v2922_v27, %v2920_v37 }
 0x57d   : > { %3238 = vmatmul.mubr.bf16.gmra.mrb[68].mxu0 %v3039_v33 }
 0x57e   : > { %3245 = vmatprep.mubr.bf16.mxu0 %v3042_v22  ;;  %v2806_v9 = vpop.xlane.xlu1 %2805 }
 0x57f   : > { %4973 = vrcp.f32 %v2806_v9 }
 0x582   : > { %v2815_v19 = vpop.xlane.xlu1 %2814 }
 0x583   : > { %4975 = vrcp.f32 %v2815_v19 }
 0x585   : > { %3246 = vmatmul.mubr.bf16.gmra.mrb[72].mxu0 %v3041_v12 }
 0x586   : > { %3253 = vmatprep.mubr.bf16.mxu0 %v3044_v46  ;;  %v2821_v13 = vpop.xlane.xlu1 %2820 }
 0x587   : > { %4977 = vrcp.f32 %v2821_v13 }
 0x589   : > { %v4974_v51 = vpop.eup %4973 }
 0x58a   : > { %v2827_v21 = vpop.xlane.xlu1 %2826  ;;  %v6753_v49 = vmul.f32 %v4974_v51, %v6512_v61  ;;  %v6756_v57 = vmul.f32 %v4974_v51, %v6510_v29 }
 0x58b   : > { %4979 = vrcp.f32 %v2827_v21 }
 0x58c   : > { %3961 = vst [vmem:[%s5788_s24 + $0x288] sm:$0xff] %v6753_v49  ;;  %3960 = vst [vmem:[%s5788_s24 + $0x280] sm:$0xff] %v6756_v57 }
 0x58d   : > { %v4976_v56 = vpop.eup %4975  ;;  %3254 = vmatmul.mubr.bf16.gmra.mrb[76].mxu0 %v3043_v15 }
 0x58e   : > { %v2833_v60 = vpop.xlane.xlu1 %2832  ;;  %v6763_v38 = vmul.f32 %v4976_v56, %v6524_v0  ;;  %v6766_v61 = vmul.f32 %v4976_v56, %v6520_v44 }
 0x58f   : > { %4981 = vrcp.f32 %v2833_v60 }
 0x590   : > { %3967 = vst [vmem:[%s5788_s24 + $0x2b8] sm:$0xff] %v6763_v38  ;;  %3966 = vst [vmem:[%s5788_s24 + $0x2b0] sm:$0xff] %v6766_v61 }
 0x591   : > { %v4978_v29 = vpop.eup %4977 }
 0x592   : > { %v2839_v27 = vpop.xlane.xlu1 %2838  ;;  %v6773_v37 = vmul.f32 %v4978_v29, %v6535_v26  ;;  %v6776_v53 = vmul.f32 %v4978_v29, %v6531_v45 }
 0x593   : > { %4983 = vrcp.f32 %v2839_v27 }
 0x594   : > { %3971 = vst [vmem:[%s5788_s24 + $0x2d8] sm:$0xff] %v6773_v37  ;;  %3970 = vst [vmem:[%s5788_s24 + $0x2d0] sm:$0xff] %v6776_v53 }
 0x595   : > { %v4980_v44 = vpop.eup %4979 }
 0x596   : > { %v2845_v0 = vpop.xlane.xlu1 %2844  ;;  %v6783_v5 = vmul.f32 %v4980_v44, %v6544_v47  ;;  %v6786_v25 = vmul.f32 %v4980_v44, %v6540_v2 }
 0x597   : > { %4985 = vrcp.f32 %v2845_v0 }
 0x598   : > { %3975 = vst [vmem:[%s5788_s24 + $0x2f8] sm:$0xff] %v6783_v5  ;;  %3974 = vst [vmem:[%s5788_s24 + $0x2f0] sm:$0xff] %v6786_v25 }
 0x599   : > { %v4982_v45 = vpop.eup %4981 }
 0x59a   : > { %v2851_v26 = vpop.xlane.xlu1 %2850  ;;  %v6793_v43 = vmul.f32 %v4982_v45, %v6552_v35  ;;  %v6796_v52 = vmul.f32 %v4982_v45, %v6548_v42 }
 0x59b   : > { %4987 = vrcp.f32 %v2851_v26 }
 0x59c   : > { %3979 = vst [vmem:[%s5788_s24 + $0x318] sm:$0xff] %v6793_v43  ;;  %3978 = vst [vmem:[%s5788_s24 + $0x310] sm:$0xff] %v6796_v52 }
 0x59d   : > { %v4984_v2 = vpop.eup %4983 }
 0x59e   : > { %v2857_v47 = vpop.xlane.xlu1 %2856  ;;  %v6803_v18 = vmul.f32 %v4984_v2, %v6566_v55  ;;  %v6806_v48 = vmul.f32 %v4984_v2, %v6560_v6 }
 0x59f   : > { %4989 = vrcp.f32 %v2857_v47 }
 0x5a0   : > { %3983 = vst [vmem:[%s5788_s24 + $0x338] sm:$0xff] %v6803_v18  ;;  %3982 = vst [vmem:[%s5788_s24 + $0x330] sm:$0xff] %v6806_v48 }
 0x5a1   : > { %v4986_v42 = vpop.eup %4985  ;;  %v2809_v35 = vpop.xlane.xlu0 %2808 }
 0x5a2   : > { %4991 = vrcp.f32 %v2809_v35  ;;  %v6813_v33 = vmul.f32 %v4986_v42, %v6578_v20  ;;  %v6816_v22 = vmul.f32 %v4986_v42, %v6574_v59 }
 0x5a4   : > { %3987 = vst [vmem:[%s5788_s24 + $0x358] sm:$0xff] %v6813_v33  ;;  %3986 = vst [vmem:[%s5788_s24 + $0x350] sm:$0xff] %v6816_v22 }
 0x5a5   : > { %v4988_v6 = vpop.eup %4987  ;;  %v2812_v55 = vpop.xlane.xlu0 %2811 }
 0x5a6   : > { %v2869_v9 = vpop.xlane.xlu1 %2868  ;;  %4993 = vrcp.f32 %v2812_v55  ;;  %v6823_v19 = vmul.f32 %v4988_v6, %v6592_v16  ;;  %v6826_v12 = vmul.f32 %v4988_v6, %v6586_v17  ;;  %v7277_v6 = vld [vmem:[#allocation5_spill] sm:$0xff] }
 0x5a7   : > { %4995 = vrcp.f32 %v2869_v9 }
 0x5a8   : > { %3991 = vst [vmem:[%s5788_s24 + $0x378] sm:$0xff] %v6823_v19  ;;  %3990 = vst [vmem:[%s5788_s24 + $0x370] sm:$0xff] %v6826_v12 }
 0x5a9   : > { %v4990_v59 = vpop.eup %4989  ;;  %v2818_v20 = vpop.xlane.xlu0 %2817 }
 0x5aa   : > { %v2863_v46 = vpop.xlane.xlu1 %2862  ;;  %4997 = vrcp.f32 %v2818_v20  ;;  %v6833_v13 = vmul.f32 %v4990_v59, %v6598_v10  ;;  %v6836_v16 = vmul.f32 %v4990_v59, %v6594_v40 }
 0x5ab   : > { %4999 = vrcp.f32 %v2863_v46 }
 0x5ac   : > { %v4992_v17 = vpop.eup %4991  ;;  %3995 = vst [vmem:[%s5788_s24 + $0x398] sm:$0xff] %v6833_v13  ;;  %3994 = vst [vmem:[%s5788_s24 + $0x390] sm:$0xff] %v6836_v16 }
 0x5ad   : > { %v2824_v51 = vpop.xlane.xlu0 %2823  ;;  %v2927_v15 = vmul.f32 %v4992_v17, %v6608_v23  ;;  %v2926_v56 = vmul.f32 %v4992_v17, %v6606_v14 }
 0x5ae   : > { %v2875_v21 = vpop.xlane.xlu1 %2874  ;;  %5001 = vrcp.f32 %v2824_v51 }
 0x5af   : > { %5003 = vrcp.f32 %v2875_v21  ;;  %3963 = vst [vmem:[%s5788_s24 + $0x298] sm:$0xff] %v2927_v15  ;;  %v3046_v40 = vpack.c.bf16 %v2927_v15, %v6753_v49  ;;  %3962 = vst [vmem:[%s5788_s24 + $0x290] sm:$0xff] %v2926_v56  ;;  %v3045_v10 = vpack.c.bf16 %v2926_v56, %v6756_v57 }
 0x5b0   : > { %v4994_v60 = vpop.eup %4993 }
 0x5b1   : > { %v4996_v29 = vpop.eup %4995  ;;  %v2830_v27 = vpop.xlane.xlu0 %2829  ;;  %3261 = vmatprep.mubr.bf16.mxu0 %v3046_v40  ;;  %v2929_v23 = vmul.f32 %v4994_v60, %v6616_v1  ;;  %v2928_v14 = vmul.f32 %v4994_v60, %v6612_v41 }
 0x5b2   : > { %v6851_v44 = vmul.f32 %v4996_v29, %v6626_v63  ;;  %5005 = vrcp.f32 %v2830_v27  ;;  %3262 = vmatmul.mubr.bf16.gmra.mrb[80].mxu0 %v3045_v10  ;;  %v6854_v49 = vmul.f32 %v4996_v29, %v6630_v50  ;;  %v7279_v27 = vld [vmem:[#allocation8_spill] sm:$0xff] }
 0x5b3   : > { %3965 = vst [vmem:[%s5788_s24 + $0x2a8] sm:$0xff] %v2929_v23  ;;  %v3048_v57 = vpack.c.bf16 %v6763_v38, %v2929_v23  ;;  %3964 = vst [vmem:[%s5788_s24 + $0x2a0] sm:$0xff] %v2928_v14  ;;  %v3047_v2 = vpack.c.bf16 %v6766_v61, %v2928_v14 }
 0x5b4   : > { %v4998_v0 = vpop.eup %4997  ;;  %4002 = vst [vmem:[%s5788_s24 + $0x3d0] sm:$0xff] %v6851_v44  ;;  %4003 = vst [vmem:[%s5788_s24 + $0x3d8] sm:$0xff] %v6854_v49 }
 0x5b5   : > { %v5000_v41 = vpop.eup %4999  ;;  %v2836_v1 = vpop.xlane.xlu0 %2835  ;;  %3269 = vmatprep.mubr.bf16.mxu0 %v3048_v57  ;;  %v2933_v63 = vmul.f32 %v4998_v0, %v6624_v7  ;;  %v2932_v50 = vmul.f32 %v4998_v0, %v6620_v36  ;;  %v7281_v0 = vld [vmem:[#allocation10_spill] sm:$0xff] }
 0x5b6   : > { %5007 = vrcp.f32 %v2836_v1  ;;  %v6866_v45 = vmul.f32 %v5000_v41, %v6640_v8  ;;  %v6869_v38 = vmul.f32 %v5000_v41, %v6634_v4 }
 0x5b7   : > { %3969 = vst [vmem:[%s5788_s24 + $0x2c8] sm:$0xff] %v2933_v63  ;;  %3968 = vst [vmem:[%s5788_s24 + $0x2c0] sm:$0xff] %v2932_v50  ;;  %v3050_v8 = vpack.c.bf16 %v6773_v37, %v2933_v63 }
 0x5b8   : > { %v5002_v26 = vpop.eup %5001  ;;  %3999 = vst [vmem:[%s5788_s24 + $0x3b8] sm:$0xff] %v6866_v45  ;;  %3998 = vst [vmem:[%s5788_s24 + $0x3b0] sm:$0xff] %v6869_v38 }
 0x5b9   : > { %v5004_v36 = vpop.eup %5003  ;;  %v2842_v7 = vpop.xlane.xlu0 %2841  ;;  %v2937_v4 = vmul.f32 %v5002_v26, %v6646_v54  ;;  %v2936_v47 = vmul.f32 %v5002_v26, %v6642_v28  ;;  %v7276_v28 = vld [vmem:[#allocation7_spill] sm:$0xff]  ;;  %v7283_v26 = vld [vmem:[#allocation13_spill] sm:$0xff] }
 0x5ba   : > { %5009 = vrcp.f32 %v2842_v7  ;;  %3270 = vmatmul.mubr.bf16.gmra.mrb[84].mxu0 %v3047_v2  ;;  %v6882_v61 = vmul.f32 %v5004_v36, %v6656_v24  ;;  %v6885_v42 = vmul.f32 %v5004_v36, %v6650_v62  ;;  %v3049_v24 = vpack.c.bf16 %v6776_v53, %v2932_v50  ;;  %v7282_v50 = vld [vmem:[#allocation11_spill] sm:$0xff] }
 0x5bb   : > { %3277 = vmatprep.mubr.bf16.mxu0 %v3050_v8  ;;  %3973 = vst [vmem:[%s5788_s24 + $0x2e8] sm:$0xff] %v2937_v4  ;;  %3972 = vst [vmem:[%s5788_s24 + $0x2e0] sm:$0xff] %v2936_v47  ;;  %v3052_v59 = vpack.c.bf16 %v6783_v5, %v2937_v4 }
 0x5bc   : > { %v5006_v35 = vpop.eup %5005  ;;  %4007 = vst [vmem:[%s5788_s24 + $0x3f8] sm:$0xff] %v6882_v61  ;;  %4006 = vst [vmem:[%s5788_s24 + $0x3f0] sm:$0xff] %v6885_v42 }
 0x5bd   : > { %v2848_v54 = vpop.xlane.xlu0 %2847  ;;  %v2941_v37 = vmul.f32 %v5006_v35, %v7276_v28  ;;  %v2940_v55 = vmul.f32 %v5006_v35, %v7277_v6 }
 0x5be   : > { %5011 = vrcp.f32 %v2848_v54 }
 0x5bf   : > { %3977 = vst [vmem:[%s5788_s24 + $0x308] sm:$0xff] %v2941_v37  ;;  %3976 = vst [vmem:[%s5788_s24 + $0x300] sm:$0xff] %v2940_v55  ;;  %v3054_v15 = vpack.c.bf16 %v6793_v43, %v2941_v37 }
 0x5c0   : > { %v5008_v62 = vpop.eup %5007 }
 0x5c1   : > { %v2854_v9 = vpop.xlane.xlu0 %2853  ;;  %v2945_v20 = vmul.f32 %v5008_v62, %v6676_v39  ;;  %v2944_v46 = vmul.f32 %v5008_v62, %v6672_v34  ;;  %v3051_v34 = vpack.c.bf16 %v6786_v25, %v2936_v47 }
 0x5c2   : > { %5013 = vrcp.f32 %v2854_v9  ;;  %3278 = vmatmul.mubr.bf16.gmra.mrb[88].mxu0 %v3049_v24 }
 0x5c3   : > { %3285 = vmatprep.mubr.bf16.mxu0 %v3052_v59  ;;  %3981 = vst [vmem:[%s5788_s24 + $0x328] sm:$0xff] %v2945_v20  ;;  %3980 = vst [vmem:[%s5788_s24 + $0x320] sm:$0xff] %v2944_v46  ;;  %v3056_v29 = vpack.c.bf16 %v6803_v18, %v2945_v20  ;;  %v3055_v1 = vpack.c.bf16 %v6806_v48, %v2944_v46 }
 0x5c4   : > { %v5010_v17 = vpop.eup %5009 }
 0x5c5   : > { %v2866_v51 = vpop.xlane.xlu0 %2865  ;;  %v2949_v21 = vmul.f32 %v5010_v17, %v6684_v30  ;;  %v2948_v53 = vmul.f32 %v5010_v17, %v6680_v3 }
 0x5c6   : > { %5015 = vrcp.f32 %v2866_v51 }
 0x5c7   : > { %3985 = vst [vmem:[%s5788_s24 + $0x348] sm:$0xff] %v2949_v21  ;;  %3984 = vst [vmem:[%s5788_s24 + $0x340] sm:$0xff] %v2948_v53  ;;  %v3058_v63 = vpack.c.bf16 %v6813_v33, %v2949_v21  ;;  %v3057_v7 = vpack.c.bf16 %v6816_v22, %v2948_v53 }
 0x5c8   : > { %v5012_v5 = vpop.eup %5011 }
 0x5c9   : > { %v2860_v39 = vpop.xlane.xlu0 %2859  ;;  %v2953_v56 = vmul.f32 %v5012_v5, %v6692_v11  ;;  %v2952_v40 = vmul.f32 %v5012_v5, %v6688_v58  ;;  %v3053_v58 = vpack.c.bf16 %v6796_v52, %v2940_v55  ;;  %v7278_v11 = vld [vmem:[#allocation6_spill] sm:$0xff] }
 0x5ca   : > { %5017 = vrcp.f32 %v2860_v39  ;;  %3286 = vmatmul.mubr.bf16.gmra.mrb[92].mxu0 %v3051_v34  ;;  %v7280_v52 = vld [vmem:[#allocation14_spill] sm:$0xff] }
 0x5cb   : > { %3293 = vmatprep.mubr.bf16.mxu0 %v3054_v15  ;;  %3989 = vst [vmem:[%s5788_s24 + $0x368] sm:$0xff] %v2953_v56  ;;  %3988 = vst [vmem:[%s5788_s24 + $0x360] sm:$0xff] %v2952_v40  ;;  %v3060_v48 = vpack.c.bf16 %v6823_v19, %v2953_v56  ;;  %v3059_v33 = vpack.c.bf16 %v6826_v12, %v2952_v40 }
 0x5cc   : > { %v5014_v3 = vpop.eup %5013 }
 0x5cd   : > { %v2872_v30 = vpop.xlane.xlu0 %2871  ;;  %v2957_v10 = vmul.f32 %v5014_v3, %v6698_v32  ;;  %v2956_v25 = vmul.f32 %v5014_v3, %v6694_v31 }
 0x5ce   : > { %5019 = vrcp.f32 %v2872_v30 }
 0x5cf   : > { %3993 = vst [vmem:[%s5788_s24 + $0x388] sm:$0xff] %v2957_v10  ;;  %3992 = vst [vmem:[%s5788_s24 + $0x380] sm:$0xff] %v2956_v25  ;;  %v3062_v8 = vpack.c.bf16 %v6833_v13, %v2957_v10  ;;  %v3061_v4 = vpack.c.bf16 %v6836_v16, %v2956_v25 }
 0x5d0   : > { %v5016_v43 = vpop.eup %5015 }
 0x5d1   : > { %v2964_v60 = vmul.f32 %v5016_v43, %v7278_v11  ;;  %v2965_v23 = vmul.f32 %v5016_v43, %v7279_v27 }
 0x5d2   : > { %3294 = vmatmul.mubr.bf16.gmra.mrb[96].mxu0 %v3053_v58 }
 0x5d3   : > { %4000 = vst [vmem:[%s5788_s24 + $0x3c0] sm:$0xff] %v2964_v60  ;;  %3301 = vmatprep.mubr.bf16.mxu0 %v3056_v29  ;;  %4001 = vst [vmem:[%s5788_s24 + $0x3c8] sm:$0xff] %v2965_v23  ;;  %v3066_v31 = vpack.c.bf16 %v6854_v49, %v2965_v23  ;;  %v3065_v32 = vpack.c.bf16 %v6851_v44, %v2964_v60 }
 0x5d4   : > { %v5018_v14 = vpop.eup %5017 }
 0x5d5   : > { %3341 = vmatprep.mubr.bf16.mxu1 %v3066_v31  ;;  %v2961_v57 = vmul.f32 %v5018_v14, %v7280_v52  ;;  %v2960_v41 = vmul.f32 %v5018_v14, %v7281_v0 }
 0x5d6   : > { %3342 = vmatmul.mubr.bf16.vlgmr.msra.gmra.mrb[128].mxu1 %v3065_v32 }
 0x5d7   : > { %3997 = vst [vmem:[%s5788_s24 + $0x3a8] sm:$0xff] %v2961_v57  ;;  %3996 = vst [vmem:[%s5788_s24 + $0x3a0] sm:$0xff] %v2960_v41  ;;  %v3064_v47 = vpack.c.bf16 %v6866_v45, %v2961_v57 }
 0x5d8   : > { %v5020_v18 = vpop.eup %5019 }
 0x5d9   : > { %v2969_v49 = vmul.f32 %v5020_v18, %v7282_v50  ;;  %v2968_v2 = vmul.f32 %v5020_v18, %v7283_v26 }
 0x5da   : > { %3302 = vmatmul.mubr.bf16.gmra.mrb[100].mxu0 %v3055_v1 }
 0x5db   : > { %3309 = vmatprep.mubr.bf16.mxu0 %v3058_v63  ;;  %4005 = vst [vmem:[%s5788_s24 + $0x3e8] sm:$0xff] %v2969_v49  ;;  %v3068_v44 = vpack.c.bf16 %v6882_v61, %v2969_v49  ;;  %4004 = vst [vmem:[%s5788_s24 + $0x3e0] sm:$0xff] %v2968_v2  ;;  %v3067_v36 = vpack.c.bf16 %v6885_v42, %v2968_v2  ;;  %v3063_v61 = vpack.c.bf16 %v6869_v38, %v2960_v41 }
 0x5dd   : > { %3349 = vmatprep.mubr.bf16.mxu1 %v3068_v44 }
 0x5de   : > { %3350 = vmatmul.mubr.bf16.gmra.mrb[132].mxu1 %v3067_v36 }
 0x5e2   : > { %3310 = vmatmul.mubr.bf16.gmra.mrb[104].mxu0 %v3057_v7 }
 0x5e3   : > { %3317 = vmatprep.mubr.bf16.mxu0 %v3060_v48 }
 0x5ea   : > { %3318 = vmatmul.mubr.bf16.gmra.mrb[108].mxu0 %v3059_v33 }
 0x5eb   : > { %3325 = vmatprep.mubr.bf16.mxu0 %v3062_v8 }
 0x5f2   : > { %3326 = vmatmul.mubr.bf16.gmra.mrb[112].mxu0 %v3061_v4 }
 0x5f3   : > { %3333 = vmatprep.mubr.bf16.mxu0 %v3064_v47 }
 0x5fa   : > { %3334 = vmatmul.mubr.bf16.gmra.mrb[116].mxu0 %v3063_v61 }
 0x648   : > { %v4354_v22 = vpop.f32.mrb[64].mxu0 }
 0x649   : > { %v4355_v42 = vpop.f32.mrb[65].mxu0 }
 0x64a   : > { %v4356_v19 = vadd.f32 %v4355_v42, %v4354_v22  ;;  %v4357_v35 = vpop.f32.mrb[66].mxu0 }
 0x64b   : > { %v4358_v54 = vpop.f32.mrb[67].mxu0 }
 0x64c   : > { %v4097_v28 = vpack.c.bf16 %v4356_v19, %v4356_v19  ;;  %v4359_v12 = vadd.f32 %v4358_v54, %v4357_v35 }
 0x64e   : > { %v4098_v37 = vpack.c.bf16 %v4359_v12, %v4359_v12  ;;  %3454 = vrot.lane.b32.xlu0 %v4097_v28, %s5102_s30 }
 0x650   : > { %v4360_v13 = vpop.f32.mrb[68].mxu0  ;;  %3456 = vrot.lane.b32.xlu1 %v4098_v37, %s5102_s30 }
 0x651   : > { %v4361_v16 = vpop.f32.mrb[69].mxu0 }
 0x652   : > { %v4362_v45 = vadd.f32 %v4361_v16, %v4360_v13  ;;  %v4363_v6 = vpop.f32.mrb[70].mxu0 }
 0x653   : > { %v4364_v55 = vpop.f32.mrb[71].mxu0 }
 0x654   : > { %v4099_v38 = vpack.c.bf16 %v4362_v45, %v4362_v45  ;;  %v4365_v62 = vadd.f32 %v4364_v55, %v4363_v6 }
 0x656   : > { %3458 = vrot.lane.b32.xlu1 %v4099_v38, %s5102_s30  ;;  %v4100_v24 = vpack.c.bf16 %v4365_v62, %v4365_v62 }
 0x658   : > { %v4366_v9 = vpop.f32.mrb[72].mxu0 }
 0x659   : > { %v4367_v59 = vpop.f32.mrb[73].mxu0 }
 0x65a   : > { %v4368_v20 = vadd.f32 %v4367_v59, %v4366_v9  ;;  %v4369_v46 = vpop.f32.mrb[74].mxu0  ;;  %3460 = vrot.lane.b32.xlu1 %v4100_v24, %s5102_s30 }
 0x65b   : > { %v4370_v17 = vpop.f32.mrb[75].mxu0 }
 0x65c   : > { %v4101_v51 = vpack.c.bf16 %v4368_v20, %v4368_v20  ;;  %v4371_v21 = vadd.f32 %v4370_v17, %v4369_v46 }
 0x65e   : > { %v4102_v53 = vpack.c.bf16 %v4371_v21, %v4371_v21  ;;  %3462 = vrot.lane.b32.xlu0 %v4101_v51, %s5102_s30 }
 0x660   : > { %v4372_v5 = vpop.f32.mrb[76].mxu0  ;;  %3464 = vrot.lane.b32.xlu1 %v4102_v53, %s5102_s30 }
 0x661   : > { %v4373_v34 = vpop.f32.mrb[77].mxu0 }
 0x662   : > { %v4374_v39 = vadd.f32 %v4373_v34, %v4372_v5  ;;  %v4375_v15 = vpop.f32.mrb[78].mxu0 }
 0x663   : > { %v4376_v56 = vpop.f32.mrb[79].mxu0 }
 0x664   : > { %v4103_v40 = vpack.c.bf16 %v4374_v39, %v4374_v39  ;;  %v4377_v3 = vadd.f32 %v4376_v56, %v4375_v15 }
 0x666   : > { %v4104_v30 = vpack.c.bf16 %v4377_v3, %v4377_v3  ;;  %3466 = vrot.lane.b32.xlu0 %v4103_v40, %s5102_s30 }
 0x668   : > { %3468 = vrot.lane.b32.xlu1 %v4104_v30, %s5102_s30 }
 0x685   : > { %v4378_v10 = vpop.f32.mrb[80].mxu0 }
 0x686   : > { %v4379_v25 = vpop.f32.mrb[81].mxu0 }
 0x687   : > { %v4380_v43 = vadd.f32 %v4379_v25, %v4378_v10  ;;  %v4381_v58 = vpop.f32.mrb[82].mxu0 }
 0x688   : > { %v4382_v11 = vpop.f32.mrb[83].mxu0 }
 0x689   : > { %v4105_v60 = vpack.c.bf16 %v4380_v43, %v4380_v43  ;;  %v4383_v29 = vadd.f32 %v4382_v11, %v4381_v58 }
 0x68b   : > { %v4106_v27 = vpack.c.bf16 %v4383_v29, %v4383_v29  ;;  %3470 = vrot.lane.b32.xlu0 %v4105_v60, %s5102_s30 }
 0x68d   : > { %3472 = vrot.lane.b32.xlu1 %v4106_v27, %s5102_s30  ;;  %v4384_v23 = vpop.f32.mrb[84].mxu0 }
 0x68e   : > { %v4385_v31 = vpop.f32.mrb[85].mxu0 }
 0x68f   : > { %v4386_v32 = vadd.f32 %v4385_v31, %v4384_v23  ;;  %v4387_v14 = vpop.f32.mrb[86].mxu0 }
 0x690   : > { %v4388_v52 = vpop.f32.mrb[87].mxu0 }
 0x691   : > { %v4107_v57 = vpack.c.bf16 %v4386_v32, %v4386_v32  ;;  %v4389_v0 = vadd.f32 %v4388_v52, %v4387_v14 }
 0x693   : > { %v4108_v41 = vpack.c.bf16 %v4389_v0, %v4389_v0  ;;  %3474 = vrot.lane.b32.xlu0 %v4107_v57, %s5102_s30 }
 0x695   : > { %3476 = vrot.lane.b32.xlu1 %v4108_v41, %s5102_s30  ;;  %v4390_v18 = vpop.f32.mrb[88].mxu0 }
 0x696   : > { %v4391_v1 = vpop.f32.mrb[89].mxu0 }
 0x697   : > { %v4392_v63 = vadd.f32 %v4391_v1, %v4390_v18  ;;  %v4393_v50 = vpop.f32.mrb[90].mxu0 }
 0x698   : > { %v4394_v49 = vpop.f32.mrb[91].mxu0 }
 0x699   : > { %v4109_v26 = vpack.c.bf16 %v4392_v63, %v4392_v63  ;;  %v4395_v2 = vadd.f32 %v4394_v49, %v4393_v50 }
 0x69b   : > { %v4110_v44 = vpack.c.bf16 %v4395_v2, %v4395_v2  ;;  %3478 = vrot.lane.b32.xlu0 %v4109_v26, %s5102_s30 }
 0x69d   : > { %3480 = vrot.lane.b32.xlu1 %v4110_v44, %s5102_s30  ;;  %v4396_v36 = vpop.f32.mrb[92].mxu0 }
 0x69e   : > { %v4397_v7 = vpop.f32.mrb[93].mxu0 }
 0x69f   : > { %v4398_v48 = vadd.f32 %v4397_v7, %v4396_v36  ;;  %v4399_v33 = vpop.f32.mrb[94].mxu0 }
 0x6a0   : > { %v4400_v8 = vpop.f32.mrb[95].mxu0 }
 0x6a1   : > { %v4111_v4 = vpack.c.bf16 %v4398_v48, %v4398_v48  ;;  %v4401_v47 = vadd.f32 %v4400_v8, %v4399_v33 }
 0x6a3   : > { %v4112_v61 = vpack.c.bf16 %v4401_v47, %v4401_v47  ;;  %3482 = vrot.lane.b32.xlu0 %v4111_v4, %s5102_s30 }
 0x6a5   : > { %3484 = vrot.lane.b32.xlu1 %v4112_v61, %s5102_s30  ;;  %v4402_v22 = vpop.f32.mrb[96].mxu0 }
 0x6a6   : > { %v4403_v42 = vpop.f32.mrb[97].mxu0 }
 0x6a7   : > { %v4404_v19 = vadd.f32 %v4403_v42, %v4402_v22  ;;  %v4405_v35 = vpop.f32.mrb[98].mxu0 }
 0x6a8   : > { %v4406_v54 = vpop.f32.mrb[99].mxu0 }
 0x6a9   : > { %v4113_v28 = vpack.c.bf16 %v4404_v19, %v4404_v19  ;;  %v4407_v12 = vadd.f32 %v4406_v54, %v4405_v35  ;;  %v4438_v37 = vpop.f32.mrb[128].mxu1 }
 0x6aa   : > { %v4439_v13 = vpop.f32.mrb[129].mxu1 }
 0x6ab   : > { %v4114_v16 = vpack.c.bf16 %v4407_v12, %v4407_v12  ;;  %v6960_v45 = vadd.f32 %v4439_v13, %v4438_v37  ;;  %3486 = vrot.lane.b32.xlu0 %v4113_v28, %s5102_s30  ;;  %v4441_v6 = vpop.f32.mrb[130].mxu1 }
 0x6ac   : > { %v4442_v55 = vpop.f32.mrb[131].mxu1 }
 0x6ad   : > { %v6963_v38 = vadd.f32 %v4442_v55, %v4441_v6  ;;  %3488 = vrot.lane.b32.xlu1 %v4114_v16, %s5102_s30  ;;  %v4408_v62 = vpop.f32.mrb[100].mxu0 }
 0x6ae   : > { %v4409_v24 = vpop.f32.mrb[101].mxu0 }
 0x6af   : > { %v4410_v9 = vadd.f32 %v4409_v24, %v4408_v62  ;;  %v4411_v59 = vpop.f32.mrb[102].mxu0 }
 0x6b0   : > { %v4412_v20 = vpop.f32.mrb[103].mxu0 }
 0x6b1   : > { %v4115_v46 = vpack.c.bf16 %v4410_v9, %v4410_v9  ;;  %v4413_v17 = vadd.f32 %v4412_v20, %v4411_v59  ;;  %v4444_v51 = vpop.f32.mrb[132].mxu1 }
 0x6b2   : > { %v4445_v21 = vpop.f32.mrb[133].mxu1 }
 0x6b3   : > { %v4116_v53 = vpack.c.bf16 %v4413_v17, %v4413_v17  ;;  %v6966_v5 = vadd.f32 %v4445_v21, %v4444_v51  ;;  %3490 = vrot.lane.b32.xlu0 %v4115_v46, %s5102_s30  ;;  %v4447_v34 = vpop.f32.mrb[134].mxu1 }
 0x6b4   : > { %v4448_v39 = vpop.f32.mrb[135].mxu1 }
 0x6b5   : > { %v6969_v15 = vadd.f32 %v4448_v39, %v4447_v34  ;;  %3492 = vrot.lane.b32.xlu1 %v4116_v53, %s5102_s30  ;;  %v4414_v56 = vpop.f32.mrb[104].mxu0 }
 0x6b6   : > { %v4415_v40 = vpop.f32.mrb[105].mxu0 }
 0x6b7   : > { %v4416_v3 = vadd.f32 %v4415_v40, %v4414_v56  ;;  %v4417_v30 = vpop.f32.mrb[106].mxu0 }
 0x6b8   : > { %v4418_v10 = vpop.f32.mrb[107].mxu0 }
 0x6b9   : > { %v4117_v25 = vpack.c.bf16 %v4416_v3, %v4416_v3  ;;  %v4419_v43 = vadd.f32 %v4418_v10, %v4417_v30 }
 0x6bb   : > { %v4118_v58 = vpack.c.bf16 %v4419_v43, %v4419_v43  ;;  %3494 = vrot.lane.b32.xlu0 %v4117_v25, %s5102_s30 }
 0x6bd   : > { %3496 = vrot.lane.b32.xlu1 %v4118_v58, %s5102_s30  ;;  %v4420_v11 = vpop.f32.mrb[108].mxu0 }
 0x6be   : > { %v4421_v60 = vpop.f32.mrb[109].mxu0 }
 0x6bf   : > { %v4422_v29 = vadd.f32 %v4421_v60, %v4420_v11  ;;  %v4423_v27 = vpop.f32.mrb[110].mxu0 }
 0x6c0   : > { %v3455_v23 = vpop.permute.xlu0 %3454  ;;  %v4424_v31 = vpop.f32.mrb[111].mxu0 }
 0x6c1   : > { %v4119_v32 = vpack.c.bf16 %v4422_v29, %v4422_v29  ;;  %3551 = vst.msk [vmem:[%s6125_s5] sm:$0xf] %vm3550_vm2, %v3455_v23  ;;  %v4425_v14 = vadd.f32 %v4424_v31, %v4423_v27 }
 0x6c2   : > { %v3457_v52 = vpop.permute.xlu1 %3456 }
 0x6c3   : > { %v4120_v57 = vpack.c.bf16 %v4425_v14, %v4425_v14  ;;  %3552 = vst.msk [vmem:[%s6125_s5 + $0x4] sm:$0xf] %vm3550_vm2, %v3457_v52  ;;  %3498 = vrot.lane.b32.xlu0 %v4119_v32, %s5102_s30 }
 0x6c5   : > { %3500 = vrot.lane.b32.xlu1 %v4120_v57, %s5102_s30  ;;  %v4426_v0 = vpop.f32.mrb[112].mxu0 }
 0x6c6   : > { %v4427_v41 = vpop.f32.mrb[113].mxu0 }
 0x6c7   : > { %v4428_v18 = vadd.f32 %v4427_v41, %v4426_v0  ;;  %v4429_v1 = vpop.f32.mrb[114].mxu0 }
 0x6c8   : > { %v4430_v63 = vpop.f32.mrb[115].mxu0  ;;  %v3459_v50 = vpop.permute.xlu1 %3458 }
 0x6c9   : > { %v4121_v49 = vpack.c.bf16 %v4428_v18, %v4428_v18  ;;  %v4431_v26 = vadd.f32 %v4430_v63, %v4429_v1  ;;  %3553 = vst.msk [vmem:[%s6125_s5 + $0x8] sm:$0xf] %vm3550_vm2, %v3459_v50 }
 0x6cb   : > { %v4122_v2 = vpack.c.bf16 %v4431_v26, %v4431_v26  ;;  %3502 = vrot.lane.b32.xlu0 %v4121_v49, %s5102_s30 }
 0x6cc   : > { %v3461_v44 = vpop.permute.xlu1 %3460 }
 0x6cd   : > { %3554 = vst.msk [vmem:[%s6125_s5 + $0xc] sm:$0xf] %vm3550_vm2, %v3461_v44  ;;  %3504 = vrot.lane.b32.xlu1 %v4122_v2, %s5102_s30  ;;  %v4432_v36 = vpop.f32.mrb[116].mxu0 }
 0x6ce   : > { %v4433_v7 = vpop.f32.mrb[117].mxu0 }
 0x6cf   : > { %v4434_v48 = vadd.f32 %v4433_v7, %v4432_v36  ;;  %v4435_v33 = vpop.f32.mrb[118].mxu0 }
 0x6d0   : > { %v3463_v8 = vpop.permute.xlu0 %3462  ;;  %v4436_v4 = vpop.f32.mrb[119].mxu0 }
 0x6d1   : > { %v4123_v47 = vpack.c.bf16 %v4434_v48, %v4434_v48  ;;  %3555 = vst.msk [vmem:[%s6125_s5 + $0x10] sm:$0xf] %vm3550_vm2, %v3463_v8  ;;  %v4437_v61 = vadd.f32 %v4436_v4, %v4435_v33 }
 0x6d2   : > { %v3465_v22 = vpop.permute.xlu1 %3464 }
 0x6d3   : > { %v4124_v42 = vpack.c.bf16 %v4437_v61, %v4437_v61  ;;  %3556 = vst.msk [vmem:[%s6125_s5 + $0x14] sm:$0xf] %vm3550_vm2, %v3465_v22  ;;  %3506 = vrot.lane.b32.xlu0 %v4123_v47, %s5102_s30 }
 0x6d4   : > { %5034 = shalt.err (!%p5031_p5)
}
 0x6d5   : > { %s5035_s21 = scalar_lea.hbm %s6991_s10, 16384  ;;  %s5039_s26 = scalar_lea.hbm %s7117_s4, 32768 }
 0x6d6   : > { %p5036_p6 = scmp.ne.s32.totalorder %s6991_s10, %s5035_s21  ;;  %p5040_p10 = scmp.lt.u32.totalorder %s6991_s10, %s7117_s4 }
 0x6d7   : > { %p5041_p11 = scmp.lt.u32.totalorder %s5039_s26, %s5035_s21  ;;  %p5043_p13 = scmp.lt.u32.totalorder %s5035_s21, %s6991_s10 }
 0x6d8   : > { %p5037_p7 = pnand %p5036_p6, %p5171_p4 }
 0x6d9   : > { %p5042_p12 = por %p5041_p11, %p5040_p10 }
 0x6da   : > { %p5038_p9 = pneg %p5037_p7 }
 0x6db   : > { %p5044_p0 = por %p5043_p13, %p5042_p12 }
 0x6dd   : > { %p5045_p1 = pnand %p5044_p0, %p5038_p9 }
 0x6df   : > { %5048 = shalt.err (!%p5045_p1)
}
 0x6e0   : > { %s5104_s8 = smov 256   ;;  %s5105_s9 = smov 16   ;;  %v4125_v19 = vpack.c.bf16 %v6960_v45, %v6960_v45  ;;  %3508 = vrot.lane.b32.xlu1 %v4124_v42, %s5102_s30  ;;  %v4126_v35 = vpack.c.bf16 %v6963_v38, %v6963_v38  ;;  %v3467_v54 = vpop.permute.xlu0 %3466  ;;  %v4127_v28 = vpack.c.bf16 %v6966_v5, %v6966_v5  ;;  %v3469_v12 = vpop.permute.xlu1 %3468  ;;  %v4128_v37 = vpack.c.bf16 %v6969_v15, %v6969_v15 }
 0x6e1   : > { %4482 = dma.vmem_to_hbm [thread:$0]  (%p5171_p4), %s6995_s7, 16384, %s6991_s10, %s7002_s18, %s5104_s8, %s5104_s8, %s5105_s9  }
 0x6e2   : > { %3510 = vrot.lane.b32.xlu0 %v4125_v19, %s5102_s30  ;;  %3557 = vst.msk [vmem:[%s6125_s5 + $0x18] sm:$0xf] %vm3550_vm2, %v3467_v54  ;;  %3558 = vst.msk [vmem:[%s6125_s5 + $0x1c] sm:$0xf] %vm3550_vm2, %v3469_v12 }
 0x6e4   : > { %3512 = vrot.lane.b32.xlu1 %v4126_v35, %s5102_s30 }
 0x6e6   : > { %3514 = vrot.lane.b32.xlu0 %v4127_v28, %s5102_s30 }
 0x6e8   : > { %3516 = vrot.lane.b32.xlu1 %v4128_v37, %s5102_s30 }
 0x6fd   : > { %v3471_v13 = vpop.permute.xlu0 %3470 }
 0x6fe   : > { %3559 = vst.msk [vmem:[%s6125_s5 + $0x20] sm:$0xf] %vm3550_vm2, %v3471_v13 }
 0x6ff   : > { %v3473_v16 = vpop.permute.xlu1 %3472 }
 0x700   : > { %3560 = vst.msk [vmem:[%s6125_s5 + $0x24] sm:$0xf] %vm3550_vm2, %v3473_v16 }
 0x705   : > { %v3475_v45 = vpop.permute.xlu0 %3474 }
 0x706   : > { %3561 = vst.msk [vmem:[%s6125_s5 + $0x28] sm:$0xf] %vm3550_vm2, %v3475_v45 }
 0x707   : > { %v3477_v6 = vpop.permute.xlu1 %3476 }
 0x708   : > { %3562 = vst.msk [vmem:[%s6125_s5 + $0x2c] sm:$0xf] %vm3550_vm2, %v3477_v6 }
 0x70d   : > { %v3479_v55 = vpop.permute.xlu0 %3478 }
 0x70e   : > { %3563 = vst.msk [vmem:[%s6125_s5 + $0x30] sm:$0xf] %vm3550_vm2, %v3479_v55 }
 0x70f   : > { %v3481_v38 = vpop.permute.xlu1 %3480 }
 0x710   : > { %3564 = vst.msk [vmem:[%s6125_s5 + $0x34] sm:$0xf] %vm3550_vm2, %v3481_v38 }
 0x715   : > { %v3483_v62 = vpop.permute.xlu0 %3482 }
 0x716   : > { %3565 = vst.msk [vmem:[%s6125_s5 + $0x38] sm:$0xf] %vm3550_vm2, %v3483_v62 }
 0x717   : > { %v3485_v24 = vpop.permute.xlu1 %3484 }
 0x718   : > { %3566 = vst.msk [vmem:[%s6125_s5 + $0x3c] sm:$0xf] %vm3550_vm2, %v3485_v24 }
 0x71d   : > { %v3487_v9 = vpop.permute.xlu0 %3486 }
 0x71e   : > { %3567 = vst.msk [vmem:[%s6125_s5 + $0x40] sm:$0xf] %vm3550_vm2, %v3487_v9 }
 0x71f   : > { %v3489_v59 = vpop.permute.xlu1 %3488 }
 0x720   : > { %3568 = vst.msk [vmem:[%s6125_s5 + $0x44] sm:$0xf] %vm3550_vm2, %v3489_v59 }
 0x725   : > { %v3491_v20 = vpop.permute.xlu0 %3490 }
 0x726   : > { %3569 = vst.msk [vmem:[%s6125_s5 + $0x48] sm:$0xf] %vm3550_vm2, %v3491_v20 }
 0x727   : > { %v3493_v46 = vpop.permute.xlu1 %3492 }
 0x728   : > { %3570 = vst.msk [vmem:[%s6125_s5 + $0x4c] sm:$0xf] %vm3550_vm2, %v3493_v46 }
 0x72d   : > { %v3495_v17 = vpop.permute.xlu0 %3494 }
 0x72e   : > { %3571 = vst.msk [vmem:[%s6125_s5 + $0x50] sm:$0xf] %vm3550_vm2, %v3495_v17 }
 0x72f   : > { %v3497_v51 = vpop.permute.xlu1 %3496 }
 0x730   : > { %3572 = vst.msk [vmem:[%s6125_s5 + $0x54] sm:$0xf] %vm3550_vm2, %v3497_v51 }
 0x735   : > { %v3499_v21 = vpop.permute.xlu0 %3498 }
 0x736   : > { %3573 = vst.msk [vmem:[%s6125_s5 + $0x58] sm:$0xf] %vm3550_vm2, %v3499_v21 }
 0x737   : > { %v3501_v53 = vpop.permute.xlu1 %3500 }
 0x738   : > { %3574 = vst.msk [vmem:[%s6125_s5 + $0x5c] sm:$0xf] %vm3550_vm2, %v3501_v53 }
 0x73d   : > { %v3503_v5 = vpop.permute.xlu0 %3502 }
 0x73e   : > { %3575 = vst.msk [vmem:[%s6125_s5 + $0x60] sm:$0xf] %vm3550_vm2, %v3503_v5 }
 0x73f   : > { %v3505_v34 = vpop.permute.xlu1 %3504 }
 0x740   : > { %3576 = vst.msk [vmem:[%s6125_s5 + $0x64] sm:$0xf] %vm3550_vm2, %v3505_v34 }
 0x745   : > { %v3507_v39 = vpop.permute.xlu0 %3506 }
 0x746   : > { %3577 = vst.msk [vmem:[%s6125_s5 + $0x68] sm:$0xf] %vm3550_vm2, %v3507_v39 }
 0x752   : > { %v3509_v15 = vpop.permute.xlu1 %3508 }
 0x753   : > { %3578 = vst.msk [vmem:[%s6125_s5 + $0x6c] sm:$0xf] %vm3550_vm2, %v3509_v15 }
 0x754   : > { %v3511_v56 = vpop.permute.xlu0 %3510 }
 0x755   : > { %3579 = vst.msk [vmem:[%s6125_s5 + $0x70] sm:$0xf] %vm3550_vm2, %v3511_v56 }
 0x756   : > { %v3513_v40 = vpop.permute.xlu1 %3512 }
 0x757   : > { %3580 = vst.msk [vmem:[%s6125_s5 + $0x74] sm:$0xf] %vm3550_vm2, %v3513_v40 }
 0x758   : > { %v3515_v3 = vpop.permute.xlu0 %3514 }
 0x759   : > { %3581 = vst.msk [vmem:[%s6125_s5 + $0x78] sm:$0xf] %vm3550_vm2, %v3515_v3 }
 0x75a   : > { %v3517_v30 = vpop.permute.xlu1 %3516 }
 0x75b   : > { %3582 = vst.msk [vmem:[%s6125_s5 + $0x7c] sm:$0xf] %vm3550_vm2, %v3517_v30 }
 0x75c PF: > { %p4488_p4 = scmp.ge.s32.totalorder %s5099_s20, 2  ;;  %s3649_s25 = sand.u32 1, %s5079_s15  }
 0x75d   : > { %s3650_s30 = scalar_lea.sflag [#allocation3], %s3649_s25 }
 0x75e   : > { %p4485_p2 = pnand %p4488_p4, %p5178_p8 }
 0x760   : > { %5074 = dma.done.wait (!%p4485_p2), %s3650_s30, 16384  }
 0x761   : > { %5076 = vsyncadd (!%p4485_p2), %s3650_s30, 4294950912  ;;  %s18_s20 = sadd.s32 1, %s5099_s20   ;;  %s7284_s15 = smov %s5083_s16 }
 0x762   : > { %p15_p3 = scmp.ge.s32.totalorder %s18_s20, 4   ;;  %s7285_s16 = smov %s5087_s17 }
 0x763   : > { %s7286_s17 = smov %s5184_s28  ;;  %s7287_s18 = smov %s5095_s19 }
 0x764   : > { %s7288_s19 = smov %s7290_s23  ;;  %17 = sbr.rel (!%p15_p3) target bundleno = 4 (0x4), region = 86 }
 0x76b   :  { %3655 = vsyncpa [#allocation3], 1 }
 0x76c   :  { %3657 = vsyncpa [#allocation3 + $0x1], 1 }

</bundles_post_ra>
